<compile_context>
chip_gen: v5e
topology: v5e:2x2
jax: 0.10.0
libtpu: 0.0.40
codegen_flags: <defaults>
</compile_context>

<pallas_src>
import functools

import jax
import jax.numpy as jnp
from jax.experimental import pallas as pl
from jax.experimental.pallas import tpu as pltpu

NNMLP = 600          # logical hidden width (matches the PyTorch module)
NNMLP_PAD = 640      # padded to a multiple of 128 lanes for tile-aligned matmuls
LANE = 128
SUBLANE = 8


def _round_up(x, m):
    return ((x + m - 1) // m) * m


def _cdiv(a, b):
    return (a + b - 1) // b


def _default_bf16_tanh():
    """bf16 EUP tanh path only on v6e / v7x; f32 tanh on v5e and older."""
    try:
        kind = jax.devices()[0].device_kind.lower()
    except Exception:
        return False
    return any(tag in kind for tag in ("v6", "v7", "7x"))


def qnet10_kernel(z1_ref,
                  w0_ref, b0_ref,
                  w1_ref, b1_ref,
                  w2_ref, b2_ref,
                  w3_ref, wskip_ref, b3_ref,
                  o_ref,
                  *, bf16_tanh):
    """One batch tile: 3x (matmul + bias + tanh), then lin3 + skip summed in f32."""
    z1_bf = z1_ref[...]                               # (TM, nz1_pad) bf16

    def layer(x_bf, w_ref, b_ref):
        pre = jnp.dot(x_bf, w_ref[...],
                      preferred_element_type=jnp.float32) + b_ref[...]
        if bf16_tanh:
            # bf16 pre-activation -> EUP bf16 tanh -> bf16 result for next MXU pass.
            return jnp.tanh(pre.astype(jnp.bfloat16))
        return jnp.tanh(pre).astype(jnp.bfloat16)

    h = layer(z1_bf, w0_ref, b0_ref)
    h = layer(h, w1_ref, b1_ref)
    h = layer(h, w2_ref, b2_ref)

    out = (jnp.dot(h, w3_ref[...], preferred_element_type=jnp.float32)
           + jnp.dot(z1_bf, wskip_ref[...], preferred_element_type=jnp.float32)
           + b3_ref[...])
    o_ref[...] = out.astype(o_ref.dtype)


@functools.partial(jax.jit, static_argnames=("nz0", "block_rows", "bf16_tanh"))
def qnet10_forward(z1, packed, *, nz0, block_rows=512, bf16_tanh=False):
    """Runs the Pallas kernel over batch tiles; weights stay resident in VMEM."""
    (w0, b0, w1, b1, w2, b2, w3, wskip, b3) = packed
    B, nz1 = z1.shape
    nz1_pad = w0.shape[0]
    nz0_pad = b3.shape[1]

    # Adaptive batch tile: minimize tail padding, and use >= 2 grid steps when
    # the batch is big enough so both v7x TensorCores get work.
    n_tiles = _cdiv(B, block_rows)
    if B >= 2 * SUBLANE:
        n_tiles = max(n_tiles, 2)
    tm = _round_up(_cdiv(B, n_tiles), SUBLANE)
    B_pad = _round_up(B, tm)

    # z1 is only ever consumed as bf16 inside the kernel: cast + pad here
    # (halves streamed input DMA, drops the per-tile cast).
    z1_p = jnp.pad(z1.astype(jnp.bfloat16),
                   ((0, B_pad - B), (0, nz1_pad - nz1)))

    def resident(arr):
        # Same block index every grid step -> loaded into VMEM once.
        return pl.BlockSpec(arr.shape, lambda i: (0, 0))

    # Default scoped-VMEM limits (16 MiB on v5e) are fine up to tm=512; only
    # raise the limit if a caller asks for bigger tiles.
    vmem_limit = (48 * 1024 * 1024) if tm > 512 else None

    out = pl.pallas_call(
        functools.partial(qnet10_kernel, bf16_tanh=bf16_tanh),
        out_shape=jax.ShapeDtypeStruct((B_pad, nz0_pad), jnp.float32),
        grid=(B_pad // tm,),
        in_specs=[
            pl.BlockSpec((tm, nz1_pad), lambda i: (i, 0)),
            resident(w0), resident(b0),
            resident(w1), resident(b1),
            resident(w2), resident(b2),
            resident(w3), resident(wskip), resident(b3),
        ],
        out_specs=pl.BlockSpec((tm, nz0_pad), lambda i: (i, 0)),
        compiler_params=pltpu.CompilerParams(
            dimension_semantics=("parallel",),
            vmem_limit_bytes=vmem_limit),
    )(z1_p, w0, b0, w1, b1, w2, b2, w3, wskip, b3)

    return out[:B, :nz0]


def init_params(key, nz0, nz1):
    """Deterministic logical parameters. Weights stored as (in, out) = W.T."""
    ks = jax.random.split(key, 9)
    s = 0.05
    w0 = s * jax.random.normal(ks[0], (nz1, NNMLP), jnp.float32)     # conv_z1.weight.T
    b0 = s * jax.random.normal(ks[1], (1, NNMLP), jnp.float32)       # conv_z1.bias
    w1 = s * jax.random.normal(ks[2], (NNMLP, NNMLP), jnp.float32)   # lin1.weight.T
    b1 = s * jax.random.normal(ks[3], (1, NNMLP), jnp.float32)       # lin1.bias
    w2 = s * jax.random.normal(ks[4], (NNMLP, NNMLP), jnp.float32)   # lin2.weight.T
    b2 = s * jax.random.normal(ks[5], (1, NNMLP), jnp.float32)       # lin2.bias
    w3 = s * jax.random.normal(ks[6], (NNMLP, nz0), jnp.float32)     # lin3.weight.T
    b3 = s * jax.random.normal(ks[7], (1, nz0), jnp.float32)         # lin3.bias
    wskip = s * jax.random.normal(ks[8], (nz1, nz0), jnp.float32)    # lin_skip.weight.T
    return (w0, b0, w1, b1, w2, b2, w3, b3, wskip)


def pack_params(params, nz0, nz1):
    """Zero-pad to tile-aligned shapes, cast weights to bf16 (biases stay f32).

    Zero padding keeps results exact: padded hidden columns are tanh(0)=0 and
    feed zero-padded weight rows downstream; padded outputs are sliced off.
    """
    (w0, b0, w1, b1, w2, b2, w3, b3, wskip) = params
    nz1_pad = _round_up(nz1, LANE)
    nz0_pad = _round_up(nz0, LANE)

    def padw(w, r, c):
        return jnp.pad(w, ((0, r - w.shape[0]), (0, c - w.shape[1])))

    w0p = padw(w0, nz1_pad, NNMLP_PAD).astype(jnp.bfloat16)
    w1p = padw(w1, NNMLP_PAD, NNMLP_PAD).astype(jnp.bfloat16)
    w2p = padw(w2, NNMLP_PAD, NNMLP_PAD).astype(jnp.bfloat16)
    w3p = padw(w3, NNMLP_PAD, nz0_pad).astype(jnp.bfloat16)
    wsp = padw(wskip, nz1_pad, nz0_pad).astype(jnp.bfloat16)

    b0p = padw(b0, 1, NNMLP_PAD).astype(jnp.float32)
    b1p = padw(b1, 1, NNMLP_PAD).astype(jnp.float32)
    b2p = padw(b2, 1, NNMLP_PAD).astype(jnp.float32)
    b3p = padw(b3, 1, nz0_pad).astype(jnp.float32)

    return (w0p, b0p, w1p, b1p, w2p, b2p, w3p, wsp, b3p)


def reference_forward_f32(z1, params):
    """Pure-JAX f32 reference matching the PyTorch forward."""
    (w0, b0, w1, b1, w2, b2, w3, b3, wskip) = params
    h = jnp.tanh(z1 @ w0 + b0)
    h = jnp.tanh(h @ w1 + b1)
    h = jnp.tanh(h @ w2 + b2)
    return (h @ w3 + b3) + z1 @ wskip


def reference_forward_matched(z1, params, bf16_tanh):
    """Pure-JAX reference mirroring the kernel's bf16-weight / f32-accum numerics."""
    (w0, b0, w1, b1, w2, b2, w3, b3, wskip) = params
    z1_bf = z1.astype(jnp.bfloat16)

    def mm(x_bf, w):
        return jnp.dot(x_bf, w.astype(jnp.bfloat16),
                       preferred_element_type=jnp.float32)

    def act(pre):
        if bf16_tanh:
            return jnp.tanh(pre.astype(jnp.bfloat16))
        return jnp.tanh(pre).astype(jnp.bfloat16)

    h = act(mm(z1_bf, w0) + b0)
    h = act(mm(h, w1) + b1)
    h = act(mm(h, w2) + b2)
    return (mm(h, w3) + b3) + mm(z1_bf, wskip)


if __name__ == "__main__":
    nz0, nz1 = 16, 32

    key = jax.random.PRNGKey(0)
    k_small, k_big, k_params = jax.random.split(key, 3)

    params = init_params(k_params, nz0, nz1)
    packed = pack_params(params, nz0, nz1)
    bf16_tanh = _default_bf16_tanh()

    # Small batch (single tile) and a multi-tile ragged batch to exercise grid.
    for batch, k in ((2, k_small), (300, k_big)):
        z1 = jax.random.normal(k, (batch, nz1), jnp.float32)

        out = qnet10_forward(z1, packed, nz0=nz0, bf16_tanh=bf16_tanh)
        out = jax.block_until_ready(out)
        assert out.shape == (batch, nz0), out.shape

        ref_match = reference_forward_matched(z1, params, bf16_tanh)
        ref_f32 = reference_forward_f32(z1, params)

        err_match = jnp.max(jnp.abs(out - ref_match))
        err_f32 = jnp.max(jnp.abs(out - ref_f32))
        assert jnp.allclose(out, ref_match, atol=5e-3, rtol=5e-3), (
            f"batch={batch}: max abs err vs matched-precision ref {err_match}")
        assert jnp.allclose(out, ref_f32, atol=5e-2, rtol=5e-2), (
            f"batch={batch}: max abs err vs f32 ref {err_f32}")

    print("KERNEL_OK")
</pallas_src>

<mosaic_0001>
module attributes {stable_mosaic.version = 11 : i64} {
  func.func @qnet10_kernel(%arg0: i32, %arg1: memref<8x128xbf16, #tpu.memory_space<vmem>>, %arg2: memref<128x640xbf16, #tpu.memory_space<vmem>>, %arg3: memref<1x640xf32, #tpu.memory_space<vmem>>, %arg4: memref<640x640xbf16, #tpu.memory_space<vmem>>, %arg5: memref<1x640xf32, #tpu.memory_space<vmem>>, %arg6: memref<640x640xbf16, #tpu.memory_space<vmem>>, %arg7: memref<1x640xf32, #tpu.memory_space<vmem>>, %arg8: memref<640x128xbf16, #tpu.memory_space<vmem>>, %arg9: memref<128x128xbf16, #tpu.memory_space<vmem>>, %arg10: memref<1x128xf32, #tpu.memory_space<vmem>>, %arg11: memref<8x128xf32, #tpu.memory_space<vmem>>) attributes {dimension_semantics = [#tpu.dimension_semantics<parallel>], iteration_bounds = array<i64: 1>, scalar_prefetch = 0 : i64, scratch_operands = 0 : i64, tpu.core_type = #tpu.core_type<tc>, window_params = [{transform_indices = @transform_0, window_bounds = array<i64: 8, 128>}, {pipeline_mode = #tpu.pipeline_mode<synchronous>, transform_indices = @transform_1, window_bounds = array<i64: 128, 640>}, {pipeline_mode = #tpu.pipeline_mode<synchronous>, transform_indices = @transform_2, window_bounds = array<i64: 1, 640>}, {pipeline_mode = #tpu.pipeline_mode<synchronous>, transform_indices = @transform_3, window_bounds = array<i64: 640, 640>}, {pipeline_mode = #tpu.pipeline_mode<synchronous>, transform_indices = @transform_4, window_bounds = array<i64: 1, 640>}, {pipeline_mode = #tpu.pipeline_mode<synchronous>, transform_indices = @transform_5, window_bounds = array<i64: 640, 640>}, {pipeline_mode = #tpu.pipeline_mode<synchronous>, transform_indices = @transform_6, window_bounds = array<i64: 1, 640>}, {pipeline_mode = #tpu.pipeline_mode<synchronous>, transform_indices = @transform_7, window_bounds = array<i64: 640, 128>}, {pipeline_mode = #tpu.pipeline_mode<synchronous>, transform_indices = @transform_8, window_bounds = array<i64: 128, 128>}, {pipeline_mode = #tpu.pipeline_mode<synchronous>, transform_indices = @transform_9, window_bounds = array<i64: 1, 128>}, {transform_indices = @transform_10, window_bounds = array<i64: 8, 128>}]} {
    %c0 = arith.constant 0 : index
    %c0_0 = arith.constant 0 : index
    %0 = vector.load %arg1[%c0, %c0_0] : memref<8x128xbf16, #tpu.memory_space<vmem>>, vector<8x128xbf16>
    %c0_1 = arith.constant 0 : index
    %c0_2 = arith.constant 0 : index
    %1 = vector.load %arg2[%c0_1, %c0_2] : memref<128x640xbf16, #tpu.memory_space<vmem>>, vector<128x640xbf16>
    %cst = arith.constant dense<0.000000e+00> : vector<8x640xf32>
    %2 = tpu.matmul %0, %1, %cst {dimension_numbers = #tpu.dot_dimension_numbers<[1], [0], [0], [1], [0, 0, 1, 1], [], []>} : vector<8x128xbf16>, vector<128x640xbf16>, vector<8x640xf32> -> vector<8x640xf32>
    %c0_3 = arith.constant 0 : index
    %c0_4 = arith.constant 0 : index
    %3 = vector.load %arg3[%c0_3, %c0_4] : memref<1x640xf32, #tpu.memory_space<vmem>>, vector<1x640xf32>
    %4 = vector.broadcast %3 : vector<1x640xf32> to vector<8x640xf32>
    %5 = arith.addf %2, %4 : vector<8x640xf32>
    %6 = math.tanh %5 : vector<8x640xf32>
    %7 = arith.truncf %6 : vector<8x640xf32> to vector<8x640xbf16>
    %c0_5 = arith.constant 0 : index
    %c0_6 = arith.constant 0 : index
    %8 = vector.load %arg4[%c0_5, %c0_6] : memref<640x640xbf16, #tpu.memory_space<vmem>>, vector<640x640xbf16>
    %cst_7 = arith.constant dense<0.000000e+00> : vector<8x640xf32>
    %9 = tpu.matmul %7, %8, %cst_7 {dimension_numbers = #tpu.dot_dimension_numbers<[1], [0], [0], [1], [0, 0, 1, 1], [], []>} : vector<8x640xbf16>, vector<640x640xbf16>, vector<8x640xf32> -> vector<8x640xf32>
    %c0_8 = arith.constant 0 : index
    %c0_9 = arith.constant 0 : index
    %10 = vector.load %arg5[%c0_8, %c0_9] : memref<1x640xf32, #tpu.memory_space<vmem>>, vector<1x640xf32>
    %11 = vector.broadcast %10 : vector<1x640xf32> to vector<8x640xf32>
    %12 = arith.addf %9, %11 : vector<8x640xf32>
    %13 = math.tanh %12 : vector<8x640xf32>
    %14 = arith.truncf %13 : vector<8x640xf32> to vector<8x640xbf16>
    %c0_10 = arith.constant 0 : index
    %c0_11 = arith.constant 0 : index
    %15 = vector.load %arg6[%c0_10, %c0_11] : memref<640x640xbf16, #tpu.memory_space<vmem>>, vector<640x640xbf16>
    %cst_12 = arith.constant dense<0.000000e+00> : vector<8x640xf32>
    %16 = tpu.matmul %14, %15, %cst_12 {dimension_numbers = #tpu.dot_dimension_numbers<[1], [0], [0], [1], [0, 0, 1, 1], [], []>} : vector<8x640xbf16>, vector<640x640xbf16>, vector<8x640xf32> -> vector<8x640xf32>
    %c0_13 = arith.constant 0 : index
    %c0_14 = arith.constant 0 : index
    %17 = vector.load %arg7[%c0_13, %c0_14] : memref<1x640xf32, #tpu.memory_space<vmem>>, vector<1x640xf32>
    %18 = vector.broadcast %17 : vector<1x640xf32> to vector<8x640xf32>
    %19 = arith.addf %16, %18 : vector<8x640xf32>
    %20 = math.tanh %19 : vector<8x640xf32>
    %21 = arith.truncf %20 : vector<8x640xf32> to vector<8x640xbf16>
    %c0_15 = arith.constant 0 : index
    %c0_16 = arith.constant 0 : index
    %22 = vector.load %arg8[%c0_15, %c0_16] : memref<640x128xbf16, #tpu.memory_space<vmem>>, vector<640x128xbf16>
    %cst_17 = arith.constant dense<0.000000e+00> : vector<8x128xf32>
    %23 = tpu.matmul %21, %22, %cst_17 {dimension_numbers = #tpu.dot_dimension_numbers<[1], [0], [0], [1], [0, 0, 1, 1], [], []>} : vector<8x640xbf16>, vector<640x128xbf16>, vector<8x128xf32> -> vector<8x128xf32>
    %c0_18 = arith.constant 0 : index
    %c0_19 = arith.constant 0 : index
    %24 = vector.load %arg9[%c0_18, %c0_19] : memref<128x128xbf16, #tpu.memory_space<vmem>>, vector<128x128xbf16>
    %cst_20 = arith.constant dense<0.000000e+00> : vector<8x128xf32>
    %25 = tpu.matmul %0, %24, %cst_20 {dimension_numbers = #tpu.dot_dimension_numbers<[1], [0], [0], [1], [0, 0, 1, 1], [], []>} : vector<8x128xbf16>, vector<128x128xbf16>, vector<8x128xf32> -> vector<8x128xf32>
    %26 = arith.addf %23, %25 : vector<8x128xf32>
    %c0_21 = arith.constant 0 : index
    %c0_22 = arith.constant 0 : index
    %27 = vector.load %arg10[%c0_21, %c0_22] : memref<1x128xf32, #tpu.memory_space<vmem>>, vector<1x128xf32>
    %28 = vector.broadcast %27 : vector<1x128xf32> to vector<8x128xf32>
    %29 = arith.addf %26, %28 : vector<8x128xf32>
    %c0_23 = arith.constant 0 : index
    %c0_24 = arith.constant 0 : index
    %30 = vector.load %arg11[%c0_23, %c0_24] : memref<8x128xf32, #tpu.memory_space<vmem>>, vector<8x128xf32>
    tpu.vector_store %arg11[%c0_23, %c0_24], %29 {strides = array<i32>} : memref<8x128xf32, #tpu.memory_space<vmem>>, vector<8x128xf32>,
    return
  }
  func.func @transform_0(%arg0: i32) -> (i32, i32) {
    %c0_i32 = arith.constant 0 : i32
    %c0_i32_0 = arith.constant 0 : i32
    return %arg0, %c0_i32 : i32, i32
  }
  func.func @transform_1(%arg0: i32) -> (i32, i32) {
    %c0_i32 = arith.constant 0 : i32
    %c0_i32_0 = arith.constant 0 : i32
    %c0_i32_1 = arith.constant 0 : i32
    return %c0_i32, %c0_i32_0 : i32, i32
  }
  func.func @transform_2(%arg0: i32) -> (i32, i32) {
    %c0_i32 = arith.constant 0 : i32
    %c0_i32_0 = arith.constant 0 : i32
    %c0_i32_1 = arith.constant 0 : i32
    return %c0_i32, %c0_i32_0 : i32, i32
  }
  func.func @transform_3(%arg0: i32) -> (i32, i32) {
    %c0_i32 = arith.constant 0 : i32
    %c0_i32_0 = arith.constant 0 : i32
    %c0_i32_1 = arith.constant 0 : i32
    return %c0_i32, %c0_i32_0 : i32, i32
  }
  func.func @transform_4(%arg0: i32) -> (i32, i32) {
    %c0_i32 = arith.constant 0 : i32
    %c0_i32_0 = arith.constant 0 : i32
    %c0_i32_1 = arith.constant 0 : i32
    return %c0_i32, %c0_i32_0 : i32, i32
  }
  func.func @transform_5(%arg0: i32) -> (i32, i32) {
    %c0_i32 = arith.constant 0 : i32
    %c0_i32_0 = arith.constant 0 : i32
    %c0_i32_1 = arith.constant 0 : i32
    return %c0_i32, %c0_i32_0 : i32, i32
  }
  func.func @transform_6(%arg0: i32) -> (i32, i32) {
    %c0_i32 = arith.constant 0 : i32
    %c0_i32_0 = arith.constant 0 : i32
    %c0_i32_1 = arith.constant 0 : i32
    return %c0_i32, %c0_i32_0 : i32, i32
  }
  func.func @transform_7(%arg0: i32) -> (i32, i32) {
    %c0_i32 = arith.constant 0 : i32
    %c0_i32_0 = arith.constant 0 : i32
    %c0_i32_1 = arith.constant 0 : i32
    return %c0_i32, %c0_i32_0 : i32, i32
  }
  func.func @transform_8(%arg0: i32) -> (i32, i32) {
    %c0_i32 = arith.constant 0 : i32
    %c0_i32_0 = arith.constant 0 : i32
    %c0_i32_1 = arith.constant 0 : i32
    return %c0_i32, %c0_i32_0 : i32, i32
  }
  func.func @transform_9(%arg0: i32) -> (i32, i32) {
    %c0_i32 = arith.constant 0 : i32
    %c0_i32_0 = arith.constant 0 : i32
    %c0_i32_1 = arith.constant 0 : i32
    return %c0_i32, %c0_i32_0 : i32, i32
  }
  func.func @transform_10(%arg0: i32) -> (i32, i32) {
    %c0_i32 = arith.constant 0 : i32
    %c0_i32_0 = arith.constant 0 : i32
    return %arg0, %c0_i32 : i32, i32
  }
}

</mosaic_0001>

<bundles_post_ra>
// kernel: qnet10_forward.1
= control target key start
LH: loop header
LB: loop body
LE: loop exit
PB: predicated region body
PF: predicated region fallthrough
CT: control target
= control target key end

     0   :  { %15 = vsyncpa [#allocation3], 0  ;;  %s7085_s0 = inlined_call_operand.vmem [shape: bf16[8,128], index: 0, kind: input, shape index: {}]   ;;  %s7086_s1 = inlined_call_operand.hbm [shape: bf16[128,640], index: 1, kind: input, shape index: {}]   ;;  %s7087_s2 = inlined_call_operand.vmem [shape: f32[1,640], index: 2, kind: input, shape index: {}]   ;;  %s7088_s3 = inlined_call_operand.hbm [shape: bf16[640,640], index: 3, kind: input, shape index: {}]   ;;  %s7089_s4 = inlined_call_operand.vmem [shape: f32[1,640], index: 4, kind: input, shape index: {}]   ;;  %s7090_s5 = inlined_call_operand.hbm [shape: bf16[640,640], index: 5, kind: input, shape index: {}]   ;;  %s7091_s6 = inlined_call_operand.hbm [shape: f32[1,640], index: 6, kind: input, shape index: {}]   ;;  %s7092_s7 = inlined_call_operand.hbm [shape: bf16[640,128], index: 7, kind: input, shape index: {}]   ;;  %s7093_s8 = inlined_call_operand.hbm [shape: bf16[128,128], index: 8, kind: input, shape index: {}]   ;;  %s7094_s9 = inlined_call_operand.vmem [shape: f32[1,128], index: 9, kind: input, shape index: {}]   ;;  %s7095_s10 = inlined_call_operand.vmem [shape: f32[8,128], index: 10, kind: output, shape index: {}]  }
   0x1   :  { %16 = vsyncpa [#allocation5], 0 }
   0x2   :  { %17 = vsyncpa [#allocation8], 0 }
   0x3   :  { %18 = vsyncpa [#allocation11], 0  ;;  %s40_s15 = sshll.u32 %s7088_s3, 4  ;;  %s6835_s16 = smov [#allocation4]   ;;  %s41_s15 = int_to_ptr.hbm [resolvable:$true] %s40_s15 }
   0x4   :  { %s42_s17 = sshll.u32 %s6835_s16, 4  ;;  %s69_s20 = sshll.u32 %s7091_s6, 4  ;;  %s43_s17 = int_to_ptr.vmem [resolvable:$true] %s42_s17  ;;  %s70_s20 = int_to_ptr.hbm [resolvable:$true] %s69_s20 }
   0x5   :  { %s6836_s21 = smov 320   ;;  %s6837_s22 = smov 20  }
   0x6   :  { %48 = dma.hbm_to_vmem [thread:$0]  %s41_s15, 25600, %s43_s17, [#allocation5], %s6836_s21, %s6836_s21, %s6837_s22  }
   0x7   :  { %s6838_s23 = smov [#allocation7]   ;;  %s25_s27 = sshll.u32 %s7086_s1, 4  ;;  %s26_s27 = int_to_ptr.hbm [resolvable:$true] %s25_s27 }
   0x8   :  { %s71_s24 = sshll.u32 %s6838_s23, 4  ;;  %s55_s29 = sshll.u32 %s7090_s5, 4  ;;  %s72_s24 = int_to_ptr.vmem [resolvable:$true] %s71_s24  ;;  %s56_s29 = int_to_ptr.hbm [resolvable:$true] %s55_s29 }
   0x9   :  { %74 = dma.hbm_to_vmem [thread:$0]  %s70_s20, 80, %s72_s24, [#allocation8]  }
   0xa   :  { %s6839_s30 = smov [#allocation2]   ;;  %s6840_s6 = smov [#allocation6]  }
   0xb   :  { %s27_s11 = sshll.u32 %s6839_s30, 4  ;;  %s57_s12 = sshll.u32 %s6840_s6, 4  ;;  %s28_s11 = int_to_ptr.vmem [resolvable:$true] %s27_s11  ;;  %s58_s12 = int_to_ptr.vmem [resolvable:$true] %s57_s12 }
   0xc   :  { %33 = dma.hbm_to_vmem [thread:$0]  %s26_s27, 5120, %s28_s11, [#allocation3], %s6836_s21, %s6836_s21, %s6837_s22  }
   0xd   :  { %s79_s15 = sshll.u32 %s7092_s7, 4  ;;  %s6841_s1 = smov [#allocation9]   ;;  %s80_s15 = int_to_ptr.hbm [resolvable:$true] %s79_s15 }
   0xe   :  { %63 = dma.hbm_to_vmem [thread:$0]  %s56_s29, 25600, %s58_s12, [#allocation5], %s6836_s21, %s6836_s21, %s6837_s22  }
   0xf   :  { %s81_s16 = sshll.u32 %s6841_s1, 4  ;;  %s92_s5 = sshll.u32 %s7093_s8, 4  ;;  %s82_s16 = int_to_ptr.vmem [resolvable:$true] %s81_s16  ;;  %s93_s5 = int_to_ptr.hbm [resolvable:$true] %s92_s5 }
  0x10   :  { %s6842_s19 = smov 64   ;;  %s6843_s20 = smov 4  }
  0x11   :  { %87 = dma.hbm_to_vmem [thread:$0]  %s80_s15, 5120, %s82_s16, [#allocation8], %s6842_s19, %s6842_s19, %s6843_s20  }
  0x12   :  { %s6844_s23 = smov [#allocation10]  }
  0x13   :  { %s94_s24 = sshll.u32 %s6844_s23, 4  ;;  %s95_s24 = int_to_ptr.vmem [resolvable:$true] %s94_s24 }
  0x14   :  { %100 = dma.hbm_to_vmem [thread:$0]  %s93_s5, 1024, %s95_s24, [#allocation11], %s6842_s19, %s6842_s19, %s6843_s20  }
  0x15   :  { %6827 = dma.done.wait [#allocation3], 5120  }
  0x16   :  { %6828 = vsyncadd [#allocation3], 4294962176 }
  0x17   :  { %6829 = dma.done.wait [#allocation5], 51200  }
  0x18   :  { %6830 = vsyncadd [#allocation5], 4294916096 }
  0x19   :  { %6831 = dma.done.wait [#allocation8], 5200  }
  0x1a   :  { %6832 = vsyncadd [#allocation8], 4294962096 }
  0x1b   :  { %6833 = dma.done.wait [#allocation11], 1024  }
  0x1c   :  { %6834 = vsyncadd [#allocation11], 4294966272  ;;  %v4343_v0 = vld [vmem:[#allocation2 + $0x118] sm:$0xf]  ;;  %v6190_v1 = vld [vmem:[#allocation2 + $0x128] sm:$0xf0] }
  0x1d   :  { %v6188_v2 = vld [vmem:[#allocation2 + $0x11c] sm:$0xf]  ;;  %v4344_v3 = vor.u32 %v6190_v1, %v4343_v0  ;;  %v4345_v4 = vld [vmem:[#allocation2 + $0x12c] sm:$0xf0]  ;;  %v4351_v5 = vld [vmem:[#allocation2 + $0x120] sm:$0xf] }
  0x1e   :  { %v6191_v6 = vld [vmem:[#allocation2 + $0x130] sm:$0xf0]  ;;  %v4348_v7 = vor.u32 %v6188_v2, %v4345_v4  ;;  %v6189_v9 = vld [vmem:[#allocation2 + $0x124] sm:$0xf]  ;;  %v4353_v10 = vld [vmem:[#allocation2 + $0x134] sm:$0xf0] }
  0x1f   :  { %v4352_v8 = vor.u32 %v6191_v6, %v4351_v5  ;;  %v4323_v11 = vld [vmem:[#allocation2 + $0xf0] sm:$0xf]  ;;  %396 = vmatpush.bf16.msra.mxu0 %v4344_v3  ;;  %v4356_v12 = vor.u32 %v6189_v9, %v4353_v10  ;;  %v6185_v13 = vld [vmem:[#allocation2 + $0x100] sm:$0xf0]  ;;  %v6183_v14 = vld [vmem:[#allocation2 + $0xf4] sm:$0xf] }
  0x20   :  { %v4325_v15 = vld [vmem:[#allocation2 + $0x104] sm:$0xf0]  ;;  %409 = vmatpush.bf16.msra.mxu1 %v4348_v7  ;;  %v4324_v16 = vor.u32 %v6185_v13, %v4323_v11  ;;  %v4331_v18 = vld [vmem:[#allocation2 + $0xf8] sm:$0xf]  ;;  %v6186_v19 = vld [vmem:[#allocation2 + $0x108] sm:$0xf0] }
  0x21   :  { %422 = vmatpush.bf16.msra.mxu2 %v4352_v8  ;;  %v4328_v17 = vor.u32 %v6183_v14, %v4325_v15  ;;  %v6184_v20 = vld [vmem:[#allocation2 + $0xfc] sm:$0xf]  ;;  %435 = vmatpush.bf16.msra.mxu3 %v4356_v12  ;;  %v4332_v21 = vor.u32 %v6186_v19, %v4331_v18  ;;  %v4333_v22 = vld [vmem:[#allocation2 + $0x10c] sm:$0xf0]  ;;  %v4303_v23 = vld [vmem:[#allocation2 + $0xc8] sm:$0xf] }
  0x22   :  { %v6180_v24 = vld [vmem:[#allocation2 + $0xd8] sm:$0xf0]  ;;  %v4336_v25 = vor.u32 %v6184_v20, %v4333_v22  ;;  %v6178_v26 = vld [vmem:[#allocation2 + $0xcc] sm:$0xf]  ;;  %v4305_v27 = vld [vmem:[#allocation2 + $0xdc] sm:$0xf0] }
  0x23   :  { %v4311_v28 = vld [vmem:[#allocation2 + $0xd0] sm:$0xf]  ;;  %397 = vmatpush.bf16.msra.mxu0 %v4324_v16  ;;  %v4304_v29 = vor.u32 %v6180_v24, %v4303_v23  ;;  %v6181_v30 = vld [vmem:[#allocation2 + $0xe0] sm:$0xf0]  ;;  %v6179_v31 = vld [vmem:[#allocation2 + $0xd4] sm:$0xf]  ;;  %v4308_v33 = vor.u32 %v6178_v26, %v4305_v27 }
  0x24   :  { %v4313_v32 = vld [vmem:[#allocation2 + $0xe4] sm:$0xf0]  ;;  %410 = vmatpush.bf16.msra.mxu1 %v4328_v17  ;;  %v4312_v34 = vor.u32 %v6181_v30, %v4311_v28  ;;  %v4283_v35 = vld [vmem:[#allocation2 + $0xa0] sm:$0xf]  ;;  %v6175_v36 = vld [vmem:[#allocation2 + $0xb0] sm:$0xf0] }
  0x25   :  { %423 = vmatpush.bf16.msra.mxu2 %v4332_v21  ;;  %v6173_v37 = vld [vmem:[#allocation2 + $0xa4] sm:$0xf]  ;;  %436 = vmatpush.bf16.msra.mxu3 %v4336_v25  ;;  %v4316_v38 = vor.u32 %v6179_v31, %v4313_v32  ;;  %v4285_v39 = vld [vmem:[#allocation2 + $0xb4] sm:$0xf0]  ;;  %v4291_v40 = vld [vmem:[#allocation2 + $0xa8] sm:$0xf]  ;;  %v4284_v44 = vor.u32 %v6175_v36, %v4283_v35 }
  0x26   :  { %v6176_v41 = vld [vmem:[#allocation2 + $0xb8] sm:$0xf0]  ;;  %v6174_v42 = vld [vmem:[#allocation2 + $0xac] sm:$0xf]  ;;  %v4293_v43 = vld [vmem:[#allocation2 + $0xbc] sm:$0xf0]  ;;  %v4288_v45 = vor.u32 %v6173_v37, %v4285_v39 }
  0x27   :  { %398 = vmatpush.bf16.msra.mxu0 %v4304_v29  ;;  %v4292_v46 = vor.u32 %v6176_v41, %v4291_v40  ;;  %v4263_v47 = vld [vmem:[#allocation2 + $0x78] sm:$0xf]  ;;  %v6170_v48 = vld [vmem:[#allocation2 + $0x88] sm:$0xf0]  ;;  %v6168_v49 = vld [vmem:[#allocation2 + $0x7c] sm:$0xf]  ;;  %v4296_v50 = vor.u32 %v6174_v42, %v4293_v43 }
  0x28   :  { %411 = vmatpush.bf16.msra.mxu1 %v4308_v33  ;;  %v4265_v51 = vld [vmem:[#allocation2 + $0x8c] sm:$0xf0]  ;;  %v4271_v52 = vld [vmem:[#allocation2 + $0x80] sm:$0xf]  ;;  %v6171_v53 = vld [vmem:[#allocation2 + $0x90] sm:$0xf0]  ;;  %v4264_v56 = vor.u32 %v6170_v48, %v4263_v47 }
  0x29   :  { %424 = vmatpush.bf16.msra.mxu2 %v4312_v34  ;;  %437 = vmatpush.bf16.msra.mxu3 %v4316_v38  ;;  %v6169_v54 = vld [vmem:[#allocation2 + $0x84] sm:$0xf]  ;;  %v4273_v55 = vld [vmem:[#allocation2 + $0x94] sm:$0xf0]  ;;  %v4268_v57 = vor.u32 %v6168_v49, %v4265_v51  ;;  %v4272_v58 = vor.u32 %v6171_v53, %v4271_v52  ;;  %v4243_v59 = vld [vmem:[#allocation2 + $0x50] sm:$0xf] }
  0x2a   :  { %v6165_v60 = vld [vmem:[#allocation2 + $0x60] sm:$0xf0]  ;;  %v6163_v61 = vld [vmem:[#allocation2 + $0x54] sm:$0xf]  ;;  %v4276_v62 = vor.u32 %v6169_v54, %v4273_v55  ;;  %v4245_v63 = vld [vmem:[#allocation2 + $0x64] sm:$0xf0] }
  0x2b   :  { %399 = vmatpush.bf16.msra.mxu0 %v4284_v44  ;;  %v4251_v0 = vld [vmem:[#allocation2 + $0x58] sm:$0xf]  ;;  %v6166_v1 = vld [vmem:[#allocation2 + $0x68] sm:$0xf0]  ;;  %v6164_v2 = vld [vmem:[#allocation2 + $0x5c] sm:$0xf]  ;;  %v4244_v4 = vor.u32 %v6165_v60, %v4243_v59  ;;  %v4248_v5 = vor.u32 %v6163_v61, %v4245_v63 }
  0x2c   :  { %412 = vmatpush.bf16.msra.mxu1 %v4288_v45  ;;  %v4253_v3 = vld [vmem:[#allocation2 + $0x6c] sm:$0xf0]  ;;  %v4252_v6 = vor.u32 %v6166_v1, %v4251_v0  ;;  %v4223_v7 = vld [vmem:[#allocation2 + $0x28] sm:$0xf]  ;;  %v6160_v8 = vld [vmem:[#allocation2 + $0x38] sm:$0xf0] }
  0x2d   :  { %425 = vmatpush.bf16.msra.mxu2 %v4292_v46  ;;  %438 = vmatpush.bf16.msra.mxu3 %v4296_v50  ;;  %v6158_v9 = vld [vmem:[#allocation2 + $0x2c] sm:$0xf]  ;;  %v4256_v10 = vor.u32 %v6164_v2, %v4253_v3  ;;  %v4225_v11 = vld [vmem:[#allocation2 + $0x3c] sm:$0xf0]  ;;  %v4231_v12 = vld [vmem:[#allocation2 + $0x30] sm:$0xf]  ;;  %v4224_v16 = vor.u32 %v6160_v8, %v4223_v7 }
  0x2e   :  { %v6161_v13 = vld [vmem:[#allocation2 + $0x40] sm:$0xf0]  ;;  %v6159_v14 = vld [vmem:[#allocation2 + $0x34] sm:$0xf]  ;;  %v4233_v15 = vld [vmem:[#allocation2 + $0x44] sm:$0xf0]  ;;  %v4228_v18 = vor.u32 %v6158_v9, %v4225_v11 }
  0x2f   :  { %400 = vmatpush.bf16.msra.mxu0 %v4264_v56  ;;  %v4203_v17 = vld [vmem:[#allocation2] sm:$0xf]  ;;  %v4232_v19 = vor.u32 %v6161_v13, %v4231_v12  ;;  %v6155_v20 = vld [vmem:[#allocation2 + $0x10] sm:$0xf0]  ;;  %v6153_v21 = vld [vmem:[#allocation2 + $0x4] sm:$0xf]  ;;  %v4236_v23 = vor.u32 %v6159_v14, %v4233_v15 }
  0x30   :  { %413 = vmatpush.bf16.msra.mxu1 %v4268_v57  ;;  %v4205_v22 = vld [vmem:[#allocation2 + $0x14] sm:$0xf0]  ;;  %v4211_v24 = vld [vmem:[#allocation2 + $0x8] sm:$0xf]  ;;  %v6156_v25 = vld [vmem:[#allocation2 + $0x18] sm:$0xf0]  ;;  %v4204_v30 = vor.u32 %v6155_v20, %v4203_v17 }
  0x31   :  { %426 = vmatpush.bf16.msra.mxu2 %v4272_v58  ;;  %439 = vmatpush.bf16.msra.mxu3 %v4276_v62  ;;  %v6154_v26 = vld [vmem:[#allocation2 + $0xc] sm:$0xf]  ;;  %v4213_v27 = vld [vmem:[#allocation2 + $0x1c] sm:$0xf0]  ;;  %v4359_v28 = vld [vmem:[#allocation2 + $0x128] sm:$0xf]  ;;  %v4208_v31 = vor.u32 %v6153_v21, %v4205_v22  ;;  %v4212_v32 = vor.u32 %v6156_v25, %v4211_v24 }
  0x32   :  { %v6192_v29 = vld [vmem:[#allocation2 + $0x138] sm:$0xf0]  ;;  %v4216_v33 = vor.u32 %v6154_v26, %v4213_v27  ;;  %v4339_v35 = vld [vmem:[#allocation2 + $0x100] sm:$0xf]  ;;  %v6187_v36 = vld [vmem:[#allocation2 + $0x110] sm:$0xf0] }
  0x33   :  { %401 = vmatpush.bf16.msra.mxu0 %v4244_v4  ;;  %v4360_v34 = vor.u32 %v6192_v29, %v4359_v28  ;;  %v6921_v37 = vld [vmem:[%s7085_s0] sm:$0xf]  ;;  %v4319_v38 = vld [vmem:[#allocation2 + $0xd8] sm:$0xf]  ;;  %v6182_v39 = vld [vmem:[#allocation2 + $0xe8] sm:$0xf0]  ;;  %v4340_v43 = vor.u32 %v6187_v36, %v4339_v35 }
  0x34   :  { %414 = vmatpush.bf16.msra.mxu1 %v4248_v5  ;;  %v4503_v40 = vld [vmem:[#allocation4 + $0x118] sm:$0xf]  ;;  %v6230_v41 = vld [vmem:[#allocation4 + $0x128] sm:$0xf0]  ;;  %v4483_v46 = vld [vmem:[#allocation4 + $0xf0] sm:$0xf]  ;;  %v4320_v57 = vor.u32 %v6182_v39, %v4319_v38 }
  0x35   :  { %427 = vmatpush.bf16.msra.mxu2 %v4252_v6  ;;  %440 = vmatpush.bf16.msra.mxu3 %v4256_v10  ;;  %v4663_v42 = vld [vmem:[#allocation4 + $0x258] sm:$0xf]  ;;  %v4504_v44 = vor.u32 %v6230_v41, %v4503_v40  ;;  %v6270_v45 = vld [vmem:[#allocation4 + $0x268] sm:$0xf0]  ;;  %v6225_v47 = vld [vmem:[#allocation4 + $0x100] sm:$0xf0] }
  0x36   :  { %v4664_v48 = vor.u32 %v6270_v45, %v4663_v42  ;;  %v4643_v49 = vld [vmem:[#allocation4 + $0x230] sm:$0xf]  ;;  %v6265_v50 = vld [vmem:[#allocation4 + $0x240] sm:$0xf0]  ;;  %v4823_v51 = vld [vmem:[#allocation4 + $0x398] sm:$0xf]  ;;  %v4484_v54 = vor.u32 %v6225_v47, %v4483_v46 }
  0x37   :  { %402 = vmatpush.bf16.msra.mxu0 %v4224_v16  ;;  %v6310_v52 = vld [vmem:[#allocation4 + $0x3a8] sm:$0xf0]  ;;  %v4299_v53 = vld [vmem:[#allocation2 + $0xb0] sm:$0xf]  ;;  %v4463_v56 = vld [vmem:[#allocation4 + $0xc8] sm:$0xf]  ;;  %v4644_v58 = vor.u32 %v6265_v50, %v4643_v49 }
  0x38   :  { %415 = vmatpush.bf16.msra.mxu1 %v4228_v18  ;;  %v4824_v55 = vor.u32 %v6310_v52, %v4823_v51  ;;  %v6220_v59 = vld [vmem:[#allocation4 + $0xd8] sm:$0xf0]  ;;  %v4803_v60 = vld [vmem:[#allocation4 + $0x370] sm:$0xf]  ;;  %v6305_v61 = vld [vmem:[#allocation4 + $0x380] sm:$0xf0] }
  0x39   :  { %428 = vmatpush.bf16.msra.mxu2 %v4232_v19  ;;  %441 = vmatpush.bf16.msra.mxu3 %v4236_v23  ;;  %v6177_v62 = vld [vmem:[#allocation2 + $0xc0] sm:$0xf0]  ;;  %v4623_v63 = vld [vmem:[#allocation4 + $0x208] sm:$0xf]  ;;  %v6260_v0 = vld [vmem:[#allocation4 + $0x218] sm:$0xf0]  ;;  %v4804_v1 = vor.u32 %v6305_v61, %v4803_v60  ;;  %v4464_v2 = vor.u32 %v6220_v59, %v4463_v56 }
  0x3a   :  { %v4783_v3 = vld [vmem:[#allocation4 + $0x348] sm:$0xf]  ;;  %v6300_v4 = vld [vmem:[#allocation4 + $0x358] sm:$0xf0]  ;;  %v4300_v5 = vor.u32 %v6177_v62, %v4299_v53  ;;  %v4624_v7 = vor.u32 %v6260_v0, %v4623_v63  ;;  %v4443_v8 = vld [vmem:[#allocation4 + $0xa0] sm:$0xf] }
  0x3b   :  { %403 = vmatpush.bf16.msra.mxu0 %v4204_v30  ;;  %v4279_v6 = vld [vmem:[#allocation2 + $0x88] sm:$0xf]  ;;  %v6215_v9 = vld [vmem:[#allocation4 + $0xb0] sm:$0xf0]  ;;  %v6172_v10 = vld [vmem:[#allocation2 + $0x98] sm:$0xf0]  ;;  %v4784_v13 = vor.u32 %v6300_v4, %v4783_v3 }
  0x3c   :  { %416 = vmatpush.bf16.msra.mxu1 %v4208_v31  ;;  %v4603_v11 = vld [vmem:[#allocation4 + $0x1e0] sm:$0xf]  ;;  %v6255_v12 = vld [vmem:[#allocation4 + $0x1f0] sm:$0xf0]  ;;  %v4444_v16 = vor.u32 %v6215_v9, %v4443_v8  ;;  %v4280_v17 = vor.u32 %v6172_v10, %v4279_v6  ;;  %v4423_v20 = vld [vmem:[#allocation4 + $0x78] sm:$0xf] }
  0x3d   :  { %429 = vmatpush.bf16.msra.mxu2 %v4212_v32  ;;  %442 = vmatpush.bf16.msra.mxu3 %v4216_v33  ;;  %v4763_v14 = vld [vmem:[#allocation4 + $0x320] sm:$0xf]  ;;  %v6295_v15 = vld [vmem:[#allocation4 + $0x330] sm:$0xf0]  ;;  %v4604_v19 = vor.u32 %v6255_v12, %v4603_v11  ;;  %v6210_v21 = vld [vmem:[#allocation4 + $0x88] sm:$0xf0] }
  0x3e   :  { %404 = vmatmul.bf16.vlgmr.msra.gmra.mxu0 %v6921_v37  ;;  %v4259_v18 = vld [vmem:[#allocation2 + $0x60] sm:$0xf]  ;;  %v6167_v22 = vld [vmem:[#allocation2 + $0x70] sm:$0xf0]  ;;  %v4583_v23 = vld [vmem:[#allocation4 + $0x1b8] sm:$0xf]  ;;  %v4764_v25 = vor.u32 %v6295_v15, %v4763_v14  ;;  %v4424_v28 = vor.u32 %v6210_v21, %v4423_v20 }
  0x3f   :  { %448 = vmatpush.bf16.msrb.mxu0 %v4360_v34  ;;  %417 = vmatmul.bf16.vlgmr.msra.gmra.mxu1 %v6921_v37  ;;  %v6250_v24 = vld [vmem:[#allocation4 + $0x1c8] sm:$0xf0]  ;;  %v4743_v26 = vld [vmem:[#allocation4 + $0x2f8] sm:$0xf]  ;;  %v4260_v29 = vor.u32 %v6167_v22, %v4259_v18  ;;  %v4403_v32 = vld [vmem:[#allocation4 + $0x50] sm:$0xf] }
  0x40   :  { %430 = vmatmul.bf16.vlgmr.msra.gmra.mxu2 %v6921_v37  ;;  %443 = vmatmul.bf16.vlgmr.msra.gmra.mxu3 %v6921_v37  ;;  %v6290_v27 = vld [vmem:[#allocation4 + $0x308] sm:$0xf0]  ;;  %v4239_v30 = vld [vmem:[#allocation2 + $0x38] sm:$0xf]  ;;  %v4584_v31 = vor.u32 %v6250_v24, %v4583_v23  ;;  %v6205_v33 = vld [vmem:[#allocation4 + $0x60] sm:$0xf0] }
  0x41   :  { %1763 = vmatpush.bf16.msrb.mxu1 %v4504_v44  ;;  %1776 = vmatpush.bf16.msrb.mxu2 %v4664_v48  ;;  %v6162_v34 = vld [vmem:[#allocation2 + $0x48] sm:$0xf0]  ;;  %v4563_v35 = vld [vmem:[#allocation4 + $0x190] sm:$0xf]  ;;  %v6245_v36 = vld [vmem:[#allocation4 + $0x1a0] sm:$0xf0]  ;;  %v4744_v38 = vor.u32 %v6290_v27, %v4743_v26  ;;  %v4404_v42 = vor.u32 %v6205_v33, %v4403_v32 }
  0x42   :  { %1789 = vmatpush.bf16.msrb.mxu3 %v4824_v55  ;;  %v4723_v39 = vld [vmem:[#allocation4 + $0x2d0] sm:$0xf]  ;;  %v6285_v40 = vld [vmem:[#allocation4 + $0x2e0] sm:$0xf0]  ;;  %v4564_v45 = vor.u32 %v6245_v36, %v4563_v35  ;;  %v4383_v46 = vld [vmem:[#allocation4 + $0x28] sm:$0xf] }
  0x43   :  { %449 = vmatpush.bf16.msrb.mxu0 %v4340_v43  ;;  %v4219_v41 = vld [vmem:[#allocation2 + $0x10] sm:$0xf]  ;;  %v4240_v43 = vor.u32 %v6162_v34, %v4239_v30  ;;  %v6157_v44 = vld [vmem:[#allocation2 + $0x20] sm:$0xf0]  ;;  %v6200_v47 = vld [vmem:[#allocation4 + $0x38] sm:$0xf0]  ;;  %v4724_v51 = vor.u32 %v6285_v40, %v4723_v39 }
  0x44   :  { %v4983_v48 = vld [vmem:[#allocation4 + $0x4d8] sm:$0xf]  ;;  %v4543_v49 = vld [vmem:[#allocation4 + $0x168] sm:$0xf]  ;;  %v6240_v50 = vld [vmem:[#allocation4 + $0x178] sm:$0xf0]  ;;  %v4384_v55 = vor.u32 %v6200_v47, %v4383_v46  ;;  %v4220_v56 = vor.u32 %v6157_v44, %v4219_v41 }
  0x45   :  { %1764 = vmatpush.bf16.msrb.mxu1 %v4484_v54  ;;  %1777 = vmatpush.bf16.msrb.mxu2 %v4644_v58  ;;  %v6350_v52 = vld [vmem:[#allocation4 + $0x4e8] sm:$0xf0]  ;;  %v4703_v53 = vld [vmem:[#allocation4 + $0x2a8] sm:$0xf]  ;;  %v6280_v54 = vld [vmem:[#allocation4 + $0x2b8] sm:$0xf0]  ;;  %v4544_v58 = vor.u32 %v6240_v50, %v4543_v49 }
  0x46   :  { %1790 = vmatpush.bf16.msrb.mxu3 %v4804_v1  ;;  %v4363_v59 = vld [vmem:[#allocation4] sm:$0xf]  ;;  %v6195_v60 = vld [vmem:[#allocation4 + $0x10] sm:$0xf0]  ;;  %v4984_v62 = vor.u32 %v6350_v52, %v4983_v48  ;;  %v5143_v0 = vld [vmem:[#allocation4 + $0x618] sm:$0xf] }
  0x47   :  { %450 = vmatpush.bf16.msrb.mxu0 %v4320_v57  ;;  %v4963_v57 = vld [vmem:[#allocation4 + $0x4b0] sm:$0xf]  ;;  %v4523_v61 = vld [vmem:[#allocation4 + $0x140] sm:$0xf]  ;;  %v6235_v63 = vld [vmem:[#allocation4 + $0x150] sm:$0xf0]  ;;  %v4364_v6 = vor.u32 %v6195_v60, %v4363_v59 }
  0x48   :  { %v6390_v1 = vld [vmem:[#allocation4 + $0x628] sm:$0xf0]  ;;  %v6345_v3 = vld [vmem:[#allocation4 + $0x4c0] sm:$0xf0]  ;;  %v6228_v4 = vld [vmem:[#allocation4 + $0x11c] sm:$0xf]  ;;  %v4524_v9 = vor.u32 %v6235_v63, %v4523_v61 }
  0x49   :  { %1765 = vmatpush.bf16.msrb.mxu1 %v4464_v2  ;;  %1778 = vmatpush.bf16.msrb.mxu2 %v4624_v7  ;;  %v4704_v2 = vor.u32 %v6280_v54, %v4703_v53  ;;  %v4683_v7 = vld [vmem:[#allocation4 + $0x280] sm:$0xf]  ;;  %v6275_v8 = vld [vmem:[#allocation4 + $0x290] sm:$0xf0]  ;;  %v5144_v10 = vor.u32 %v6390_v1, %v5143_v0  ;;  %v6268_v11 = vld [vmem:[#allocation4 + $0x25c] sm:$0xf] }
  0x4a   :  { %1791 = vmatpush.bf16.msrb.mxu3 %v4784_v13  ;;  %v4665_v12 = vld [vmem:[#allocation4 + $0x26c] sm:$0xf0]  ;;  %v4964_v13 = vor.u32 %v6345_v3, %v4963_v57  ;;  %v4943_v14 = vld [vmem:[#allocation4 + $0x488] sm:$0xf]  ;;  %v6340_v18 = vld [vmem:[#allocation4 + $0x498] sm:$0xf0]  ;;  %v4684_v21 = vor.u32 %v6275_v8, %v4683_v7 }
  0x4b   :  { %451 = vmatpush.bf16.msrb.mxu0 %v4300_v5  ;;  %v4505_v5 = vld [vmem:[#allocation4 + $0x12c] sm:$0xf0]  ;;  %v4485_v20 = vld [vmem:[#allocation4 + $0x104] sm:$0xf0]  ;;  %v4668_v22 = vor.u32 %v6268_v11, %v4665_v12  ;;  %v6263_v24 = vld [vmem:[#allocation4 + $0x234] sm:$0xf]  ;;  %v4944_v26 = vor.u32 %v6340_v18, %v4943_v14 }
  0x4c   :  { %v4508_v15 = vor.u32 %v6228_v4, %v4505_v5  ;;  %v4923_v27 = vld [vmem:[#allocation4 + $0x460] sm:$0xf]  ;;  %v6380_v30 = vld [vmem:[#allocation4 + $0x5d8] sm:$0xf0]  ;;  %v6218_v32 = vld [vmem:[#allocation4 + $0xcc] sm:$0xf] }
  0x4d   :  { %1766 = vmatpush.bf16.msrb.mxu1 %v4444_v16  ;;  %1779 = vmatpush.bf16.msrb.mxu2 %v4604_v19  ;;  %v5123_v16 = vld [vmem:[#allocation4 + $0x5f0] sm:$0xf]  ;;  %v6223_v19 = vld [vmem:[#allocation4 + $0xf4] sm:$0xf]  ;;  %v4465_v33 = vld [vmem:[#allocation4 + $0xdc] sm:$0xf0] }
  0x4e   :  { %1792 = vmatpush.bf16.msrb.mxu3 %v4764_v25  ;;  %v4645_v25 = vld [vmem:[#allocation4 + $0x244] sm:$0xf0]  ;;  %v6258_v35 = vld [vmem:[#allocation4 + $0x20c] sm:$0xf]  ;;  %v4625_v36 = vld [vmem:[#allocation4 + $0x21c] sm:$0xf0]  ;;  %v4468_v40 = vor.u32 %v6218_v32, %v4465_v33 }
  0x4f   :  { %452 = vmatpush.bf16.msrb.mxu0 %v4280_v17  ;;  %v6385_v17 = vld [vmem:[#allocation4 + $0x600] sm:$0xf0]  ;;  %v4903_v39 = vld [vmem:[#allocation4 + $0x438] sm:$0xf]  ;;  %v5083_v41 = vld [vmem:[#allocation4 + $0x5a0] sm:$0xf]  ;;  %v4628_v46 = vor.u32 %v6258_v35, %v4625_v36 }
  0x50   :  { %v5124_v23 = vor.u32 %v6385_v17, %v5123_v16  ;;  %v6213_v44 = vld [vmem:[#allocation4 + $0xa4] sm:$0xf]  ;;  %v4883_v49 = vld [vmem:[#allocation4 + $0x410] sm:$0xf]  ;;  %v6370_v52 = vld [vmem:[#allocation4 + $0x588] sm:$0xf0] }
  0x51   :  { %1767 = vmatpush.bf16.msrb.mxu1 %v4424_v28  ;;  %1780 = vmatpush.bf16.msrb.mxu2 %v4584_v31  ;;  %v4488_v28 = vor.u32 %v6223_v19, %v4485_v20  ;;  %v6335_v31 = vld [vmem:[#allocation4 + $0x470] sm:$0xf0]  ;;  %v6325_v53 = vld [vmem:[#allocation4 + $0x420] sm:$0xf0]  ;;  %v6208_v54 = vld [vmem:[#allocation4 + $0x7c] sm:$0xf] }
  0x52   :  { %1793 = vmatpush.bf16.msrb.mxu3 %v4744_v38  ;;  %v4924_v38 = vor.u32 %v6335_v31, %v4923_v27  ;;  %v4884_v57 = vor.u32 %v6325_v53, %v4883_v49  ;;  %v4863_v59 = vld [vmem:[#allocation4 + $0x3e8] sm:$0xf]  ;;  %v6320_v60 = vld [vmem:[#allocation4 + $0x3f8] sm:$0xf0]  ;;  %v6315_v63 = vld [vmem:[#allocation4 + $0x3d0] sm:$0xf0] }
  0x53   :  { %453 = vmatpush.bf16.msrb.mxu0 %v4260_v29  ;;  %v5103_v29 = vld [vmem:[#allocation4 + $0x5c8] sm:$0xf]  ;;  %v4864_v61 = vor.u32 %v6320_v60, %v4863_v59  ;;  %v6308_v0 = vld [vmem:[#allocation4 + $0x39c] sm:$0xf]  ;;  %v4825_v1 = vld [vmem:[#allocation4 + $0x3ac] sm:$0xf0] }
  0x54   :  { %v5104_v34 = vor.u32 %v6380_v30, %v5103_v29  ;;  %v4828_v3 = vor.u32 %v6308_v0, %v4825_v1  ;;  %v6303_v4 = vld [vmem:[#allocation4 + $0x374] sm:$0xf]  ;;  %v4805_v5 = vld [vmem:[#allocation4 + $0x384] sm:$0xf0]  ;;  %v6298_v7 = vld [vmem:[#allocation4 + $0x34c] sm:$0xf] }
  0x55   :  { %1768 = vmatpush.bf16.msrb.mxu1 %v4404_v42  ;;  %1781 = vmatpush.bf16.msrb.mxu2 %v4564_v45  ;;  %v6375_v42 = vld [vmem:[#allocation4 + $0x5b0] sm:$0xf0]  ;;  %v4445_v45 = vld [vmem:[#allocation4 + $0xb4] sm:$0xf0]  ;;  %v4785_v8 = vld [vmem:[#allocation4 + $0x35c] sm:$0xf0] }
  0x56   :  { %1794 = vmatpush.bf16.msrb.mxu3 %v4724_v51  ;;  %v5084_v47 = vor.u32 %v6375_v42, %v5083_v41  ;;  %v4448_v50 = vor.u32 %v6213_v44, %v4445_v45  ;;  %v5063_v51 = vld [vmem:[#allocation4 + $0x578] sm:$0xf]  ;;  %v6293_v12 = vld [vmem:[#allocation4 + $0x324] sm:$0xf]  ;;  %v5043_v16 = vld [vmem:[#allocation4 + $0x550] sm:$0xf] }
  0x57   :  { %454 = vmatpush.bf16.msrb.mxu0 %v4240_v43  ;;  %v6330_v43 = vld [vmem:[#allocation4 + $0x448] sm:$0xf0]  ;;  %v4605_v11 = vld [vmem:[#allocation4 + $0x1f4] sm:$0xf0]  ;;  %v6365_v17 = vld [vmem:[#allocation4 + $0x560] sm:$0xf0] }
  0x58   :  { %v4904_v48 = vor.u32 %v6330_v43, %v4903_v39  ;;  %v4765_v14 = vld [vmem:[#allocation4 + $0x334] sm:$0xf0]  ;;  %v6203_v18 = vld [vmem:[#allocation4 + $0x54] sm:$0xf]  ;;  %v5044_v19 = vor.u32 %v6365_v17, %v5043_v16  ;;  %v4405_v20 = vld [vmem:[#allocation4 + $0x64] sm:$0xf0] }
  0x59   :  { %1769 = vmatpush.bf16.msrb.mxu1 %v4384_v55  ;;  %1782 = vmatpush.bf16.msrb.mxu2 %v4544_v58  ;;  %v4425_v55 = vld [vmem:[#allocation4 + $0x8c] sm:$0xf0]  ;;  %v6360_v29 = vld [vmem:[#allocation4 + $0x538] sm:$0xf0]  ;;  %v6198_v30 = vld [vmem:[#allocation4 + $0x2c] sm:$0xf] }
  0x5a   :  { %1795 = vmatpush.bf16.msrb.mxu3 %v4704_v2  ;;  %v4428_v58 = vor.u32 %v6208_v54, %v4425_v55  ;;  %v4385_v32 = vld [vmem:[#allocation4 + $0x3c] sm:$0xf0]  ;;  %v6283_v35 = vld [vmem:[#allocation4 + $0x2d4] sm:$0xf]  ;;  %v6193_v42 = vld [vmem:[#allocation4 + $0x4] sm:$0xf] }
  0x5b   :  { %455 = vmatpush.bf16.msrb.mxu0 %v4220_v56  ;;  %v5064_v56 = vor.u32 %v6370_v52, %v5063_v51  ;;  %v4388_v33 = vor.u32 %v6198_v30, %v4385_v32  ;;  %v6355_v41 = vld [vmem:[#allocation4 + $0x510] sm:$0xf0]  ;;  %v4365_v44 = vld [vmem:[#allocation4 + $0x14] sm:$0xf0]  ;;  %v4705_v49 = vld [vmem:[#allocation4 + $0x2bc] sm:$0xf0] }
  0x5c   :  { %v4368_v45 = vor.u32 %v6193_v42, %v4365_v44  ;;  %v6233_v52 = vld [vmem:[#allocation4 + $0x144] sm:$0xf]  ;;  %v4525_v53 = vld [vmem:[#allocation4 + $0x154] sm:$0xf0]  ;;  %v4945_v30 = vld [vmem:[#allocation4 + $0x49c] sm:$0xf0] }
  0x5d   :  { %1770 = vmatpush.bf16.msrb.mxu1 %v4364_v6  ;;  %1783 = vmatpush.bf16.msrb.mxu2 %v4524_v9  ;;  %v4808_v6 = vor.u32 %v6303_v4, %v4805_v5  ;;  %v4788_v9 = vor.u32 %v6298_v7, %v4785_v8  ;;  %v4528_v54 = vor.u32 %v6233_v52, %v4525_v53  ;;  %v6273_v55 = vld [vmem:[#allocation4 + $0x284] sm:$0xf]  ;;  %v4985_v4 = vld [vmem:[#allocation4 + $0x4ec] sm:$0xf0]  ;;  %v6378_v32 = vld [vmem:[#allocation4 + $0x5cc] sm:$0xf] }
  0x5e   :  { %456 = vmatmul.bf16.vlgmr.msrb.gmra.mxu0 %v6921_v37  ;;  %1796 = vmatpush.bf16.msrb.mxu3 %v4684_v21  ;;  %v4648_v37 = vor.u32 %v6263_v24, %v4645_v25  ;;  %v4408_v21 = vor.u32 %v6203_v18, %v4405_v20  ;;  %v6288_v24 = vld [vmem:[#allocation4 + $0x2fc] sm:$0xf]  ;;  %v5145_v7 = vld [vmem:[#allocation4 + $0x62c] sm:$0xf0]  ;;  %v6343_v18 = vld [vmem:[#allocation4 + $0x4b4] sm:$0xf] }
  0x5f   :  { %1802 = vmatpush.bf16.msra.mxu0 %v4984_v62  ;;  %v4843_v62 = vld [vmem:[#allocation4 + $0x3c0] sm:$0xf]  ;;  %v6226_v42 = vld [vmem:[#allocation4 + $0x108] sm:$0xf0] }
  0x60   :  { %v4844_v2 = vor.u32 %v6315_v63, %v4843_v62 }
  0x61   :  { %1815 = vmatpush.bf16.msra.mxu1 %v5144_v10  ;;  %1828 = vmatpush.bf16.msra.mxu2 %v4508_v15  ;;  %v6253_v10 = vld [vmem:[#allocation4 + $0x1e4] sm:$0xf]  ;;  %v4768_v15 = vor.u32 %v6293_v12, %v4765_v14 }
  0x62   :  { %1841 = vmatpush.bf16.msra.mxu3 %v4668_v22  ;;  %v6248_v22 = vld [vmem:[#allocation4 + $0x1bc] sm:$0xf] }
  0x63   :  { %1803 = vmatpush.bf16.msra.mxu0 %v4964_v13  ;;  %v4608_v13 = vor.u32 %v6253_v10, %v4605_v11 }
  0x65   :  { %1816 = vmatpush.bf16.msra.mxu1 %v5124_v23  ;;  %1829 = vmatpush.bf16.msra.mxu2 %v4488_v28  ;;  %v4585_v23 = vld [vmem:[#allocation4 + $0x1cc] sm:$0xf0]  ;;  %v5023_v28 = vld [vmem:[#allocation4 + $0x528] sm:$0xf] }
  0x66   :  { %1842 = vmatpush.bf16.msra.mxu3 %v4648_v37  ;;  %v4588_v25 = vor.u32 %v6248_v22, %v4585_v23  ;;  %v5024_v31 = vor.u32 %v6360_v29, %v5023_v28  ;;  %v6243_v37 = vld [vmem:[#allocation4 + $0x194] sm:$0xf]  ;;  %v5125_v22 = vld [vmem:[#allocation4 + $0x604] sm:$0xf0]  ;;  %v6338_v29 = vld [vmem:[#allocation4 + $0x48c] sm:$0xf] }
  0x67   :  { %1804 = vmatpush.bf16.msra.mxu0 %v4944_v26  ;;  %v4745_v26 = vld [vmem:[#allocation4 + $0x30c] sm:$0xf0]  ;;  %v6271_v28 = vld [vmem:[#allocation4 + $0x270] sm:$0xf0] }
  0x68   :  { %v4748_v27 = vor.u32 %v6288_v24, %v4745_v26  ;;  %v4511_v24 = vld [vmem:[#allocation4 + $0x120] sm:$0xf] }
  0x69   :  { %1817 = vmatpush.bf16.msra.mxu1 %v5104_v34  ;;  %1830 = vmatpush.bf16.msra.mxu2 %v4468_v40  ;;  %v4565_v34 = vld [vmem:[#allocation4 + $0x1a4] sm:$0xf0]  ;;  %v5003_v40 = vld [vmem:[#allocation4 + $0x500] sm:$0xf] }
  0x6a   :  { %1843 = vmatpush.bf16.msra.mxu3 %v4628_v46  ;;  %v4568_v36 = vor.u32 %v6243_v37, %v4565_v34  ;;  %v5004_v43 = vor.u32 %v6355_v41, %v5003_v40  ;;  %v6238_v46 = vld [vmem:[#allocation4 + $0x16c] sm:$0xf]  ;;  %v4671_v26 = vld [vmem:[#allocation4 + $0x260] sm:$0xf]  ;;  %v4948_v40 = vor.u32 %v6338_v29, %v4945_v30  ;;  %v4491_v41 = vld [vmem:[#allocation4 + $0xf8] sm:$0xf] }
  0x6b   :  { %1805 = vmatpush.bf16.msra.mxu0 %v4924_v38  ;;  %v4725_v38 = vld [vmem:[#allocation4 + $0x2e4] sm:$0xf0]  ;;  %v4411_v30 = vld [vmem:[#allocation4 + $0x58] sm:$0xf] }
  0x6c   :  { %v4728_v39 = vor.u32 %v6283_v35, %v4725_v38 }
  0x6d   :  { %1818 = vmatpush.bf16.msra.mxu1 %v5084_v47  ;;  %1831 = vmatpush.bf16.msra.mxu2 %v4448_v50  ;;  %v4545_v47 = vld [vmem:[#allocation4 + $0x17c] sm:$0xf0] }
  0x6e   :  { %1844 = vmatpush.bf16.msra.mxu3 %v4608_v13  ;;  %v4548_v50 = vor.u32 %v6238_v46, %v4545_v47  ;;  %v6266_v46 = vld [vmem:[#allocation4 + $0x248] sm:$0xf0]  ;;  %v6333_v47 = vld [vmem:[#allocation4 + $0x464] sm:$0xf] }
  0x6f   :  { %1806 = vmatpush.bf16.msra.mxu0 %v4904_v48  ;;  %v6278_v48 = vld [vmem:[#allocation4 + $0x2ac] sm:$0xf] }
  0x70   :  { %v4708_v51 = vor.u32 %v6278_v48, %v4705_v49  ;;  %v4925_v48 = vld [vmem:[#allocation4 + $0x474] sm:$0xf0]  ;;  %v6373_v49 = vld [vmem:[#allocation4 + $0x5a4] sm:$0xf] }
  0x71   :  { %1819 = vmatpush.bf16.msra.mxu1 %v5064_v56  ;;  %1832 = vmatpush.bf16.msra.mxu2 %v4428_v58  ;;  %v4685_v56 = vld [vmem:[#allocation4 + $0x294] sm:$0xf0]  ;;  %v6931_v58 = vld [vmem:[%s7087_s2] sm:$0x1f]  ;;  %v4928_v53 = vor.u32 %v6333_v47, %v4925_v48  ;;  %v6311_v47 = vld [vmem:[#allocation4 + $0x3b0] sm:$0xf0] }
  0x72   :  { %1845 = vmatpush.bf16.msra.mxu3 %v4588_v25  ;;  %v178_v59 = vperm.slane %v6931_v58, 0  ;;  %v179_v60 = vperm.slane %v6931_v58, 1  ;;  %v180_v1 = vperm.slane %v6931_v58, 2  ;;  %v6231_v25 = vld [vmem:[#allocation4 + $0x130] sm:$0xf0] }
  0x73   :  { %1807 = vmatpush.bf16.msra.mxu0 %v4884_v57  ;;  %v4688_v57 = vor.u32 %v6273_v55, %v4685_v56  ;;  %v4512_v34 = vor.u32 %v6231_v25, %v4511_v24  ;;  %v6221_v55 = vld [vmem:[#allocation4 + $0xe0] sm:$0xf0]  ;;  %v4865_v25 = vld [vmem:[#allocation4 + $0x3fc] sm:$0xf0]  ;;  %v4391_v48 = vld [vmem:[#allocation4 + $0x30] sm:$0xf] }
  0x75   :  { %1820 = vmatpush.bf16.msra.mxu1 %v5044_v19  ;;  %1833 = vmatpush.bf16.msra.mxu2 %v4408_v21  ;;  %v4965_v19 = vld [vmem:[#allocation4 + $0x4c4] sm:$0xf0]  ;;  %v6383_v21 = vld [vmem:[#allocation4 + $0x5f4] sm:$0xf] }
  0x76   :  { %1846 = vmatpush.bf16.msra.mxu3 %v4568_v36  ;;  %v4968_v23 = vor.u32 %v6343_v18, %v4965_v19 }
  0x77   :  { %1808 = vmatpush.bf16.msra.mxu0 %v4864_v61 }
  0x79   :  { %1821 = vmatpush.bf16.msra.mxu1 %v5024_v31  ;;  %1834 = vmatpush.bf16.msra.mxu2 %v4388_v33  ;;  %v5105_v33 = vld [vmem:[#allocation4 + $0x5dc] sm:$0xf0] }
  0x7a   :  { %1847 = vmatpush.bf16.msra.mxu3 %v4548_v50  ;;  %v5085_v50 = vld [vmem:[#allocation4 + $0x5b4] sm:$0xf0] }
  0x7b   :  { %1809 = vmatpush.bf16.msra.mxu0 %v4844_v2  ;;  %v181_v2 = vperm.slane %v6931_v58, 3  ;;  %v5088_v56 = vor.u32 %v6373_v49, %v5085_v50  ;;  %v6201_v49 = vld [vmem:[#allocation4 + $0x40] sm:$0xf0] }
  0x7d   :  { %1822 = vmatpush.bf16.msra.mxu1 %v5004_v43  ;;  %1835 = vmatpush.bf16.msra.mxu2 %v4368_v45  ;;  %v4651_v43 = vld [vmem:[#allocation4 + $0x238] sm:$0xf]  ;;  %v5108_v45 = vor.u32 %v6378_v32, %v5105_v33 }
  0x7e   :  { %1848 = vmatpush.bf16.msra.mxu3 %v4528_v54  ;;  %v4652_v52 = vor.u32 %v6266_v46, %v4651_v43  ;;  %v4471_v54 = vld [vmem:[#allocation4 + $0xd0] sm:$0xf]  ;;  %v4991_v43 = vld [vmem:[#allocation4 + $0x4e0] sm:$0xf] }
  0x7f   :  { %1854 = vmatpush.bf16.msrb.mxu0 %v4828_v3  ;;  %v6348_v3 = vld [vmem:[#allocation4 + $0x4dc] sm:$0xf] }
  0x80   :  { %v4988_v13 = vor.u32 %v6348_v3, %v4985_v4  ;;  %v4451_v3 = vld [vmem:[#allocation4 + $0xa8] sm:$0xf]  ;;  %v6216_v4 = vld [vmem:[#allocation4 + $0xb8] sm:$0xf0] }
  0x83   :  { %1855 = vmatpush.bf16.msrb.mxu0 %v4808_v6  ;;  %v6388_v6 = vld [vmem:[#allocation4 + $0x61c] sm:$0xf] }
  0x84   :  { %v5148_v17 = vor.u32 %v6388_v6, %v5145_v7  ;;  %v4611_v7 = vld [vmem:[#allocation4 + $0x1e8] sm:$0xf] }
  0x87   :  { %1856 = vmatpush.bf16.msrb.mxu0 %v4788_v9 }
  0x8b   :  { %1857 = vmatpush.bf16.msrb.mxu0 %v4768_v15 }
  0x8f   :  { %1858 = vmatpush.bf16.msrb.mxu0 %v4748_v27  ;;  %v5128_v27 = vor.u32 %v6383_v21, %v5125_v22  ;;  %v4591_v21 = vld [vmem:[#allocation4 + $0x1c0] sm:$0xf]  ;;  %v6251_v22 = vld [vmem:[#allocation4 + $0x1d0] sm:$0xf0] }
  0x90   :  { %v4592_v29 = vor.u32 %v6251_v22, %v4591_v21  ;;  %v5131_v21 = vld [vmem:[#allocation4 + $0x5f8] sm:$0xf]  ;;  %v6386_v22 = vld [vmem:[#allocation4 + $0x608] sm:$0xf0] }
  0x93   :  { %1859 = vmatpush.bf16.msrb.mxu0 %v4728_v39  ;;  %v4672_v39 = vor.u32 %v6271_v28, %v4671_v26  ;;  %v6358_v26 = vld [vmem:[#allocation4 + $0x52c] sm:$0xf] }
  0x97   :  { %1860 = vmatpush.bf16.msrb.mxu0 %v4708_v51  ;;  %v4492_v51 = vor.u32 %v6226_v42, %v4491_v41  ;;  %v4831_v42 = vld [vmem:[#allocation4 + $0x3a0] sm:$0xf] }
  0x9b   :  { %1861 = vmatpush.bf16.msrb.mxu0 %v4688_v57  ;;  %v4631_v57 = vld [vmem:[#allocation4 + $0x210] sm:$0xf] }
  0xbb   :  { %v405_v61 = vpop.f32.mrf.mxu0 }
  0xbc   :  { %v406_v62 = vadd.f32 %v405_v61, %v178_v59  ;;  %v418_v63 = vpop.f32.mrf.mxu1  ;;  %v6261_v59 = vld [vmem:[#allocation4 + $0x220] sm:$0xf0]  ;;  %v4905_v61 = vld [vmem:[#allocation4 + $0x44c] sm:$0xf0] }
  0xbd   :  { %v419_v0 = vadd.f32 %v418_v63, %v179_v60  ;;  %v6328_v60 = vld [vmem:[#allocation4 + $0x43c] sm:$0xf]  ;;  %v5065_v63 = vld [vmem:[#allocation4 + $0x58c] sm:$0xf0] }
  0xbe   :  { %6652 = vtanh.f32 %v406_v62  ;;  %v6368_v62 = vld [vmem:[#allocation4 + $0x57c] sm:$0xf] }
  0xbf   :  { %6654 = vtanh.f32 %v419_v0  ;;  %v4472_v0 = vor.u32 %v6221_v55, %v4471_v54  ;;  %v5068_v6 = vor.u32 %v6368_v62, %v5065_v63  ;;  %v6241_v54 = vld [vmem:[#allocation4 + $0x180] sm:$0xf0]  ;;  %v6306_v62 = vld [vmem:[#allocation4 + $0x388] sm:$0xf0]  ;;  %v4971_v63 = vld [vmem:[#allocation4 + $0x4b8] sm:$0xf] }
  0xc3   :  { %v431_v5 = vpop.f32.mrf.mxu2  ;;  %v444_v9 = vpop.f32.mrf.mxu3 }
  0xc4   :  { %v432_v8 = vadd.f32 %v431_v5, %v180_v1  ;;  %v407_v10 = vpop.f32.mrf.mxu0  ;;  %v6653_v11 = vpop.eup %6652  ;;  %v445_v12 = vadd.f32 %v444_v9, %v181_v2  ;;  %v4632_v1 = vor.u32 %v6261_v59, %v4631_v57  ;;  %v182_v2 = vperm.slane %v6931_v58, 4  ;;  %v6323_v9 = vld [vmem:[#allocation4 + $0x414] sm:$0xf]  ;;  %v4811_v57 = vld [vmem:[#allocation4 + $0x378] sm:$0xf] }
  0xc5   :  { %v420_v14 = vpop.f32.mrf.mxu1  ;;  %v6655_v15 = vpop.eup %6654  ;;  %v6937_v16 = vpack.c.bf16 %v6653_v11, %v6653_v11  ;;  %v4908_v5 = vor.u32 %v6328_v60, %v4905_v61  ;;  %v4885_v10 = vld [vmem:[#allocation4 + $0x424] sm:$0xf0]  ;;  %v6363_v11 = vld [vmem:[#allocation4 + $0x554] sm:$0xf]  ;;  %v4832_v60 = vor.u32 %v6311_v47, %v4831_v42  ;;  %v4392_v61 = vor.u32 %v6201_v49, %v4391_v48  ;;  %v6376_v48 = vld [vmem:[#allocation4 + $0x5b8] sm:$0xf0] }
  0xc6   :  { %6656 = vtanh.f32 %v432_v8  ;;  %v6939_v20 = vpack.c.bf16 %v6655_v15, %v6655_v15  ;;  %v6256_v8 = vld [vmem:[#allocation4 + $0x1f8] sm:$0xf0]  ;;  %v4431_v15 = vld [vmem:[#allocation4 + $0x80] sm:$0xf]  ;;  %v4888_v18 = vor.u32 %v6323_v9, %v4885_v10  ;;  %v6229_v9 = vld [vmem:[#allocation4 + $0x124] sm:$0xf] }
  0xc7   :  { %6658 = vtanh.f32 %v445_v12  ;;  %1771 = vmatmul.bf16.vlgmr.msrb.gmra.mxu1 %v6937_v16  ;;  %v5045_v12 = vld [vmem:[#allocation4 + $0x564] sm:$0xf0]  ;;  %v4612_v14 = vor.u32 %v6256_v8, %v4611_v7  ;;  %v6391_v7 = vld [vmem:[#allocation4 + $0x630] sm:$0xf0]  ;;  %v4513_v10 = vld [vmem:[#allocation4 + $0x134] sm:$0xf0] }
  0xc8   :  { %1784 = vmatmul.bf16.vlgmr.msrb.gmra.mxu2 %v6939_v20  ;;  %1867 = vmatpush.bf16.msrb.mxu1 %v4988_v13  ;;  %v4452_v13 = vor.u32 %v6216_v4, %v4451_v3  ;;  %v5048_v19 = vor.u32 %v6363_v11, %v5045_v12  ;;  %v6196_v3 = vld [vmem:[#allocation4 + $0x18] sm:$0xf0]  ;;  %v4531_v4 = vld [vmem:[#allocation4 + $0x148] sm:$0xf]  ;;  %v4812_v11 = vor.u32 %v6306_v62, %v4811_v57  ;;  %v6286_v57 = vld [vmem:[#allocation4 + $0x2e8] sm:$0xf0] }
  0xc9   :  { %1880 = vmatpush.bf16.msrb.mxu2 %v5148_v17  ;;  %v6211_v17 = vld [vmem:[#allocation4 + $0x90] sm:$0xf0]  ;;  %v5091_v47 = vld [vmem:[#allocation4 + $0x5a8] sm:$0xf] }
  0xca   :  { %v4432_v28 = vor.u32 %v6211_v17, %v4431_v15  ;;  %v6371_v62 = vld [vmem:[#allocation4 + $0x590] sm:$0xf0] }
  0xcb   :  { %v433_v31 = vpop.f32.mrf.mxu2  ;;  %v446_v35 = vpop.f32.mrf.mxu3 }
  0xcc   :  { %v6657_v37 = vpop.eup %6656  ;;  %1868 = vmatpush.bf16.msrb.mxu1 %v4968_v23  ;;  %v6318_v23 = vld [vmem:[#allocation4 + $0x3ec] sm:$0xf]  ;;  %v6313_v35 = vld [vmem:[#allocation4 + $0x3c4] sm:$0xf] }
  0xcd   :  { %v6659_v36 = vpop.eup %6658  ;;  %v6943_v38 = vpack.c.bf16 %v6657_v37, %v6657_v37  ;;  %1881 = vmatpush.bf16.msrb.mxu2 %v5128_v27  ;;  %v5025_v27 = vld [vmem:[#allocation4 + $0x53c] sm:$0xf0]  ;;  %v6206_v31 = vld [vmem:[#allocation4 + $0x68] sm:$0xf0]  ;;  %v4868_v32 = vor.u32 %v6318_v23, %v4865_v25  ;;  %v4571_v37 = vld [vmem:[#allocation4 + $0x198] sm:$0xf] }
  0xce   :  { %v6945_v44 = vpack.c.bf16 %v6659_v36, %v6659_v36  ;;  %v5028_v33 = vor.u32 %v6358_v26, %v5025_v27  ;;  %v4845_v36 = vld [vmem:[#allocation4 + $0x3d4] sm:$0xf0]  ;;  %v4412_v41 = vor.u32 %v6206_v31, %v4411_v30  ;;  %v4493_v25 = vld [vmem:[#allocation4 + $0x10c] sm:$0xf0]  ;;  %v4931_v27 = vld [vmem:[#allocation4 + $0x468] sm:$0xf] }
  0xcf   :  { %1797 = vmatmul.bf16.vlgmr.msrb.gmra.mxu3 %v6943_v38  ;;  %v4771_v30 = vld [vmem:[#allocation4 + $0x328] sm:$0xf]  ;;  %v6296_v31 = vld [vmem:[#allocation4 + $0x338] sm:$0xf0] }
  0xd0   :  { %1810 = vmatmul.bf16.vlgmr.msra.gmra.mxu0 %v6945_v44  ;;  %1893 = vmatpush.bf16.msrb.mxu3 %v4512_v34  ;;  %v6246_v34 = vld [vmem:[#allocation4 + $0x1a8] sm:$0xf0] }
  0xd1   :  { %1906 = vmatpush.bf16.msra.mxu0 %v4672_v39  ;;  %1869 = vmatpush.bf16.msrb.mxu1 %v4948_v40  ;;  %v6353_v39 = vld [vmem:[#allocation4 + $0x504] sm:$0xf]  ;;  %v5005_v40 = vld [vmem:[#allocation4 + $0x514] sm:$0xf0]  ;;  %v4572_v46 = vor.u32 %v6246_v34, %v4571_v37 }
  0xd2   :  { %1882 = vmatpush.bf16.msrb.mxu2 %v5108_v45  ;;  %v6351_v45 = vld [vmem:[#allocation4 + $0x4f0] sm:$0xf0]  ;;  %v6381_v37 = vld [vmem:[#allocation4 + $0x5e0] sm:$0xf0] }
  0xd4   :  { %1894 = vmatpush.bf16.msrb.mxu3 %v4492_v51  ;;  %v4848_v51 = vor.u32 %v6313_v35, %v4845_v36  ;;  %v6219_v35 = vld [vmem:[#allocation4 + $0xd4] sm:$0xf]  ;;  %v4473_v36 = vld [vmem:[#allocation4 + $0xe4] sm:$0xf0] }
  0xd5   :  { %1907 = vmatpush.bf16.msra.mxu0 %v4652_v52  ;;  %1870 = vmatpush.bf16.msrb.mxu1 %v4928_v53  ;;  %v5008_v52 = vor.u32 %v6353_v39, %v5005_v40  ;;  %v4551_v53 = vld [vmem:[#allocation4 + $0x170] sm:$0xf]  ;;  %v4772_v39 = vor.u32 %v6296_v31, %v4771_v30  ;;  %v4911_v40 = vld [vmem:[#allocation4 + $0x440] sm:$0xf]  ;;  %v4393_v30 = vld [vmem:[#allocation4 + $0x44] sm:$0xf0] }
  0xd6   :  { %1883 = vmatpush.bf16.msrb.mxu2 %v5088_v56  ;;  %v4992_v56 = vor.u32 %v6351_v45, %v4991_v43  ;;  %v4751_v43 = vld [vmem:[#allocation4 + $0x300] sm:$0xf]  ;;  %v6291_v45 = vld [vmem:[#allocation4 + $0x310] sm:$0xf0] }
  0xd8   :  { %1895 = vmatpush.bf16.msrb.mxu3 %v4472_v0  ;;  %1836 = vmatmul.bf16.vlgmr.msra.gmra.mxu2 %v6937_v16  ;;  %v6346_v0 = vld [vmem:[#allocation4 + $0x4c8] sm:$0xf0] }
  0xd9   :  { %1908 = vmatpush.bf16.msra.mxu0 %v4632_v1  ;;  %1871 = vmatpush.bf16.msrb.mxu1 %v4908_v5  ;;  %v4552_v1 = vor.u32 %v6241_v54, %v4551_v53  ;;  %v6236_v5 = vld [vmem:[#allocation4 + $0x158] sm:$0xf0]  ;;  %v4972_v8 = vor.u32 %v6346_v0, %v4971_v63  ;;  %v4891_v53 = vld [vmem:[#allocation4 + $0x418] sm:$0xf]  ;;  %v6326_v54 = vld [vmem:[#allocation4 + $0x428] sm:$0xf0] }
  0xda   :  { %1884 = vmatpush.bf16.msrb.mxu2 %v5068_v6  ;;  %v5151_v6 = vld [vmem:[#allocation4 + $0x620] sm:$0xf]  ;;  %v4532_v15 = vor.u32 %v6236_v5, %v4531_v4  ;;  %v4892_v63 = vor.u32 %v6326_v54, %v4891_v53  ;;  %v6209_v0 = vld [vmem:[#allocation4 + $0x84] sm:$0xf]  ;;  %v6299_v53 = vld [vmem:[#allocation4 + $0x354] sm:$0xf] }
  0xdb   :  { %v457_v58 = vpop.f32.mrf.mxu0  ;;  %v5152_v17 = vor.u32 %v6391_v7, %v5151_v6  ;;  %v6321_v4 = vld [vmem:[#allocation4 + $0x400] sm:$0xf0]  ;;  %v4711_v6 = vld [vmem:[#allocation4 + $0x2b0] sm:$0xf]  ;;  %v4793_v54 = vld [vmem:[#allocation4 + $0x364] sm:$0xf0] }
  0xdc   :  { %v458_v24 = vadd.f32 %v457_v58, %v182_v2  ;;  %1896 = vmatpush.bf16.msrb.mxu3 %v4452_v13  ;;  %v4371_v2 = vld [vmem:[#allocation4 + $0x8] sm:$0xf]  ;;  %v4951_v13 = vld [vmem:[#allocation4 + $0x490] sm:$0xf]  ;;  %v6281_v7 = vld [vmem:[#allocation4 + $0x2c0] sm:$0xf0] }
  0xdd   :  { %1909 = vmatpush.bf16.msra.mxu0 %v4612_v14  ;;  %1872 = vmatpush.bf16.msrb.mxu1 %v4888_v18  ;;  %v4372_v12 = vor.u32 %v6196_v3, %v4371_v2  ;;  %v6341_v14 = vld [vmem:[#allocation4 + $0x4a0] sm:$0xf0]  ;;  %v4791_v58 = vld [vmem:[#allocation4 + $0x350] sm:$0xf] }
  0xde   :  { %6660 = vtanh.f32 %v458_v24  ;;  %1885 = vmatpush.bf16.msrb.mxu2 %v5048_v19  ;;  %v6301_v18 = vld [vmem:[#allocation4 + $0x360] sm:$0xf0]  ;;  %v4516_v19 = vor.u32 %v6229_v9, %v4513_v10  ;;  %v4952_v23 = vor.u32 %v6341_v14, %v4951_v13  ;;  %v6224_v24 = vld [vmem:[#allocation4 + $0xfc] sm:$0xf]  ;;  %v4871_v3 = vld [vmem:[#allocation4 + $0x3f0] sm:$0xf] }
  0xdf   :  { %1849 = vmatmul.bf16.vlgmr.msra.gmra.mxu3 %v6939_v20  ;;  %v4792_v26 = vor.u32 %v6301_v18, %v4791_v58  ;;  %v5051_v9 = vld [vmem:[#allocation4 + $0x558] sm:$0xf]  ;;  %v6366_v10 = vld [vmem:[#allocation4 + $0x568] sm:$0xf0]  ;;  %v4413_v13 = vld [vmem:[#allocation4 + $0x6c] sm:$0xf0] }
  0xe0   :  { %1862 = vmatmul.bf16.vlgmr.msrb.gmra.mxu0 %v6943_v38  ;;  %1897 = vmatpush.bf16.msrb.mxu3 %v4432_v28  ;;  %v6336_v28 = vld [vmem:[#allocation4 + $0x478] sm:$0xf0]  ;;  %v4691_v14 = vld [vmem:[#allocation4 + $0x288] sm:$0xf] }
  0xe1   :  { %1910 = vmatpush.bf16.msra.mxu0 %v4592_v29  ;;  %1873 = vmatpush.bf16.msrb.mxu1 %v4868_v32  ;;  %v5132_v29 = vor.u32 %v6386_v22, %v5131_v21  ;;  %v4496_v32 = vor.u32 %v6224_v24, %v4493_v25  ;;  %v4932_v34 = vor.u32 %v6336_v28, %v4931_v27  ;;  %v4851_v58 = vld [vmem:[#allocation4 + $0x3c8] sm:$0xf]  ;;  %v6316_v18 = vld [vmem:[#allocation4 + $0x3d8] sm:$0xf0]  ;;  %v6269_v21 = vld [vmem:[#allocation4 + $0x264] sm:$0xf] }
  0xe2   :  { %1886 = vmatpush.bf16.msrb.mxu2 %v5028_v33  ;;  %v5111_v33 = vld [vmem:[#allocation4 + $0x5d0] sm:$0xf]  ;;  %v6309_v22 = vld [vmem:[#allocation4 + $0x3a4] sm:$0xf]  ;;  %v4673_v25 = vld [vmem:[#allocation4 + $0x274] sm:$0xf0]  ;;  %v4852_v28 = vor.u32 %v6316_v18, %v4851_v58 }
  0xe3   :  { %v459_v50 = vpop.f32.mrf.mxu0  ;;  %v5112_v42 = vor.u32 %v6381_v37, %v5111_v33  ;;  %v6361_v27 = vld [vmem:[#allocation4 + $0x540] sm:$0xf0]  ;;  %v6264_v33 = vld [vmem:[#allocation4 + $0x23c] sm:$0xf]  ;;  %v4676_v37 = vor.u32 %v6269_v21, %v4673_v25  ;;  %v4753_v58 = vld [vmem:[#allocation4 + $0x314] sm:$0xf0] }
  0xe4   :  { %v6661_v55 = vpop.eup %6660  ;;  %1898 = vmatpush.bf16.msrb.mxu3 %v4412_v41  ;;  %v6331_v41 = vld [vmem:[#allocation4 + $0x450] sm:$0xf0]  ;;  %v6214_v50 = vld [vmem:[#allocation4 + $0xac] sm:$0xf]  ;;  %v4593_v21 = vld [vmem:[#allocation4 + $0x1d4] sm:$0xf0] }
  0xe5   :  { %v6953_v59 = vpack.c.bf16 %v6661_v55, %v6661_v55  ;;  %1911 = vmatpush.bf16.msra.mxu0 %v4572_v46  ;;  %1874 = vmatpush.bf16.msrb.mxu1 %v4848_v51  ;;  %v4476_v46 = vor.u32 %v6219_v35, %v4473_v36  ;;  %v4912_v49 = vor.u32 %v6331_v41, %v4911_v40  ;;  %v4453_v51 = vld [vmem:[#allocation4 + $0xbc] sm:$0xf0]  ;;  %v4653_v35 = vld [vmem:[#allocation4 + $0x24c] sm:$0xf0]  ;;  %v6304_v36 = vld [vmem:[#allocation4 + $0x37c] sm:$0xf] }
  0xe6   :  { %1887 = vmatpush.bf16.msrb.mxu2 %v5008_v52  ;;  %v4752_v52 = vor.u32 %v6291_v45, %v4751_v43  ;;  %v5092_v55 = vor.u32 %v6376_v48, %v5091_v47  ;;  %v5011_v41 = vld [vmem:[#allocation4 + $0x508] sm:$0xf]  ;;  %v6194_v43 = vld [vmem:[#allocation4 + $0xc] sm:$0xf]  ;;  %v4373_v45 = vld [vmem:[#allocation4 + $0x1c] sm:$0xf0] }
  0xe7   :  { %1823 = vmatmul.bf16.vlgmr.msra.gmra.mxu1 %v6953_v59  ;;  %v4993_v47 = vld [vmem:[#allocation4 + $0x4f4] sm:$0xf0] }
  0xe8   :  { %1899 = vmatpush.bf16.msrb.mxu3 %v4392_v61  ;;  %v5071_v61 = vld [vmem:[#allocation4 + $0x580] sm:$0xf] }
  0xe9   :  { %1919 = vmatpush.bf16.msra.mxu1 %v4832_v60  ;;  %1912 = vmatpush.bf16.msra.mxu0 %v4552_v1  ;;  %v4456_v60 = vor.u32 %v6214_v50, %v4453_v51  ;;  %v4433_v1 = vld [vmem:[#allocation4 + $0x94] sm:$0xf0]  ;;  %v5072_v5 = vor.u32 %v6371_v62, %v5071_v61  ;;  %v4656_v51 = vor.u32 %v6264_v33, %v4653_v35  ;;  %v6344_v62 = vld [vmem:[#allocation4 + $0x4bc] sm:$0xf]  ;;  %v4573_v33 = vld [vmem:[#allocation4 + $0x1ac] sm:$0xf0] }
  0xea   :  { %1932 = vmatpush.bf16.msra.mxu2 %v4992_v56  ;;  %v4731_v56 = vld [vmem:[#allocation4 + $0x2d8] sm:$0xf] }
  0xeb   :  { %1888 = vmatmul.bf16.vlgmr.msrb.gmra.mxu2 %v6953_v59  ;;  %v4732_v2 = vor.u32 %v6286_v57, %v4731_v56  ;;  %v5153_v50 = vld [vmem:[#allocation4 + $0x634] sm:$0xf0]  ;;  %v6259_v57 = vld [vmem:[#allocation4 + $0x214] sm:$0xf] }
  0xec   :  { %1900 = vmatpush.bf16.msrb.mxu3 %v4372_v12  ;;  %v6204_v12 = vld [vmem:[#allocation4 + $0x5c] sm:$0xf]  ;;  %v4913_v35 = vld [vmem:[#allocation4 + $0x454] sm:$0xf0] }
  0xed   :  { %1920 = vmatpush.bf16.msra.mxu1 %v4812_v11  ;;  %1913 = vmatpush.bf16.msra.mxu0 %v4532_v15  ;;  %v4872_v11 = vor.u32 %v6321_v4, %v4871_v3  ;;  %v4712_v15 = vor.u32 %v6281_v7, %v4711_v6  ;;  %v4416_v24 = vor.u32 %v6204_v12, %v4413_v13  ;;  %v6294_v4 = vld [vmem:[#allocation4 + $0x32c] sm:$0xf]  ;;  %v6379_v13 = vld [vmem:[#allocation4 + $0x5d4] sm:$0xf] }
  0xee   :  { %1933 = vmatpush.bf16.msra.mxu2 %v4972_v8  ;;  %v4436_v8 = vor.u32 %v6209_v0, %v4433_v1  ;;  %v4796_v0 = vor.u32 %v6299_v53, %v4793_v54  ;;  %v6384_v1 = vld [vmem:[#allocation4 + $0x5fc] sm:$0xf]  ;;  %v6254_v7 = vld [vmem:[#allocation4 + $0x1ec] sm:$0xf]  ;;  %v5053_v53 = vld [vmem:[#allocation4 + $0x56c] sm:$0xf0] }
  0xef   :  { %1901 = vmatmul.bf16.vlgmr.msrb.gmra.mxu3 %v6937_v16  ;;  %v6234_v54 = vld [vmem:[#allocation4 + $0x14c] sm:$0xf] }
  0xf0   :  { %1945 = vmatpush.bf16.msra.mxu3 %v5152_v17  ;;  %1914 = vmatmul.bf16.vlgmr.msra.gmra.mxu0 %v6939_v20  ;;  %v6276_v17 = vld [vmem:[#allocation4 + $0x298] sm:$0xf0] }
  0xf1   :  { %1958 = vmatpush.bf16.msrb.mxu0 %v4516_v19  ;;  %1921 = vmatpush.bf16.msra.mxu1 %v4792_v26  ;;  %v5052_v19 = vor.u32 %v6366_v10, %v5051_v9  ;;  %v5031_v26 = vld [vmem:[#allocation4 + $0x530] sm:$0xf]  ;;  %v4692_v31 = vor.u32 %v6276_v17, %v4691_v14  ;;  %v6339_v10 = vld [vmem:[#allocation4 + $0x494] sm:$0xf]  ;;  %v5113_v14 = vld [vmem:[#allocation4 + $0x5e4] sm:$0xf0] }
  0xf2   :  { %1934 = vmatpush.bf16.msra.mxu2 %v4952_v23  ;;  %v4833_v23 = vld [vmem:[#allocation4 + $0x3b4] sm:$0xf0]  ;;  %v6289_v17 = vld [vmem:[#allocation4 + $0x304] sm:$0xf] }
  0xf3   :  { %v4756_v25 = vor.u32 %v6289_v17, %v4753_v58  ;;  %v6314_v58 = vld [vmem:[#allocation4 + $0x3cc] sm:$0xf] }
  0xf4   :  { %1946 = vmatpush.bf16.msra.mxu3 %v5132_v29  ;;  %v6199_v29 = vld [vmem:[#allocation4 + $0x34] sm:$0xf] }
  0xf5   :  { %1959 = vmatpush.bf16.msrb.mxu0 %v4496_v32  ;;  %1922 = vmatpush.bf16.msra.mxu1 %v4772_v39  ;;  %v4836_v32 = vor.u32 %v6309_v22, %v4833_v23  ;;  %v4813_v39 = vld [vmem:[#allocation4 + $0x38c] sm:$0xf0]  ;;  %v4396_v40 = vor.u32 %v6199_v29, %v4393_v30  ;;  %v5116_v22 = vor.u32 %v6379_v13, %v5113_v14  ;;  %v6334_v23 = vld [vmem:[#allocation4 + $0x46c] sm:$0xf]  ;;  %v6284_v29 = vld [vmem:[#allocation4 + $0x2dc] sm:$0xf] }
  0xf6   :  { %1935 = vmatpush.bf16.msra.mxu2 %v4932_v34  ;;  %v5032_v34 = vor.u32 %v6361_v27, %v5031_v26  ;;  %v4816_v48 = vor.u32 %v6304_v36, %v4813_v39  ;;  %v6374_v26 = vld [vmem:[#allocation4 + $0x5ac] sm:$0xf]  ;;  %v5093_v27 = vld [vmem:[#allocation4 + $0x5bc] sm:$0xf0]  ;;  %v4733_v30 = vld [vmem:[#allocation4 + $0x2ec] sm:$0xf0] }
  0xf7   :  { %1875 = vmatmul.bf16.vlgmr.msrb.gmra.mxu1 %v6945_v44  ;;  %v4736_v36 = vor.u32 %v6284_v29, %v4733_v30  ;;  %v6369_v39 = vld [vmem:[#allocation4 + $0x584] sm:$0xf]  ;;  %v6227_v13 = vld [vmem:[#allocation4 + $0x110] sm:$0xf0]  ;;  %v4659_v14 = vld [vmem:[#allocation4 + $0x240] sm:$0xf] }
  0xf8   :  { %1947 = vmatpush.bf16.msra.mxu3 %v5112_v42  ;;  %v6356_v42 = vld [vmem:[#allocation4 + $0x518] sm:$0xf0]  ;;  %v4639_v29 = vld [vmem:[#allocation4 + $0x218] sm:$0xf]  ;;  %v6262_v30 = vld [vmem:[#allocation4 + $0x228] sm:$0xf0] }
  0xf9   :  { %1960 = vmatpush.bf16.msrb.mxu0 %v4476_v46  ;;  %1923 = vmatpush.bf16.msra.mxu1 %v4752_v52  ;;  %v6349_v46 = vld [vmem:[#allocation4 + $0x4e4] sm:$0xf]  ;;  %v5012_v52 = vor.u32 %v6356_v42, %v5011_v41  ;;  %v6279_v42 = vld [vmem:[#allocation4 + $0x2b4] sm:$0xf] }
  0xfa   :  { %1936 = vmatpush.bf16.msra.mxu2 %v4912_v49  ;;  %v6389_v49 = vld [vmem:[#allocation4 + $0x624] sm:$0xf]  ;;  %v4996_v56 = vor.u32 %v6349_v46, %v4993_v47  ;;  %v6239_v46 = vld [vmem:[#allocation4 + $0x174] sm:$0xf]  ;;  %v4553_v47 = vld [vmem:[#allocation4 + $0x184] sm:$0xf0] }
  0xfb   :  { %v5156_v61 = vor.u32 %v6389_v49, %v5153_v50  ;;  %v6324_v49 = vld [vmem:[#allocation4 + $0x41c] sm:$0xf]  ;;  %v4893_v50 = vld [vmem:[#allocation4 + $0x42c] sm:$0xf0] }
  0xfc   :  { %1948 = vmatpush.bf16.msra.mxu3 %v5092_v55  ;;  %v4376_v55 = vor.u32 %v6194_v43, %v4373_v45  ;;  %v4713_v43 = vld [vmem:[#allocation4 + $0x2c4] sm:$0xf0] }
  0xfd   :  { %1961 = vmatpush.bf16.msrb.mxu0 %v4456_v60  ;;  %1924 = vmatpush.bf16.msra.mxu1 %v4732_v2  ;;  %v4633_v60 = vld [vmem:[#allocation4 + $0x224] sm:$0xf0]  ;;  %v5133_v2 = vld [vmem:[#allocation4 + $0x60c] sm:$0xf0] }
  0xfe   :  { %1937 = vmatpush.bf16.msra.mxu2 %v4892_v63  ;;  %v4973_v63 = vld [vmem:[#allocation4 + $0x4cc] sm:$0xf0]  ;;  %v4636_v3 = vor.u32 %v6259_v57, %v4633_v60  ;;  %v5136_v9 = vor.u32 %v6384_v1, %v5133_v2  ;;  %v6274_v57 = vld [vmem:[#allocation4 + $0x28c] sm:$0xf]  ;;  %v4693_v60 = vld [vmem:[#allocation4 + $0x29c] sm:$0xf0] }
  0xff   :  { %v4976_v6 = vor.u32 %v6344_v62, %v4973_v63  ;;  %v4519_v62 = vld [vmem:[#allocation4 + $0x128] sm:$0xf]  ;;  %v6232_v2 = vld [vmem:[#allocation4 + $0x138] sm:$0xf0] }
 0x100   :  { %1949 = vmatpush.bf16.msra.mxu3 %v5072_v5  ;;  %v4773_v5 = vld [vmem:[#allocation4 + $0x33c] sm:$0xf0]  ;;  %v4679_v63 = vld [vmem:[#allocation4 + $0x268] sm:$0xf] }
 0x101   :  { %1962 = vmatpush.bf16.msrb.mxu0 %v4436_v8  ;;  %1925 = vmatpush.bf16.msra.mxu1 %v4712_v15  ;;  %v4613_v8 = vld [vmem:[#allocation4 + $0x1fc] sm:$0xf0]  ;;  %v4776_v12 = vor.u32 %v6294_v4, %v4773_v5  ;;  %v4873_v4 = vld [vmem:[#allocation4 + $0x404] sm:$0xf0]  ;;  %v4696_v5 = vor.u32 %v6274_v57, %v4693_v60  ;;  %v6252_v57 = vld [vmem:[#allocation4 + $0x1d8] sm:$0xf0] }
 0x102   :  { %1938 = vmatpush.bf16.msra.mxu2 %v4872_v11  ;;  %v4953_v11 = vld [vmem:[#allocation4 + $0x4a4] sm:$0xf0]  ;;  %v4616_v15 = vor.u32 %v6254_v7, %v4613_v8 }
 0x103   :  { %v4956_v18 = vor.u32 %v6339_v10, %v4953_v11  ;;  %v5033_v7 = vld [vmem:[#allocation4 + $0x544] sm:$0xf0]  ;;  %v4499_v10 = vld [vmem:[#allocation4 + $0x100] sm:$0xf]  ;;  %v4520_v11 = vor.u32 %v6232_v2, %v4519_v62  ;;  %v6212_v62 = vld [vmem:[#allocation4 + $0x98] sm:$0xf0] }
 0x104   :  { %1950 = vmatpush.bf16.msra.mxu3 %v5052_v19  ;;  %v6249_v19 = vld [vmem:[#allocation4 + $0x1c4] sm:$0xf] }
 0x105   :  { %1963 = vmatpush.bf16.msrb.mxu0 %v4416_v24  ;;  %1926 = vmatpush.bf16.msra.mxu1 %v4692_v31  ;;  %v4933_v24 = vld [vmem:[#allocation4 + $0x47c] sm:$0xf0] }
 0x106   :  { %1939 = vmatpush.bf16.msra.mxu2 %v4852_v28  ;;  %v4596_v28 = vor.u32 %v6249_v19, %v4593_v21  ;;  %v4936_v31 = vor.u32 %v6334_v23, %v4933_v24  ;;  %v6354_v19 = vld [vmem:[#allocation4 + $0x50c] sm:$0xf]  ;;  %v5013_v21 = vld [vmem:[#allocation4 + $0x51c] sm:$0xf0]  ;;  %v6312_v23 = vld [vmem:[#allocation4 + $0x3b8] sm:$0xf0] }
 0x108   :  { %1951 = vmatpush.bf16.msra.mxu3 %v5032_v34  ;;  %1927 = vmatmul.bf16.vlgmr.msra.gmra.mxu1 %v6943_v38  ;;  %v6329_v34 = vld [vmem:[#allocation4 + $0x444] sm:$0xf] }
 0x109   :  { %1971 = vmatpush.bf16.msrb.mxu1 %v4676_v37  ;;  %1964 = vmatpush.bf16.msrb.mxu0 %v4396_v40  ;;  %v5096_v37 = vor.u32 %v6374_v26, %v5093_v27  ;;  %v5073_v40 = vld [vmem:[#allocation4 + $0x594] sm:$0xf0]  ;;  %v4916_v45 = vor.u32 %v6329_v34, %v4913_v35  ;;  %v6352_v26 = vld [vmem:[#allocation4 + $0x4f8] sm:$0xf0]  ;;  %v4500_v27 = vor.u32 %v6227_v13, %v4499_v10  ;;  %v4819_v35 = vld [vmem:[#allocation4 + $0x380] sm:$0xf] }
 0x10a   :  { %1984 = vmatpush.bf16.msrb.mxu2 %v4836_v32  ;;  %v6244_v32 = vld [vmem:[#allocation4 + $0x19c] sm:$0xf]  ;;  %v6207_v10 = vld [vmem:[#allocation4 + $0x70] sm:$0xf0] }
 0x10b   :  { %1940 = vmatmul.bf16.vlgmr.msra.gmra.mxu2 %v6945_v44  ;;  %v4576_v41 = vor.u32 %v6244_v32, %v4573_v33  ;;  %v4479_v33 = vld [vmem:[#allocation4 + $0xd8] sm:$0xf]  ;;  %v6292_v13 = vld [vmem:[#allocation4 + $0x318] sm:$0xf0] }
 0x10c   :  { %1952 = vmatpush.bf16.msra.mxu3 %v5012_v52  ;;  %v6364_v52 = vld [vmem:[#allocation4 + $0x55c] sm:$0xf] }
 0x10d   :  { %1972 = vmatpush.bf16.msrb.mxu1 %v4656_v51  ;;  %1965 = vmatpush.bf16.msrb.mxu0 %v4376_v55  ;;  %v4716_v51 = vor.u32 %v6279_v42, %v4713_v43  ;;  %v4556_v55 = vor.u32 %v6239_v46, %v4553_v47  ;;  %v5056_v1 = vor.u32 %v6364_v52, %v5053_v53  ;;  %v4619_v43 = vld [vmem:[#allocation4 + $0x1f0] sm:$0xf]  ;;  %v4959_v53 = vld [vmem:[#allocation4 + $0x498] sm:$0xf] }
 0x10e   :  { %1985 = vmatpush.bf16.msrb.mxu2 %v4816_v48  ;;  %v5076_v48 = vor.u32 %v6369_v39, %v5073_v40  ;;  %v4640_v39 = vor.u32 %v6262_v30, %v4639_v29  ;;  %v4979_v40 = vld [vmem:[#allocation4 + $0x4c0] sm:$0xf]  ;;  %v4459_v47 = vld [vmem:[#allocation4 + $0xb0] sm:$0xf]  ;;  %v6327_v29 = vld [vmem:[#allocation4 + $0x430] sm:$0xf0] }
 0x10f   :  { %1953 = vmatmul.bf16.vlgmr.msra.gmra.mxu3 %v6953_v59  ;;  %v4379_v30 = vld [vmem:[#allocation4 + $0x10] sm:$0xf] }
 0x110   :  { %1997 = vmatpush.bf16.msrb.mxu3 %v4996_v56  ;;  %1966 = vmatmul.bf16.vlgmr.msrb.gmra.mxu0 %v6937_v16  ;;  %v4533_v56 = vld [vmem:[#allocation4 + $0x15c] sm:$0xf0] }
 0x111   :  { %2010 = vmatpush.bf16.msra.mxu0 %v5156_v61  ;;  %1973 = vmatpush.bf16.msrb.mxu1 %v4636_v3  ;;  %v4896_v61 = vor.u32 %v6324_v49, %v4893_v50  ;;  %v6319_v3 = vld [vmem:[#allocation4 + $0x3f4] sm:$0xf]  ;;  %v4536_v8 = vor.u32 %v6234_v54, %v4533_v56  ;;  %v4799_v50 = vld [vmem:[#allocation4 + $0x358] sm:$0xf]  ;;  %v6342_v54 = vld [vmem:[#allocation4 + $0x4a8] sm:$0xf0] }
 0x112   :  { %1986 = vmatpush.bf16.msrb.mxu2 %v4796_v0  ;;  %v6272_v0 = vld [vmem:[#allocation4 + $0x278] sm:$0xf0]  ;;  %v4599_v56 = vld [vmem:[#allocation4 + $0x1c8] sm:$0xf] }
 0x113   :  { %v4600_v2 = vor.u32 %v6252_v57, %v4599_v56  ;;  %v4699_v57 = vld [vmem:[#allocation4 + $0x290] sm:$0xf] }
 0x114   :  { %1998 = vmatpush.bf16.msrb.mxu3 %v4976_v6  ;;  %v6359_v6 = vld [vmem:[#allocation4 + $0x534] sm:$0xf] }
 0x115   :  { %2011 = vmatpush.bf16.msra.mxu0 %v5136_v9  ;;  %1974 = vmatpush.bf16.msrb.mxu1 %v4616_v15  ;;  %v4680_v9 = vor.u32 %v6272_v0, %v4679_v63  ;;  %v6267_v15 = vld [vmem:[#allocation4 + $0x250] sm:$0xf0]  ;;  %v5036_v17 = vor.u32 %v6359_v6, %v5033_v7  ;;  %v4960_v63 = vor.u32 %v6342_v54, %v4959_v53  ;;  %v4779_v0 = vld [vmem:[#allocation4 + $0x330] sm:$0xf]  ;;  %v4579_v6 = vld [vmem:[#allocation4 + $0x1a0] sm:$0xf] }
 0x116   :  { %1987 = vmatpush.bf16.msrb.mxu2 %v4776_v12  ;;  %v4876_v12 = vor.u32 %v6319_v3, %v4873_v4  ;;  %v4660_v24 = vor.u32 %v6267_v15, %v4659_v14  ;;  %v4939_v3 = vld [vmem:[#allocation4 + $0x470] sm:$0xf]  ;;  %v6337_v4 = vld [vmem:[#allocation4 + $0x480] sm:$0xf0]  ;;  %v6247_v7 = vld [vmem:[#allocation4 + $0x1b0] sm:$0xf0] }
 0x117   :  { %v4580_v14 = vor.u32 %v6247_v7, %v4579_v6  ;;  %v4919_v15 = vld [vmem:[#allocation4 + $0x448] sm:$0xf]  ;;  %v6387_v53 = vld [vmem:[#allocation4 + $0x610] sm:$0xf0]  ;;  %v5283_v54 = vld [vmem:[#allocation6 + $0xf0] sm:$0xf] }
 0x118   :  { %1999 = vmatpush.bf16.msrb.mxu3 %v4956_v18  ;;  %v4853_v18 = vld [vmem:[#allocation4 + $0x3dc] sm:$0xf0]  ;;  %v6420_v6 = vld [vmem:[#allocation6 + $0xd8] sm:$0xf0]  ;;  %v6510_v7 = vld [vmem:[#allocation6 + $0x3a8] sm:$0xf0] }
 0x119   :  { %2012 = vmatpush.bf16.msra.mxu0 %v5116_v22  ;;  %1975 = vmatpush.bf16.msrb.mxu1 %v4596_v28  ;;  %v4839_v22 = vld [vmem:[#allocation4 + $0x3a8] sm:$0xf]  ;;  %v4856_v28 = vor.u32 %v6314_v58, %v4853_v18  ;;  %v4559_v18 = vld [vmem:[#allocation4 + $0x178] sm:$0xf] }
 0x11a   :  { %1988 = vmatpush.bf16.msrb.mxu2 %v4756_v25  ;;  %v4999_v25 = vld [vmem:[#allocation4 + $0x4e8] sm:$0xf]  ;;  %v4840_v32 = vor.u32 %v6312_v23, %v4839_v22  ;;  %v4399_v22 = vld [vmem:[#allocation4 + $0x38] sm:$0xf]  ;;  %v6202_v23 = vld [vmem:[#allocation4 + $0x48] sm:$0xf0] }
 0x11b   :  { %v5000_v34 = vor.u32 %v6352_v26, %v4999_v25  ;;  %v4739_v25 = vld [vmem:[#allocation4 + $0x2e0] sm:$0xf]  ;;  %v6287_v26 = vld [vmem:[#allocation4 + $0x2f0] sm:$0xf0] }
 0x11c   :  { %2000 = vmatpush.bf16.msrb.mxu3 %v4936_v31  ;;  %v5016_v31 = vor.u32 %v6354_v19, %v5013_v21  ;;  %v6242_v19 = vld [vmem:[#allocation4 + $0x188] sm:$0xf0] }
 0x11d   :  { %2013 = vmatpush.bf16.msra.mxu0 %v5096_v37  ;;  %1976 = vmatpush.bf16.msrb.mxu1 %v4576_v41  ;;  %v6222_v37 = vld [vmem:[#allocation4 + $0xe8] sm:$0xf0]  ;;  %v6347_v41 = vld [vmem:[#allocation4 + $0x4d0] sm:$0xf0] }
 0x11e   :  { %1989 = vmatpush.bf16.msrb.mxu2 %v4736_v36  ;;  %v6307_v36 = vld [vmem:[#allocation4 + $0x390] sm:$0xf0]  ;;  %v4480_v42 = vor.u32 %v6222_v37, %v4479_v33  ;;  %v4980_v49 = vor.u32 %v6347_v41, %v4979_v40  ;;  %v4539_v33 = vld [vmem:[#allocation4 + $0x150] sm:$0xf]  ;;  %v6237_v37 = vld [vmem:[#allocation4 + $0x160] sm:$0xf0] }
 0x11f   :  { %v4820_v46 = vor.u32 %v6307_v36, %v4819_v35  ;;  %v5159_v35 = vld [vmem:[#allocation4 + $0x628] sm:$0xf]  ;;  %v5303_v36 = vld [vmem:[#allocation6 + $0x118] sm:$0xf]  ;;  %v6392_v41 = vld [vmem:[#allocation4 + $0x638] sm:$0xf0] }
 0x120   :  { %2001 = vmatpush.bf16.msrb.mxu3 %v4916_v45  ;;  %v6257_v45 = vld [vmem:[#allocation4 + $0x200] sm:$0xf0] }
 0x121   :  { %2014 = vmatpush.bf16.msra.mxu0 %v5076_v48  ;;  %1977 = vmatpush.bf16.msrb.mxu1 %v4556_v55  ;;  %v6217_v48 = vld [vmem:[#allocation4 + $0xc0] sm:$0xf0]  ;;  %v4620_v52 = vor.u32 %v6257_v45, %v4619_v43  ;;  %v6282_v43 = vld [vmem:[#allocation4 + $0x2c8] sm:$0xf0]  ;;  %v4540_v45 = vor.u32 %v6237_v37, %v4539_v33  ;;  %v6372_v33 = vld [vmem:[#allocation4 + $0x598] sm:$0xf0] }
 0x122   :  { %1990 = vmatpush.bf16.msrb.mxu2 %v4716_v51  ;;  %v6302_v51 = vld [vmem:[#allocation4 + $0x368] sm:$0xf0]  ;;  %v4460_v55 = vor.u32 %v6217_v48, %v4459_v47 }
 0x123   :  { %v4800_v60 = vor.u32 %v6302_v51, %v4799_v50  ;;  %v6322_v47 = vld [vmem:[#allocation4 + $0x408] sm:$0xf0]  ;;  %v5160_v51 = vor.u32 %v6392_v41, %v5159_v35  ;;  %v5403_v35 = vld [vmem:[#allocation6 + $0x1e0] sm:$0xf]  ;;  %v5203_v41 = vld [vmem:[#allocation6 + $0x50] sm:$0xf] }
 0x124   :  { %2002 = vmatpush.bf16.msrb.mxu3 %v4896_v61  ;;  %v4439_v61 = vld [vmem:[#allocation4 + $0x88] sm:$0xf] }
 0x125   :  { %2015 = vmatpush.bf16.msra.mxu0 %v5056_v1  ;;  %1978 = vmatpush.bf16.msrb.mxu1 %v4536_v8  ;;  %v6297_v1 = vld [vmem:[#allocation4 + $0x340] sm:$0xf0] }
 0x126   :  { %1991 = vmatpush.bf16.msrb.mxu2 %v4696_v5  ;;  %v4440_v5 = vor.u32 %v6212_v62, %v4439_v61  ;;  %v4780_v8 = vor.u32 %v6297_v1, %v4779_v0  ;;  %v4859_v61 = vld [vmem:[#allocation4 + $0x3d0] sm:$0xf]  ;;  %v6317_v62 = vld [vmem:[#allocation4 + $0x3e0] sm:$0xf0]  ;;  %v6470_v0 = vld [vmem:[#allocation6 + $0x268] sm:$0xf0] }
 0x128   :  { %2003 = vmatpush.bf16.msrb.mxu3 %v4876_v12  ;;  %1979 = vmatmul.bf16.vlgmr.msrb.gmra.mxu1 %v6939_v20  ;;  %v4759_v12 = vld [vmem:[#allocation4 + $0x308] sm:$0xf] }
 0x129   :  { %2023 = vmatpush.bf16.msra.mxu1 %v4520_v11  ;;  %2016 = vmatpush.bf16.msra.mxu0 %v5036_v17  ;;  %v4940_v11 = vor.u32 %v6337_v4, %v4939_v3  ;;  %v6332_v17 = vld [vmem:[#allocation4 + $0x458] sm:$0xf0]  ;;  %v4760_v21 = vor.u32 %v6292_v13, %v4759_v12  ;;  %v5443_v12 = vld [vmem:[#allocation6 + $0x230] sm:$0xf]  ;;  %v6465_v13 = vld [vmem:[#allocation6 + $0x240] sm:$0xf0] }
 0x12a   :  { %2036 = vmatpush.bf16.msra.mxu2 %v4680_v9  ;;  %v4419_v9 = vld [vmem:[#allocation4 + $0x60] sm:$0xf] }
 0x12b   :  { %1992 = vmatmul.bf16.vlgmr.msrb.gmra.mxu2 %v6943_v38  ;;  %v4420_v58 = vor.u32 %v6207_v10, %v4419_v9  ;;  %v5119_v9 = vld [vmem:[#allocation4 + $0x5d8] sm:$0xf]  ;;  %v6382_v10 = vld [vmem:[#allocation4 + $0x5e8] sm:$0xf0] }
 0x12c   :  { %2004 = vmatpush.bf16.msrb.mxu3 %v4856_v28  ;;  %v4899_v28 = vld [vmem:[#allocation4 + $0x420] sm:$0xf] }
 0x12d   :  { %2024 = vmatpush.bf16.msra.mxu1 %v4500_v27  ;;  %2017 = vmatpush.bf16.msra.mxu0 %v5016_v31  ;;  %v4560_v27 = vor.u32 %v6242_v19, %v4559_v18  ;;  %v4400_v31 = vor.u32 %v6202_v23, %v4399_v22  ;;  %v4900_v40 = vor.u32 %v6327_v29, %v4899_v28  ;;  %v6415_v18 = vld [vmem:[#allocation6 + $0xb0] sm:$0xf0]  ;;  %v5603_v19 = vld [vmem:[#allocation6 + $0x370] sm:$0xf]  ;;  %v6505_v23 = vld [vmem:[#allocation6 + $0x380] sm:$0xf0] }
 0x12e   :  { %2037 = vmatpush.bf16.msra.mxu2 %v4660_v24  ;;  %v4920_v24 = vor.u32 %v6332_v17, %v4919_v15  ;;  %v5120_v17 = vor.u32 %v6382_v10, %v5119_v9  ;;  %v5444_v22 = vor.u32 %v6465_v13, %v5443_v12  ;;  %v5223_v29 = vld [vmem:[#allocation6 + $0x78] sm:$0xf]  ;;  %v5523_v9 = vld [vmem:[#allocation6 + $0x2d0] sm:$0xf]  ;;  %v6485_v10 = vld [vmem:[#allocation6 + $0x2e0] sm:$0xf0] }
 0x12f   :  { %2005 = vmatmul.bf16.vlgmr.msrb.gmra.mxu3 %v6945_v44  ;;  %v5019_v13 = vld [vmem:[#allocation4 + $0x510] sm:$0xf] }
 0x130   :  { %2049 = vmatpush.bf16.msra.mxu3 %v4840_v32  ;;  %2018 = vmatmul.bf16.vlgmr.msra.gmra.mxu0 %v6953_v59  ;;  %v6197_v32 = vld [vmem:[#allocation4 + $0x20] sm:$0xf0] }
 0x131   :  { %2062 = vmatpush.bf16.msrb.mxu0 %v5000_v34  ;;  %2025 = vmatpush.bf16.msra.mxu1 %v4480_v42  ;;  %v4740_v34 = vor.u32 %v6287_v26, %v4739_v25  ;;  %v4719_v42 = vld [vmem:[#allocation4 + $0x2b8] sm:$0xf]  ;;  %v4380_v48 = vor.u32 %v6197_v32, %v4379_v30  ;;  %v6460_v25 = vld [vmem:[#allocation6 + $0x218] sm:$0xf0]  ;;  %v5604_v26 = vor.u32 %v6505_v23, %v5603_v19  ;;  %v6410_v30 = vld [vmem:[#allocation6 + $0x88] sm:$0xf0] }
 0x132   :  { %2038 = vmatpush.bf16.msra.mxu2 %v4640_v39  ;;  %v6430_v39 = vld [vmem:[#allocation6 + $0x128] sm:$0xf0]  ;;  %v5079_v32 = vld [vmem:[#allocation4 + $0x588] sm:$0xf]  ;;  %v5524_v19 = vor.u32 %v6485_v10, %v5523_v9  ;;  %v6540_v9 = vld [vmem:[#allocation6 + $0x498] sm:$0xf0] }
 0x133   :  { %v5304_v50 = vor.u32 %v6430_v39, %v5303_v36  ;;  %v6455_v36 = vld [vmem:[#allocation6 + $0x1f0] sm:$0xf0]  ;;  %v5503_v23 = vld [vmem:[#allocation6 + $0x2a8] sm:$0xf] }
 0x134   :  { %2050 = vmatpush.bf16.msra.mxu3 %v4820_v46  ;;  %v4879_v46 = vld [vmem:[#allocation4 + $0x3f8] sm:$0xf] }
 0x135   :  { %2063 = vmatpush.bf16.msrb.mxu0 %v4980_v49  ;;  %2026 = vmatpush.bf16.msra.mxu1 %v4460_v55  ;;  %v5139_v49 = vld [vmem:[#allocation4 + $0x600] sm:$0xf]  ;;  %v6425_v55 = vld [vmem:[#allocation6 + $0x100] sm:$0xf0]  ;;  %v4880_v56 = vor.u32 %v6322_v47, %v4879_v46  ;;  %v6367_v46 = vld [vmem:[#allocation4 + $0x570] sm:$0xf0]  ;;  %v5404_v47 = vor.u32 %v6455_v36, %v5403_v35 }
 0x136   :  { %2039 = vmatpush.bf16.msra.mxu2 %v4620_v52  ;;  %v4720_v52 = vor.u32 %v6282_v43, %v4719_v42  ;;  %v5284_v1 = vor.u32 %v6425_v55, %v5283_v54  ;;  %v5140_v3 = vor.u32 %v6387_v53, %v5139_v49  ;;  %v5563_v42 = vld [vmem:[#allocation6 + $0x320] sm:$0xf]  ;;  %v5183_v55 = vld [vmem:[#allocation6 + $0x28] sm:$0xf]  ;;  %v6468_v36 = vld [vmem:[#allocation6 + $0x25c] sm:$0xf] }
 0x138   :  { %2051 = vmatpush.bf16.msra.mxu3 %v4800_v60  ;;  %v6277_v60 = vld [vmem:[#allocation4 + $0x2a0] sm:$0xf0] }
 0x139   :  { %2064 = vmatpush.bf16.msrb.mxu0 %v4960_v63  ;;  %2027 = vmatpush.bf16.msra.mxu1 %v4440_v5  ;;  %v5463_v63 = vld [vmem:[#allocation6 + $0x258] sm:$0xf]  ;;  %v4700_v4 = vor.u32 %v6277_v60, %v4699_v57  ;;  %v5263_v5 = vld [vmem:[#allocation6 + $0xc8] sm:$0xf]  ;;  %v6400_v57 = vld [vmem:[#allocation6 + $0x38] sm:$0xf0] }
 0x13a   :  { %2040 = vmatpush.bf16.msra.mxu2 %v4600_v2  ;;  %v5623_v2 = vld [vmem:[#allocation6 + $0x398] sm:$0xf]  ;;  %v5264_v15 = vor.u32 %v6420_v6, %v5263_v5  ;;  %v5184_v5 = vor.u32 %v6400_v57, %v5183_v55  ;;  %v5163_v6 = vld [vmem:[#allocation6] sm:$0xf]  ;;  %v5763_v57 = vld [vmem:[#allocation6 + $0x4b0] sm:$0xf] }
 0x13b   :  { %v5543_v60 = vld [vmem:[#allocation6 + $0x2f8] sm:$0xf]  ;;  %v5265_v55 = vld [vmem:[#allocation6 + $0xdc] sm:$0xf0] }
 0x13c   :  { %2052 = vmatpush.bf16.msra.mxu3 %v4780_v8  ;;  %v4860_v8 = vor.u32 %v6317_v62, %v4859_v61  ;;  %v6490_v61 = vld [vmem:[#allocation6 + $0x308] sm:$0xf0]  ;;  %v5039_v62 = vld [vmem:[#allocation4 + $0x538] sm:$0xf] }
 0x13d   :  { %2065 = vmatpush.bf16.msrb.mxu0 %v4940_v11  ;;  %2028 = vmatpush.bf16.msra.mxu1 %v4420_v58  ;;  %v5464_v11 = vor.u32 %v6470_v0, %v5463_v63  ;;  %v5243_v58 = vld [vmem:[#allocation6 + $0xa0] sm:$0xf]  ;;  %v6362_v63 = vld [vmem:[#allocation4 + $0x548] sm:$0xf0] }
 0x13e   :  { %2041 = vmatpush.bf16.msra.mxu2 %v4580_v14  ;;  %v5624_v14 = vor.u32 %v6510_v7, %v5623_v2  ;;  %v6445_v2 = vld [vmem:[#allocation6 + $0x1a0] sm:$0xf0]  ;;  %v5040_v7 = vor.u32 %v6362_v63, %v5039_v62 }
 0x140   :  { %2053 = vmatpush.bf16.msra.mxu3 %v4760_v21  ;;  %v5099_v21 = vld [vmem:[#allocation4 + $0x5b0] sm:$0xf] }
 0x141   :  { %2066 = vmatpush.bf16.msrb.mxu0 %v4920_v24  ;;  %2029 = vmatpush.bf16.msra.mxu1 %v4400_v31  ;;  %v5583_v31 = vld [vmem:[#allocation6 + $0x348] sm:$0xf] }
 0x142   :  { %2042 = vmatpush.bf16.msra.mxu2 %v4560_v27  ;;  %v5244_v27 = vor.u32 %v6415_v18, %v5243_v58  ;;  %v5343_v58 = vld [vmem:[#allocation6 + $0x168] sm:$0xf]  ;;  %v6440_v18 = vld [vmem:[#allocation6 + $0x178] sm:$0xf0] }
 0x144   :  { %2054 = vmatpush.bf16.msra.mxu3 %v4740_v34  ;;  %v6970_v24 = vpop.f32.mrf.mxu1  ;;  %v6500_v34 = vld [vmem:[#allocation6 + $0x358] sm:$0xf0] }
 0x145   :  { %2067 = vmatpush.bf16.msrb.mxu0 %v4900_v40  ;;  %2030 = vmatpush.bf16.msra.mxu1 %v4380_v48  ;;  %v5584_v39 = vor.u32 %v6500_v34, %v5583_v31  ;;  %v5080_v40 = vor.u32 %v6372_v33, %v5079_v32  ;;  %v6495_v48 = vld [vmem:[#allocation6 + $0x330] sm:$0xf0]  ;;  %v5305_v31 = vld [vmem:[#allocation6 + $0x12c] sm:$0xf0]  ;;  %v5483_v33 = vld [vmem:[#allocation6 + $0x280] sm:$0xf] }
 0x146   :  { %2043 = vmatpush.bf16.msra.mxu2 %v4540_v45  ;;  %v5059_v45 = vld [vmem:[#allocation4 + $0x560] sm:$0xf]  ;;  %v5564_v53 = vor.u32 %v6495_v48, %v5563_v42 }
 0x148   :  { %2055 = vmatpush.bf16.msra.mxu3 %v4720_v52  ;;  %2031 = vmatmul.bf16.vlgmr.msra.gmra.mxu1 %v6937_v16  ;;  %v5423_v16 = vld [vmem:[#allocation6 + $0x208] sm:$0xf]  ;;  %v6450_v52 = vld [vmem:[#allocation6 + $0x1c8] sm:$0xf0] }
 0x149   :  { %2075 = vmatpush.bf16.msrb.mxu1 %v5160_v51  ;;  %2068 = vmatpush.bf16.msrb.mxu0 %v4880_v56  ;;  %v5424_v37 = vor.u32 %v6460_v25, %v5423_v16  ;;  %v5383_v51 = vld [vmem:[#allocation6 + $0x1b8] sm:$0xf]  ;;  %v5060_v56 = vor.u32 %v6367_v46, %v5059_v45  ;;  %v6480_v16 = vld [vmem:[#allocation6 + $0x2b8] sm:$0xf0]  ;;  %v5344_v25 = vor.u32 %v6440_v18, %v5343_v58  ;;  %v5225_v58 = vld [vmem:[#allocation6 + $0x8c] sm:$0xf0] }
 0x14a   :  { %3390 = vmatpush.bf16.msrb.mxu2 %v5304_v50  ;;  %v5384_v0 = vor.u32 %v6450_v52, %v5383_v51  ;;  %v5783_v46 = vld [vmem:[#allocation6 + $0x4d8] sm:$0xf]  ;;  %v6463_v51 = vld [vmem:[#allocation6 + $0x234] sm:$0xf]  ;;  %v5445_v52 = vld [vmem:[#allocation6 + $0x244] sm:$0xf0] }
 0x14b   :  { %2044 = vmatmul.bf16.vlgmr.msra.gmra.mxu2 %v6939_v20  ;;  %v6377_v20 = vld [vmem:[#allocation4 + $0x5c0] sm:$0xf0]  ;;  %v6974_v43 = vpop.f32.mrf.mxu2 }
 0x14c   :  { %2056 = vmatpush.bf16.msra.mxu3 %v4700_v4  ;;  %v5100_v28 = vor.u32 %v6377_v20, %v5099_v21  ;;  %v1774_v50 = vpop.f32.mrf.mxu1 }
 0x14d   :  { %2076 = vmatpush.bf16.msrb.mxu1 %v5140_v3  ;;  %2069 = vmatpush.bf16.msrb.mxu0 %v4860_v8  ;;  %v6976_v49 = vpop.f32.mrf.mxu0  ;;  %v5544_v3 = vor.u32 %v6490_v61, %v5543_v60  ;;  %v6395_v8 = vld [vmem:[#allocation6 + $0x10] sm:$0xf0] }
 0x14e   :  { %3391 = vmatpush.bf16.msrb.mxu2 %v5284_v1  ;;  %v5363_v1 = vld [vmem:[#allocation6 + $0x190] sm:$0xf]  ;;  %v5164_v21 = vor.u32 %v6395_v8, %v5163_v6  ;;  %v6413_v6 = vld [vmem:[#allocation6 + $0xa4] sm:$0xf] }
 0x14f   :  { %2057 = vmatmul.bf16.vlgmr.msra.gmra.mxu3 %v6943_v38  ;;  %v5224_v38 = vor.u32 %v6410_v30, %v5223_v29  ;;  %v6428_v30 = vld [vmem:[#allocation6 + $0x11c] sm:$0xf] }
 0x150   :  { %3403 = vmatpush.bf16.msrb.mxu3 %v5464_v11  ;;  %2070 = vmatmul.bf16.vlgmr.msrb.gmra.mxu0 %v6945_v44  ;;  %v6405_v44 = vld [vmem:[#allocation6 + $0x60] sm:$0xf0] }
 0x151   :  { %3416 = vmatpush.bf16.msra.mxu0 %v5624_v14  ;;  %2077 = vmatpush.bf16.msrb.mxu1 %v5120_v17  ;;  %v5204_v54 = vor.u32 %v6405_v44, %v5203_v41  ;;  %v6981_v11 = vld [vmem:[%s7089_s4] sm:$0x1f]  ;;  %v5308_v41 = vor.u32 %v6428_v30, %v5305_v31  ;;  %v6423_v44 = vld [vmem:[#allocation6 + $0xf4] sm:$0xf] }
 0x152   :  { %3392 = vmatpush.bf16.msrb.mxu2 %v5264_v15  ;;  %v1798_v4 = vpop.f32.mrf.mxu3  ;;  %v6357_v14 = vld [vmem:[#allocation4 + $0x520] sm:$0xf0]  ;;  %v5364_v15 = vor.u32 %v6445_v2, %v5363_v1  ;;  %v713_v20 = vperm.slane %v6981_v11, 0  ;;  %v5425_v1 = vld [vmem:[#allocation6 + $0x21c] sm:$0xf0] }
 0x153   :  { %v1787_v12 = vpop.f32.mrf.mxu2  ;;  %v6403_v30 = vld [vmem:[#allocation6 + $0x54] sm:$0xf] }
 0x154   :  { %3404 = vmatpush.bf16.msrb.mxu3 %v5444_v22  ;;  %v5020_v22 = vor.u32 %v6357_v14, %v5019_v13  ;;  %v1773_v32 = vadd.f32 %v6970_v24, %v713_v20  ;;  %v5285_v24 = vld [vmem:[#allocation6 + $0x104] sm:$0xf0]  ;;  %v6453_v12 = vld [vmem:[#allocation6 + $0x1e4] sm:$0xf]  ;;  %v714_v13 = vperm.slane %v6981_v11, 1 }
 0x155   :  { %3417 = vmatpush.bf16.msra.mxu0 %v5604_v26  ;;  %2078 = vmatpush.bf16.msrb.mxu1 %v5100_v28  ;;  %v1813_v17 = vpop.f32.mrf.mxu0  ;;  %v5323_v26 = vld [vmem:[#allocation6 + $0x140] sm:$0xf]  ;;  %v5504_v28 = vor.u32 %v6480_v16, %v5503_v23  ;;  %v6448_v16 = vld [vmem:[#allocation6 + $0x1bc] sm:$0xf] }
 0x156   :  { %3393 = vmatpush.bf16.msrb.mxu2 %v5244_v27  ;;  %v6435_v27 = vld [vmem:[#allocation6 + $0x150] sm:$0xf0] }
 0x157   :  { %v5324_v35 = vor.u32 %v6435_v27, %v5323_v26 }
 0x158   :  { %3405 = vmatpush.bf16.msrb.mxu3 %v5424_v37  ;;  %v6475_v37 = vld [vmem:[#allocation6 + $0x290] sm:$0xf0] }
 0x159   :  { %3418 = vmatpush.bf16.msra.mxu0 %v5584_v39  ;;  %2079 = vmatpush.bf16.msrb.mxu1 %v5080_v40  ;;  %v5465_v39 = vld [vmem:[#allocation6 + $0x26c] sm:$0xf0]  ;;  %v5484_v42 = vor.u32 %v6475_v37, %v5483_v33  ;;  %v5703_v37 = vld [vmem:[#allocation6 + $0x438] sm:$0xf] }
 0x15a   :  { %3394 = vmatpush.bf16.msrb.mxu2 %v5224_v38  ;;  %v1800_v29 = vpop.f32.mrf.mxu3  ;;  %v1786_v38 = vadd.f32 %v6974_v43, %v1773_v32  ;;  %v5468_v45 = vor.u32 %v6468_v36, %v5465_v39  ;;  %v6418_v43 = vld [vmem:[#allocation6 + $0xcc] sm:$0xf]  ;;  %v5205_v32 = vld [vmem:[#allocation6 + $0x64] sm:$0xf0] }
 0x15b   :  { %v6985_v34 = vpop.f32.mrf.mxu2 }
 0x15c   :  { %3406 = vmatpush.bf16.msrb.mxu3 %v5404_v47  ;;  %v6550_v47 = vld [vmem:[#allocation6 + $0x4e8] sm:$0xf0]  ;;  %v1799_v48 = vadd.f32 %v1798_v4, %v1786_v38  ;;  %v5268_v4 = vor.u32 %v6418_v43, %v5265_v55  ;;  %v1838_v27 = vadd.f32 %v6985_v34, %v714_v13  ;;  %v6443_v38 = vld [vmem:[#allocation6 + $0x194] sm:$0xf]  ;;  %v5208_v34 = vor.u32 %v6403_v30, %v5205_v32  ;;  %v5345_v43 = vld [vmem:[#allocation6 + $0x17c] sm:$0xf0] }
 0x15d   :  { %3419 = vmatpush.bf16.msra.mxu0 %v5564_v53  ;;  %2080 = vmatpush.bf16.msrb.mxu1 %v5060_v56  ;;  %v6988_v40 = vpop.f32.mrf.mxu0  ;;  %v5784_v50 = vor.u32 %v6550_v47, %v5783_v46  ;;  %v5288_v53 = vor.u32 %v6423_v44, %v5285_v24  ;;  %v5448_v56 = vor.u32 %v6463_v51, %v5445_v52  ;;  %v6398_v44 = vld [vmem:[#allocation6 + $0x2c] sm:$0xf]  ;;  %v5185_v24 = vld [vmem:[#allocation6 + $0x3c] sm:$0xf0]  ;;  %v5683_v46 = vld [vmem:[#allocation6 + $0x410] sm:$0xf] }
 0x15e   :  { %3395 = vmatpush.bf16.msrb.mxu2 %v5204_v54  ;;  %v1812_v60 = vadd.f32 %v6976_v49, %v1799_v48  ;;  %v5405_v49 = vld [vmem:[#allocation6 + $0x1f4] sm:$0xf0]  ;;  %v6525_v47 = vld [vmem:[#allocation6 + $0x420] sm:$0xf0]  ;;  %v6503_v13 = vld [vmem:[#allocation6 + $0x374] sm:$0xf] }
 0x15f   :  { %v5408_v18 = vor.u32 %v6453_v12, %v5405_v49  ;;  %v5943_v30 = vld [vmem:[#allocation6 + $0x618] sm:$0xf]  ;;  %v6590_v32 = vld [vmem:[#allocation6 + $0x628] sm:$0xf0] }
 0x160   :  { %3407 = vmatpush.bf16.msrb.mxu3 %v5384_v0  ;;  %v6458_v0 = vld [vmem:[#allocation6 + $0x20c] sm:$0xf] }
 0x161   :  { %3420 = vmatpush.bf16.msra.mxu0 %v5544_v3  ;;  %2081 = vmatpush.bf16.msrb.mxu1 %v5040_v7  ;;  %v5245_v7 = vld [vmem:[#allocation6 + $0xb4] sm:$0xf0]  ;;  %v5428_v8 = vor.u32 %v6458_v0, %v5425_v1  ;;  %v6433_v1 = vld [vmem:[#allocation6 + $0x144] sm:$0xf] }
 0x162   :  { %3396 = vmatpush.bf16.msrb.mxu2 %v5184_v5  ;;  %v1850_v54 = vpop.f32.mrf.mxu3  ;;  %v5743_v5 = vld [vmem:[#allocation6 + $0x488] sm:$0xf]  ;;  %v5248_v14 = vor.u32 %v6413_v6, %v5245_v7  ;;  %v6515_v6 = vld [vmem:[#allocation6 + $0x3d0] sm:$0xf0] }
 0x163   :  { %v1839_v63 = vpop.f32.mrf.mxu2  ;;  %v5744_v10 = vor.u32 %v6540_v9, %v5743_v5  ;;  %v1851_v36 = vadd.f32 %v1850_v54, %v1838_v27  ;;  %v5643_v5 = vld [vmem:[#allocation6 + $0x3c0] sm:$0xf]  ;;  %v5625_v9 = vld [vmem:[#allocation6 + $0x3ac] sm:$0xf0] }
 0x164   :  { %3408 = vmatpush.bf16.msrb.mxu3 %v5364_v15  ;;  %v1824_v62 = vpop.f32.mrf.mxu1  ;;  %v6408_v15 = vld [vmem:[#allocation6 + $0x7c] sm:$0xf]  ;;  %v5644_v7 = vor.u32 %v6515_v6, %v5643_v5  ;;  %v6573_v5 = vld [vmem:[#allocation6 + $0x5a4] sm:$0xf] }
 0x165   :  { %3421 = vmatpush.bf16.msra.mxu0 %v5524_v19  ;;  %2082 = vmatpush.bf16.msrb.mxu1 %v5020_v22  ;;  %v1825_v2 = vadd.f32 %v1824_v62, %v1812_v60  ;;  %v1865_v3 = vpop.f32.mrf.mxu0  ;;  %v5723_v19 = vld [vmem:[#allocation6 + $0x460] sm:$0xf]  ;;  %v5228_v29 = vor.u32 %v6408_v15, %v5225_v58  ;;  %v1864_v48 = vadd.f32 %v6988_v40, %v1851_v36  ;;  %v6520_v62 = vld [vmem:[#allocation6 + $0x3f8] sm:$0xf0]  ;;  %v5325_v40 = vld [vmem:[#allocation6 + $0x154] sm:$0xf0] }
 0x166   :  { %3397 = vmatpush.bf16.msrb.mxu2 %v5164_v21  ;;  %v6535_v21 = vld [vmem:[#allocation6 + $0x470] sm:$0xf0]  ;;  %v715_v58 = vperm.slane %v6981_v11, 2  ;;  %v6488_v36 = vld [vmem:[#allocation6 + $0x2fc] sm:$0xf] }
 0x167   :  { %6662 = vtanh.f32 %v1825_v2  ;;  %v5724_v20 = vor.u32 %v6535_v21, %v5723_v19  ;;  %v5585_v19 = vld [vmem:[#allocation6 + $0x35c] sm:$0xf0] }
 0x168   :  { %3409 = vmatpush.bf16.msrb.mxu3 %v5344_v25  ;;  %2083 = vmatmul.bf16.vlgmr.msrb.gmra.mxu1 %v6953_v59  ;;  %v6545_v59 = vld [vmem:[#allocation6 + $0x4c0] sm:$0xf0]  ;;  %v5385_v25 = vld [vmem:[#allocation6 + $0x1cc] sm:$0xf0] }
 0x169   :  { %3422 = vmatpush.bf16.msra.mxu0 %v5504_v28  ;;  %3429 = vmatpush.bf16.msra.mxu1 %v5784_v50  ;;  %v5764_v61 = vor.u32 %v6545_v59, %v5763_v57  ;;  %v5388_v33 = vor.u32 %v6448_v16, %v5385_v25  ;;  %v5684_v50 = vor.u32 %v6525_v47, %v5683_v46  ;;  %v6393_v57 = vld [vmem:[#allocation6 + $0x4] sm:$0xf]  ;;  %v5165_v59 = vld [vmem:[#allocation6 + $0x14] sm:$0xf0] }
 0x16a   :  { %v1852_v17 = vpop.f32.mrf.mxu3  ;;  %v5168_v2 = vor.u32 %v6393_v57, %v5165_v59  ;;  %v5565_v16 = vld [vmem:[#allocation6 + $0x334] sm:$0xf0]  ;;  %v6580_v57 = vld [vmem:[#allocation6 + $0x5d8] sm:$0xf0]  ;;  %v6578_v59 = vld [vmem:[#allocation6 + $0x5cc] sm:$0xf] }
 0x16c   :  { %3410 = vmatpush.bf16.msrb.mxu3 %v5324_v35  ;;  %v1826_v22 = vpop.f32.mrf.mxu1  ;;  %v6530_v35 = vld [vmem:[#allocation6 + $0x448] sm:$0xf0] }
 0x16d   :  { %3423 = vmatpush.bf16.msra.mxu0 %v5484_v42  ;;  %3430 = vmatpush.bf16.msra.mxu1 %v5764_v61  ;;  %v6663_v26 = vpop.eup %6662  ;;  %v6994_v28 = vpop.f32.mrf.mxu0  ;;  %v5704_v39 = vor.u32 %v6530_v35, %v5703_v37  ;;  %v5663_v61 = vld [vmem:[#allocation6 + $0x3e8] sm:$0xf]  ;;  %v5944_v37 = vor.u32 %v6590_v32, %v5943_v30  ;;  %v5945_v35 = vld [vmem:[#allocation6 + $0x62c] sm:$0xf0]  ;;  %v6565_v32 = vld [vmem:[#allocation6 + $0x560] sm:$0xf0] }
 0x16e   :  { %v1889_v23 = vpop.f32.mrf.mxu2  ;;  %v6996_v31 = vpack.c.bf16 %v6663_v26, %v6663_v26  ;;  %v5664_v0 = vor.u32 %v6520_v62, %v5663_v61  ;;  %v5905_v61 = vld [vmem:[#allocation6 + $0x5dc] sm:$0xf0]  ;;  %v6478_v62 = vld [vmem:[#allocation6 + $0x2ac] sm:$0xf]  ;;  %v5843_v30 = vld [vmem:[#allocation6 + $0x550] sm:$0xf] }
 0x16f   :  { %3442 = vmatpush.bf16.msra.mxu2 %v5944_v37  ;;  %v5844_v37 = vor.u32 %v6565_v32, %v5843_v30  ;;  %v6541_v30 = vld [vmem:[#allocation6 + $0x4a0] sm:$0xf0]  ;;  %v5171_v32 = vld [vmem:[#allocation6 + $0x8] sm:$0xf] }
 0x170   :  { %3455 = vmatpush.bf16.msra.mxu3 %v5308_v41  ;;  %3398 = vmatmul.bf16.vlgmr.msrb.gmra.mxu2 %v6996_v31  ;;  %v5365_v41 = vld [vmem:[#allocation6 + $0x1a4] sm:$0xf0] }
 0x171   :  { %3468 = vmatpush.bf16.msrb.mxu0 %v5468_v45  ;;  %3431 = vmatpush.bf16.msra.mxu1 %v5744_v10  ;;  %v5368_v45 = vor.u32 %v6443_v38, %v5365_v41 }
 0x172   :  { %v1902_v42 = vpop.f32.mrf.mxu3 }
 0x173   :  { %v1903_v22 = vadd.f32 %v1902_v42, %v715_v58  ;;  %v6426_v58 = vld [vmem:[#allocation6 + $0x108] sm:$0xf0] }
 0x174   :  { %3456 = vmatpush.bf16.msra.mxu3 %v5288_v53  ;;  %v1876_v51 = vpop.f32.mrf.mxu1  ;;  %v6438_v53 = vld [vmem:[#allocation6 + $0x16c] sm:$0xf] }
 0x175   :  { %3469 = vmatpush.bf16.msrb.mxu0 %v5448_v56  ;;  %3432 = vmatpush.bf16.msra.mxu1 %v5724_v20  ;;  %v1877_v54 = vadd.f32 %v1876_v51, %v1864_v48  ;;  %v1917_v55 = vpop.f32.mrf.mxu0  ;;  %v5188_v56 = vor.u32 %v6398_v44, %v5185_v24  ;;  %v5348_v60 = vor.u32 %v6438_v53, %v5345_v43  ;;  %v5923_v24 = vld [vmem:[#allocation6 + $0x5f0] sm:$0xf]  ;;  %v5925_v48 = vld [vmem:[#allocation6 + $0x604] sm:$0xf0] }
 0x176   :  { %v1891_v52 = vpop.f32.mrf.mxu2  ;;  %v1916_v27 = vadd.f32 %v6994_v28, %v1903_v22  ;;  %v6583_v28 = vld [vmem:[#allocation6 + $0x5f4] sm:$0xf]  ;;  %v5525_v51 = vld [vmem:[#allocation6 + $0x2e4] sm:$0xf0] }
 0x177   :  { %v1890_v63 = vadd.f32 %v1889_v23, %v1877_v54  ;;  %v6493_v23 = vld [vmem:[#allocation6 + $0x324] sm:$0xf]  ;;  %v5928_v53 = vor.u32 %v6583_v28, %v5925_v48 }
 0x178   :  { %3457 = vmatpush.bf16.msra.mxu3 %v5268_v4  ;;  %v5328_v4 = vor.u32 %v6433_v1, %v5325_v40  ;;  %v5568_v25 = vor.u32 %v6493_v23, %v5565_v16  ;;  %v5311_v40 = vld [vmem:[#allocation6 + $0x120] sm:$0xf]  ;;  %v5865_v23 = vld [vmem:[#allocation6 + $0x58c] sm:$0xf0] }
 0x179   :  { %3470 = vmatpush.bf16.msrb.mxu0 %v5428_v8  ;;  %3433 = vmatpush.bf16.msra.mxu1 %v5704_v39  ;;  %6664 = vtanh.f32 %v1890_v63  ;;  %v6508_v8 = vld [vmem:[#allocation6 + $0x39c] sm:$0xf]  ;;  %v5545_v39 = vld [vmem:[#allocation6 + $0x30c] sm:$0xf0]  ;;  %v5505_v63 = vld [vmem:[#allocation6 + $0x2bc] sm:$0xf0] }
 0x17a   :  { %v1904_v3 = vpop.f32.mrf.mxu3  ;;  %v5628_v12 = vor.u32 %v6508_v8, %v5625_v9  ;;  %v5548_v44 = vor.u32 %v6488_v36, %v5545_v39  ;;  %v5508_v1 = vor.u32 %v6478_v62, %v5505_v63  ;;  %v5885_v8 = vld [vmem:[#allocation6 + $0x5b4] sm:$0xf0]  ;;  %v6548_v62 = vld [vmem:[#allocation6 + $0x4dc] sm:$0xf]  ;;  %v5785_v63 = vld [vmem:[#allocation6 + $0x4ec] sm:$0xf0] }
 0x17b   :  { %v5883_v3 = vld [vmem:[#allocation6 + $0x5a0] sm:$0xf] }
 0x17c   :  { %3458 = vmatpush.bf16.msra.mxu3 %v5248_v14  ;;  %v1878_v10 = vpop.f32.mrf.mxu1  ;;  %v5605_v14 = vld [vmem:[#allocation6 + $0x384] sm:$0xf0] }
 0x17d   :  { %3471 = vmatpush.bf16.msrb.mxu0 %v5408_v18  ;;  %3434 = vmatpush.bf16.msra.mxu1 %v5684_v50  ;;  %v5608_v17 = vor.u32 %v6503_v13, %v5605_v14  ;;  %v6498_v18 = vld [vmem:[#allocation6 + $0x34c] sm:$0xf]  ;;  %v6483_v50 = vld [vmem:[#allocation6 + $0x2d4] sm:$0xf]  ;;  %v5485_v13 = vld [vmem:[#allocation6 + $0x294] sm:$0xf0] }
 0x17e   :  { %v5588_v20 = vor.u32 %v6498_v18, %v5585_v19  ;;  %v5528_v43 = vor.u32 %v6483_v50, %v5525_v51  ;;  %v5863_v19 = vld [vmem:[#allocation6 + $0x578] sm:$0xf]  ;;  %v5231_v50 = vld [vmem:[#allocation6 + $0x80] sm:$0xf]  ;;  %v6411_v51 = vld [vmem:[#allocation6 + $0x90] sm:$0xf0] }
 0x17f   :  { %v6665_v49 = vpop.eup %6664 }
 0x180   :  { %3459 = vmatpush.bf16.msra.mxu3 %v5228_v29  ;;  %v7000_v15 = vpack.c.bf16 %v6665_v49, %v6665_v49  ;;  %v6473_v49 = vld [vmem:[#allocation6 + $0x284] sm:$0xf] }
 0x181   :  { %3472 = vmatpush.bf16.msrb.mxu0 %v5388_v33  ;;  %3435 = vmatpush.bf16.msra.mxu1 %v5664_v0  ;;  %v6588_v33 = vld [vmem:[#allocation6 + $0x61c] sm:$0xf]  ;;  %v5908_v0 = vor.u32 %v6578_v59, %v5905_v61  ;;  %v5488_v18 = vor.u32 %v6473_v49, %v5485_v13  ;;  %v5805_v59 = vld [vmem:[#allocation6 + $0x514] sm:$0xf0]  ;;  %v6546_v13 = vld [vmem:[#allocation6 + $0x4c8] sm:$0xf0] }
 0x182   :  { %3411 = vmatmul.bf16.vlgmr.msrb.gmra.mxu3 %v7000_v15 }
 0x184   :  { %3460 = vmatpush.bf16.msra.mxu3 %v5208_v34  ;;  %v5948_v34 = vor.u32 %v6588_v33, %v5945_v35  ;;  %v6563_v33 = vld [vmem:[#allocation6 + $0x554] sm:$0xf]  ;;  %v5845_v35 = vld [vmem:[#allocation6 + $0x564] sm:$0xf0] }
 0x185   :  { %3473 = vmatpush.bf16.msrb.mxu0 %v5368_v45  ;;  %3436 = vmatpush.bf16.msra.mxu1 %v5644_v7  ;;  %v1928_v21 = vpop.f32.mrf.mxu1  ;;  %v6585_v45 = vld [vmem:[#allocation6 + $0x600] sm:$0xf0]  ;;  %v5848_v39 = vor.u32 %v6563_v33, %v5845_v35  ;;  %v6396_v33 = vld [vmem:[#allocation6 + $0x18] sm:$0xf0]  ;;  %v5951_v35 = vld [vmem:[#allocation6 + $0x620] sm:$0xf] }
 0x186   :  { %v1929_v38 = vadd.f32 %v1928_v21, %v1916_v27  ;;  %v5924_v47 = vor.u32 %v6585_v45, %v5923_v24  ;;  %v6570_v21 = vld [vmem:[#allocation6 + $0x588] sm:$0xf0]  ;;  %v6421_v27 = vld [vmem:[#allocation6 + $0xe0] sm:$0xf0]  ;;  %v716_v45 = vperm.slane %v6981_v11, 3 }
 0x187   :  { %v5864_v22 = vor.u32 %v6570_v21, %v5863_v19  ;;  %v6558_v24 = vld [vmem:[#allocation6 + $0x52c] sm:$0xf] }
 0x188   :  { %3461 = vmatpush.bf16.msra.mxu3 %v5188_v56  ;;  %3443 = vmatpush.bf16.msra.mxu2 %v5924_v47  ;;  %v5903_v56 = vld [vmem:[#allocation6 + $0x5c8] sm:$0xf] }
 0x189   :  { %3474 = vmatpush.bf16.msrb.mxu0 %v5348_v60  ;;  %3481 = vmatpush.bf16.msrb.mxu1 %v5628_v12  ;;  %v5904_v60 = vor.u32 %v6580_v57, %v5903_v56  ;;  %v5888_v12 = vor.u32 %v6573_v5, %v5885_v8  ;;  %v6551_v5 = vld [vmem:[#allocation6 + $0x4f0] sm:$0xf0]  ;;  %v5765_v8 = vld [vmem:[#allocation6 + $0x4c4] sm:$0xf0] }
 0x18c   :  { %3462 = vmatpush.bf16.msra.mxu3 %v5168_v2  ;;  %v6431_v2 = vld [vmem:[#allocation6 + $0x130] sm:$0xf0]  ;;  %3444 = vmatpush.bf16.msra.mxu2 %v5904_v60  ;;  %v5232_v60 = vor.u32 %v6411_v51, %v5231_v50  ;;  %v6586_v50 = vld [vmem:[#allocation6 + $0x608] sm:$0xf0] }
 0x18d   :  { %3475 = vmatpush.bf16.msrb.mxu0 %v5328_v4  ;;  %3482 = vmatpush.bf16.msrb.mxu1 %v5608_v17  ;;  %v7005_v29 = vpop.f32.mrf.mxu0  ;;  %v1930_v41 = vpop.f32.mrf.mxu1  ;;  %v6575_v4 = vld [vmem:[#allocation6 + $0x5b0] sm:$0xf0]  ;;  %v5312_v10 = vor.u32 %v6431_v2, %v5311_v40  ;;  %v5291_v17 = vld [vmem:[#allocation6 + $0xf8] sm:$0xf] }
 0x18e   :  { %v1941_v26 = vpop.f32.mrf.mxu2  ;;  %v5884_v7 = vor.u32 %v6575_v4, %v5883_v3  ;;  %v5292_v16 = vor.u32 %v6426_v58, %v5291_v17  ;;  %v5251_v41 = vld [vmem:[#allocation6 + $0xa8] sm:$0xf]  ;;  %v5211_v2 = vld [vmem:[#allocation6 + $0x58] sm:$0xf]  ;;  %v6406_v3 = vld [vmem:[#allocation6 + $0x68] sm:$0xf0]  ;;  %v5788_v4 = vor.u32 %v6548_v62, %v5785_v63 }
 0x18f   :  { %v1942_v42 = vadd.f32 %v1941_v26, %v1929_v38  ;;  %v5271_v26 = vld [vmem:[#allocation6 + $0xd0] sm:$0xf] }
 0x190   :  { %3507 = vmatpush.bf16.msrb.mxu3 %v5948_v34  ;;  %3445 = vmatpush.bf16.msra.mxu2 %v5884_v7  ;;  %v5272_v36 = vor.u32 %v6421_v27, %v5271_v26  ;;  %v6416_v34 = vld [vmem:[#allocation6 + $0xb8] sm:$0xf0]  ;;  %v5191_v58 = vld [vmem:[#allocation6 + $0x30] sm:$0xf] }
 0x191   :  { %3483 = vmatpush.bf16.msrb.mxu1 %v5588_v20  ;;  %v6568_v20 = vld [vmem:[#allocation6 + $0x57c] sm:$0xf]  ;;  %v5252_v47 = vor.u32 %v6416_v34, %v5251_v41  ;;  %v5731_v41 = vld [vmem:[#allocation6 + $0x468] sm:$0xf]  ;;  %v5911_v63 = vld [vmem:[#allocation6 + $0x5d0] sm:$0xf] }
 0x192   :  { %v1954_v46 = vpop.f32.mrf.mxu3  ;;  %3463 = vmatmul.bf16.vlgmr.msra.gmra.mxu3 %v6996_v31 }
 0x193   :  { %v1955_v52 = vadd.f32 %v1954_v46, %v1942_v42  ;;  %v6560_v42 = vld [vmem:[#allocation6 + $0x538] sm:$0xf0]  ;;  %v5825_v46 = vld [vmem:[#allocation6 + $0x53c] sm:$0xf0] }
 0x194   :  { %3508 = vmatpush.bf16.msrb.mxu3 %v5928_v53  ;;  %3446 = vmatpush.bf16.msra.mxu2 %v5864_v22  ;;  %v5828_v48 = vor.u32 %v6558_v24, %v5825_v46  ;;  %v5803_v53 = vld [vmem:[#allocation6 + $0x500] sm:$0xf]  ;;  %v6471_v24 = vld [vmem:[#allocation6 + $0x270] sm:$0xf0] }
 0x195   :  { %3484 = vmatpush.bf16.msrb.mxu1 %v5568_v25  ;;  %6666 = vtanh.f32 %v1955_v52  ;;  %v1969_v55 = vpop.f32.mrf.mxu0  ;;  %v5868_v25 = vor.u32 %v6568_v20, %v5865_v23  ;;  %v6538_v23 = vld [vmem:[#allocation6 + $0x48c] sm:$0xf] }
 0x196   :  { %v1943_v54 = vpop.f32.mrf.mxu2  ;;  %v1968_v55 = vadd.f32 %v7005_v29, %v716_v45  ;;  %v6543_v29 = vld [vmem:[#allocation6 + $0x4b4] sm:$0xf] }
 0x197   :  { %v6553_v54 = vld [vmem:[#allocation6 + $0x504] sm:$0xf]  ;;  %v5768_v49 = vor.u32 %v6543_v29, %v5765_v8 }
 0x198   :  { %3509 = vmatpush.bf16.msrb.mxu3 %v5908_v0  ;;  %3447 = vmatpush.bf16.msra.mxu2 %v5844_v37  ;;  %v5808_v61 = vor.u32 %v6553_v54, %v5805_v59  ;;  %v5791_v0 = vld [vmem:[#allocation6 + $0x4e0] sm:$0xf] }
 0x199   :  { %3485 = vmatpush.bf16.msrb.mxu1 %v5548_v44  ;;  %v5823_v44 = vld [vmem:[#allocation6 + $0x528] sm:$0xf]  ;;  %v5711_v54 = vld [vmem:[#allocation6 + $0x440] sm:$0xf] }
 0x19a   :  { %v1956_v6 = vpop.f32.mrf.mxu3  ;;  %v5824_v28 = vor.u32 %v6560_v42, %v5823_v44  ;;  %v5172_v44 = vor.u32 %v6396_v33, %v5171_v32  ;;  %v5471_v42 = vld [vmem:[#allocation6 + $0x260] sm:$0xf]  ;;  %v5645_v32 = vld [vmem:[#allocation6 + $0x3d4] sm:$0xf0]  ;;  %v5651_v33 = vld [vmem:[#allocation6 + $0x3c8] sm:$0xf] }
 0x19b   :  { %v6667_v9 = vpop.eup %6666  ;;  %v5792_v6 = vor.u32 %v6551_v5, %v5791_v0  ;;  %v6581_v0 = vld [vmem:[#allocation6 + $0x5e0] sm:$0xf0] }
 0x19c   :  { %v7008_v14 = vpack.c.bf16 %v6667_v9, %v6667_v9  ;;  %3510 = vmatpush.bf16.msrb.mxu3 %v5888_v12  ;;  %3448 = vmatpush.bf16.msra.mxu2 %v5824_v28  ;;  %v5771_v9 = vld [vmem:[#allocation6 + $0x4b8] sm:$0xf]  ;;  %v5212_v12 = vor.u32 %v6406_v3, %v5211_v2  ;;  %v6536_v28 = vld [vmem:[#allocation6 + $0x478] sm:$0xf0]  ;;  %v5685_v2 = vld [vmem:[#allocation6 + $0x424] sm:$0xf0]  ;;  %v5912_v29 = vor.u32 %v6581_v0, %v5911_v63 }
 0x19d   :  { %3486 = vmatpush.bf16.msrb.mxu1 %v5528_v43  ;;  %v6555_v43 = vld [vmem:[#allocation6 + $0x510] sm:$0xf0]  ;;  %v5772_v19 = vor.u32 %v6546_v13, %v5771_v9  ;;  %v5691_v3 = vld [vmem:[#allocation6 + $0x418] sm:$0xf]  ;;  %v6461_v5 = vld [vmem:[#allocation6 + $0x220] sm:$0xf0] }
 0x19e   :  { %3424 = vmatmul.bf16.vlgmr.msra.gmra.mxu0 %v7008_v14  ;;  %v5804_v57 = vor.u32 %v6555_v43, %v5803_v53  ;;  %v6528_v53 = vld [vmem:[#allocation6 + $0x43c] sm:$0xf]  ;;  %v5705_v43 = vld [vmem:[#allocation6 + $0x44c] sm:$0xf0]  ;;  %v6518_v13 = vld [vmem:[#allocation6 + $0x3ec] sm:$0xf] }
 0x19f   :  { %3520 = vmatpush.bf16.msra.mxu0 %v5312_v10  ;;  %v5708_v59 = vor.u32 %v6528_v53, %v5705_v43  ;;  %v6549_v63 = vld [vmem:[#allocation6 + $0x4e4] sm:$0xf]  ;;  %v5793_v0 = vld [vmem:[#allocation6 + $0x4f4] sm:$0xf0] }
 0x1a0   :  { %3511 = vmatpush.bf16.msrb.mxu3 %v5868_v25  ;;  %3449 = vmatpush.bf16.msra.mxu2 %v5804_v57  ;;  %v5751_v25 = vld [vmem:[#allocation6 + $0x490] sm:$0xf]  ;;  %v6466_v57 = vld [vmem:[#allocation6 + $0x248] sm:$0xf0] }
 0x1a1   :  { %3487 = vmatpush.bf16.msrb.mxu1 %v5508_v1  ;;  %v5752_v37 = vor.u32 %v6541_v30, %v5751_v25  ;;  %v6571_v25 = vld [vmem:[#allocation6 + $0x590] sm:$0xf0]  ;;  %v6513_v30 = vld [vmem:[#allocation6 + $0x3c4] sm:$0xf] }
 0x1a3   :  { %3521 = vmatpush.bf16.msra.mxu0 %v5292_v16  ;;  %v5745_v16 = vld [vmem:[#allocation6 + $0x49c] sm:$0xf0] }
 0x1a4   :  { %3512 = vmatpush.bf16.msrb.mxu3 %v5848_v39  ;;  %3494 = vmatpush.bf16.msrb.mxu2 %v5788_v4  ;;  %v5748_v27 = vor.u32 %v6538_v23, %v5745_v16  ;;  %v6533_v39 = vld [vmem:[#allocation6 + $0x464] sm:$0xf]  ;;  %v5431_v4 = vld [vmem:[#allocation6 + $0x210] sm:$0xf]  ;;  %v5871_v16 = vld [vmem:[#allocation6 + $0x580] sm:$0xf] }
 0x1a5   :  { %3488 = vmatpush.bf16.msrb.mxu1 %v5488_v18  ;;  %v1980_v38 = vpop.f32.mrf.mxu1  ;;  %v6401_v18 = vld [vmem:[#allocation6 + $0x40] sm:$0xf0] }
 0x1a6   :  { %v1981_v1 = vadd.f32 %v1980_v38, %v1968_v55  ;;  %v5192_v26 = vor.u32 %v6401_v18, %v5191_v58  ;;  %v5725_v38 = vld [vmem:[#allocation6 + $0x474] sm:$0xf0]  ;;  %v5671_v58 = vld [vmem:[#allocation6 + $0x3f0] sm:$0xf]  ;;  %v5411_v18 = vld [vmem:[#allocation6 + $0x1e8] sm:$0xf] }
 0x1a7   :  { %3522 = vmatpush.bf16.msra.mxu0 %v5272_v36  ;;  %v6591_v36 = vld [vmem:[#allocation6 + $0x630] sm:$0xf0]  ;;  %v5728_v45 = vor.u32 %v6533_v39, %v5725_v38  ;;  %v5648_v39 = vor.u32 %v6513_v30, %v5645_v32  ;;  %v6516_v38 = vld [vmem:[#allocation6 + $0x3d8] sm:$0xf0]  ;;  %v6414_v32 = vld [vmem:[#allocation6 + $0xac] sm:$0xf] }
 0x1a8   :  { %3513 = vmatpush.bf16.msrb.mxu3 %v5828_v48  ;;  %3495 = vmatpush.bf16.msrb.mxu2 %v5768_v49  ;;  %v5952_v46 = vor.u32 %v6591_v36, %v5951_v35  ;;  %v5931_v48 = vld [vmem:[#allocation6 + $0x5f8] sm:$0xf]  ;;  %v5432_v49 = vor.u32 %v6461_v5, %v5431_v4  ;;  %v5391_v35 = vld [vmem:[#allocation6 + $0x1c0] sm:$0xf]  ;;  %v6451_v36 = vld [vmem:[#allocation6 + $0x1d0] sm:$0xf0] }
 0x1a9   :  { %v6429_v4 = vld [vmem:[#allocation6 + $0x124] sm:$0xf]  ;;  %v5313_v5 = vld [vmem:[#allocation6 + $0x134] sm:$0xf0] }
 0x1ab   :  { %3523 = vmatpush.bf16.msra.mxu0 %v5252_v47  ;;  %v5732_v47 = vor.u32 %v6536_v28, %v5731_v41  ;;  %v5872_v41 = vor.u32 %v6571_v25, %v5871_v16  ;;  %v5371_v28 = vld [vmem:[#allocation6 + $0x198] sm:$0xf]  ;;  %v6534_v25 = vld [vmem:[#allocation6 + $0x46c] sm:$0xf] }
 0x1ac   :  { %3514 = vmatpush.bf16.msrb.mxu3 %v5808_v61  ;;  %3496 = vmatpush.bf16.msrb.mxu2 %v5748_v27  ;;  %v5932_v61 = vor.u32 %v6586_v50, %v5931_v48  ;;  %v5831_v50 = vld [vmem:[#allocation6 + $0x530] sm:$0xf] }
 0x1ad   :  { %v2019_v56 = vpop.f32.mrf.mxu0  ;;  %v1982_v40 = vpop.f32.mrf.mxu1 }
 0x1ae   :  { %v1993_v52 = vpop.f32.mrf.mxu2  ;;  %3476 = vmatmul.bf16.vlgmr.msrb.gmra.mxu0 %v7000_v15  ;;  %v6523_v40 = vld [vmem:[#allocation6 + $0x414] sm:$0xf] }
 0x1af   :  { %v1994_v7 = vadd.f32 %v1993_v52, %v1981_v1  ;;  %3524 = vmatpush.bf16.msra.mxu0 %v5232_v60  ;;  %v5472_v52 = vor.u32 %v6471_v24, %v5471_v42  ;;  %v6531_v60 = vld [vmem:[#allocation6 + $0x450] sm:$0xf0]  ;;  %v5851_v42 = vld [vmem:[#allocation6 + $0x558] sm:$0xf]  ;;  %v6566_v24 = vld [vmem:[#allocation6 + $0x568] sm:$0xf0] }
 0x1b0   :  { %3559 = vmatpush.bf16.msra.mxu3 %v5792_v6  ;;  %3497 = vmatpush.bf16.msrb.mxu2 %v5728_v45  ;;  %v5712_v62 = vor.u32 %v6531_v60, %v5711_v54  ;;  %v5688_v6 = vor.u32 %v6523_v40, %v5685_v2  ;;  %v5392_v45 = vor.u32 %v6451_v36, %v5391_v35  ;;  %v5351_v54 = vld [vmem:[#allocation6 + $0x170] sm:$0xf]  ;;  %v5811_v60 = vld [vmem:[#allocation6 + $0x508] sm:$0xf]  ;;  %v6436_v40 = vld [vmem:[#allocation6 + $0x158] sm:$0xf0] }
 0x1b1   :  { %v5852_v48 = vor.u32 %v6566_v24, %v5851_v42  ;;  %v6529_v36 = vld [vmem:[#allocation6 + $0x444] sm:$0xf]  ;;  %v5633_v42 = vld [vmem:[#allocation6 + $0x3b4] sm:$0xf0] }
 0x1b2   :  { %v2006_v10 = vpop.f32.mrf.mxu3  ;;  %v6409_v24 = vld [vmem:[#allocation6 + $0x84] sm:$0xf] }
 0x1b3   :  { %v2007_v17 = vadd.f32 %v2006_v10, %v1994_v7  ;;  %3525 = vmatpush.bf16.msra.mxu0 %v5212_v12  ;;  %v6526_v7 = vld [vmem:[#allocation6 + $0x428] sm:$0xf0]  ;;  %v5891_v10 = vld [vmem:[#allocation6 + $0x5a8] sm:$0xf]  ;;  %v6576_v12 = vld [vmem:[#allocation6 + $0x5b8] sm:$0xf0] }
 0x1b4   :  { %3560 = vmatpush.bf16.msra.mxu3 %v5772_v19  ;;  %3498 = vmatpush.bf16.msrb.mxu2 %v5708_v59  ;;  %v5692_v8 = vor.u32 %v6526_v7, %v5691_v3  ;;  %v6456_v19 = vld [vmem:[#allocation6 + $0x1f8] sm:$0xf0]  ;;  %v717_v59 = vperm.slane %v6981_v11, 4  ;;  %v5796_v7 = vor.u32 %v6549_v63, %v5793_v0  ;;  %v5773_v11 = vld [vmem:[#allocation6 + $0x4cc] sm:$0xf0] }
 0x1b5   :  { %v2020_v20 = vadd.f32 %v2019_v56, %v2007_v17  ;;  %v2021_v22 = vpop.f32.mrf.mxu0  ;;  %v5451_v56 = vld [vmem:[#allocation6 + $0x238] sm:$0xf]  ;;  %v5665_v17 = vld [vmem:[#allocation6 + $0x3fc] sm:$0xf0]  ;;  %v5412_v27 = vor.u32 %v6456_v19, %v5411_v18  ;;  %v6539_v18 = vld [vmem:[#allocation6 + $0x494] sm:$0xf] }
 0x1b6   :  { %v1995_v21 = vpop.f32.mrf.mxu2  ;;  %v5452_v1 = vor.u32 %v6466_v57, %v5451_v56  ;;  %v5892_v22 = vor.u32 %v6576_v12, %v5891_v10  ;;  %v6441_v56 = vld [vmem:[#allocation6 + $0x180] sm:$0xf0]  ;;  %v5316_v12 = vor.u32 %v6429_v4, %v5313_v5  ;;  %v5753_v19 = vld [vmem:[#allocation6 + $0x4a4] sm:$0xf0]  ;;  %v6499_v4 = vld [vmem:[#allocation6 + $0x354] sm:$0xf] }
 0x1b7   :  { %6668 = vtanh.f32 %v2020_v20  ;;  %3526 = vmatpush.bf16.msra.mxu0 %v5192_v26  ;;  %v5668_v21 = vor.u32 %v6518_v13, %v5665_v17  ;;  %v6521_v20 = vld [vmem:[#allocation6 + $0x400] sm:$0xf0]  ;;  %v5293_v13 = vld [vmem:[#allocation6 + $0x10c] sm:$0xf0]  ;;  %v5673_v63 = vld [vmem:[#allocation6 + $0x404] sm:$0xf0] }
 0x1b8   :  { %3561 = vmatpush.bf16.msra.mxu3 %v5752_v37  ;;  %3499 = vmatpush.bf16.msrb.mxu2 %v5688_v6  ;;  %v5672_v23 = vor.u32 %v6521_v20, %v5671_v58  ;;  %v6419_v20 = vld [vmem:[#allocation6 + $0xd4] sm:$0xf] }
 0x1ba   :  { %v2008_v34 = vpop.f32.mrf.mxu3 }
 0x1bb   :  { %3527 = vmatpush.bf16.msra.mxu0 %v5172_v44  ;;  %v5652_v34 = vor.u32 %v6516_v38, %v5651_v33  ;;  %v5253_v33 = vld [vmem:[#allocation6 + $0xbc] sm:$0xf0] }
 0x1bc   :  { %3562 = vmatpush.bf16.msra.mxu3 %v5732_v47  ;;  %3500 = vmatpush.bf16.msrb.mxu2 %v5668_v21  ;;  %v5256_v38 = vor.u32 %v6414_v32, %v5253_v33  ;;  %v5551_v32 = vld [vmem:[#allocation6 + $0x300] sm:$0xf]  ;;  %v6491_v33 = vld [vmem:[#allocation6 + $0x310] sm:$0xf0] }
 0x1bd   :  { %v6669_v51 = vpop.eup %6668 }
 0x1be   :  { %v7014_v55 = vpack.c.bf16 %v6669_v51, %v6669_v51  ;;  %3528 = vmatmul.bf16.vlgmr.msra.gmra.mxu0 %v6996_v31  ;;  %v6561_v51 = vld [vmem:[#allocation6 + $0x540] sm:$0xf0] }
 0x1bf   :  { %3572 = vmatpush.bf16.msrb.mxu0 %v5952_v46  ;;  %v6446_v46 = vld [vmem:[#allocation6 + $0x1a8] sm:$0xf0]  ;;  %v5832_v57 = vor.u32 %v6561_v51, %v5831_v50 }
 0x1c0   :  { %3437 = vmatmul.bf16.vlgmr.msra.gmra.mxu1 %v7014_v55  ;;  %3563 = vmatpush.bf16.msra.mxu3 %v5712_v62  ;;  %v5372_v53 = vor.u32 %v6446_v46, %v5371_v28  ;;  %v5352_v62 = vor.u32 %v6441_v56, %v5351_v54  ;;  %v6524_v46 = vld [vmem:[#allocation6 + $0x41c] sm:$0xf]  ;;  %v6506_v54 = vld [vmem:[#allocation6 + $0x388] sm:$0xf0] }
 0x1c1   :  { %3533 = vmatpush.bf16.msra.mxu1 %v5472_v52  ;;  %3501 = vmatpush.bf16.msrb.mxu2 %v5648_v39  ;;  %v5713_v39 = vld [vmem:[#allocation6 + $0x454] sm:$0xf0]  ;;  %v6504_v56 = vld [vmem:[#allocation6 + $0x37c] sm:$0xf] }
 0x1c3   :  { %3573 = vmatpush.bf16.msrb.mxu0 %v5932_v61  ;;  %v6556_v61 = vld [vmem:[#allocation6 + $0x518] sm:$0xf0] }
 0x1c4   :  { %3564 = vmatpush.bf16.msra.mxu3 %v5692_v8  ;;  %v5812_v3 = vor.u32 %v6556_v61, %v5811_v60  ;;  %v6544_v8 = vld [vmem:[#allocation6 + $0x4bc] sm:$0xf]  ;;  %v5213_v61 = vld [vmem:[#allocation6 + $0x6c] sm:$0xf0] }
 0x1c5   :  { %v7018_v9 = vpop.f32.mrf.mxu1  ;;  %3534 = vmatpush.bf16.msra.mxu1 %v5452_v1  ;;  %v5331_v1 = vld [vmem:[#allocation6 + $0x148] sm:$0xf]  ;;  %v5776_v58 = vor.u32 %v6544_v8, %v5773_v11  ;;  %v6404_v60 = vld [vmem:[#allocation6 + $0x5c] sm:$0xf]  ;;  %v6514_v8 = vld [vmem:[#allocation6 + $0x3cc] sm:$0xf] }
 0x1c6   :  { %v2033_v6 = vadd.f32 %v7018_v9, %v717_v59  ;;  %v5273_v9 = vld [vmem:[#allocation6 + $0xe4] sm:$0xf0]  ;;  %v5613_v59 = vld [vmem:[#allocation6 + $0x38c] sm:$0xf0]  ;;  %v5653_v11 = vld [vmem:[#allocation6 + $0x3dc] sm:$0xf0] }
 0x1c7   :  { %3574 = vmatpush.bf16.msrb.mxu0 %v5912_v29  ;;  %v5332_v29 = vor.u32 %v6436_v40, %v5331_v1  ;;  %v5276_v30 = vor.u32 %v6419_v20, %v5273_v9  ;;  %v5616_v1 = vor.u32 %v6504_v56, %v5613_v59  ;;  %v5216_v40 = vor.u32 %v6404_v60, %v5213_v61  ;;  %v5573_v20 = vld [vmem:[#allocation6 + $0x33c] sm:$0xf0]  ;;  %v6394_v9 = vld [vmem:[#allocation6 + $0xc] sm:$0xf]  ;;  %v5511_v59 = vld [vmem:[#allocation6 + $0x2b0] sm:$0xf] }
 0x1c8   :  { %3565 = vmatpush.bf16.msra.mxu3 %v5672_v23  ;;  %v5756_v23 = vor.u32 %v6539_v18, %v5753_v19  ;;  %v6496_v18 = vld [vmem:[#allocation6 + $0x338] sm:$0xf0]  ;;  %v6494_v19 = vld [vmem:[#allocation6 + $0x32c] sm:$0xf]  ;;  %v6481_v60 = vld [vmem:[#allocation6 + $0x2c0] sm:$0xf0] }
 0x1c9   :  { %3535 = vmatpush.bf16.msra.mxu1 %v5432_v49  ;;  %v6424_v49 = vld [vmem:[#allocation6 + $0xfc] sm:$0xf] }
 0x1ca   :  { %v5296_v21 = vor.u32 %v6424_v49, %v5293_v13  ;;  %v6512_v49 = vld [vmem:[#allocation6 + $0x3b8] sm:$0xf0] }
 0x1cb   :  { %3575 = vmatpush.bf16.msrb.mxu0 %v5892_v22 }
 0x1cc   :  { %3566 = vmatpush.bf16.msra.mxu3 %v5652_v34  ;;  %v6509_v34 = vld [vmem:[#allocation6 + $0x3a4] sm:$0xf] }
 0x1cd   :  { %v7020_v37 = vpop.f32.mrf.mxu0  ;;  %v2034_v44 = vpop.f32.mrf.mxu1  ;;  %3536 = vmatpush.bf16.msra.mxu1 %v5412_v27 }
 0x1ce   :  { %v2045_v26 = vpop.f32.mrf.mxu2  ;;  %v5716_v44 = vor.u32 %v6529_v36, %v5713_v39  ;;  %v6489_v36 = vld [vmem:[#allocation6 + $0x304] sm:$0xf]  ;;  %v5553_v39 = vld [vmem:[#allocation6 + $0x314] sm:$0xf0] }
 0x1cf   :  { %3576 = vmatpush.bf16.msrb.mxu0 %v5872_v41  ;;  %v2046_v10 = vadd.f32 %v2045_v26, %v2033_v6  ;;  %v5733_v26 = vld [vmem:[#allocation6 + $0x47c] sm:$0xf0]  ;;  %v5593_v6 = vld [vmem:[#allocation6 + $0x364] sm:$0xf0] }
 0x1d0   :  { %3489 = vmatmul.bf16.vlgmr.msrb.gmra.mxu1 %v7008_v14  ;;  %v5736_v35 = vor.u32 %v6534_v25, %v5733_v26  ;;  %v5631_v41 = vld [vmem:[#allocation6 + $0x3a0] sm:$0xf]  ;;  %v5596_v13 = vor.u32 %v6499_v4, %v5593_v6  ;;  %v5953_v25 = vld [vmem:[#allocation6 + $0x634] sm:$0xf0]  ;;  %v5512_v6 = vor.u32 %v6481_v60, %v5511_v59 }
 0x1d1   :  { %3537 = vmatpush.bf16.msra.mxu1 %v5392_v45  ;;  %v5233_v45 = vld [vmem:[#allocation6 + $0x94] sm:$0xf0]  ;;  %v5893_v4 = vld [vmem:[#allocation6 + $0x5bc] sm:$0xf0] }
 0x1d2   :  { %v2058_v47 = vpop.f32.mrf.mxu3 }
 0x1d3   :  { %3577 = vmatpush.bf16.msrb.mxu0 %v5852_v48  ;;  %v2059_v17 = vadd.f32 %v2058_v47, %v2046_v10  ;;  %v5693_v47 = vld [vmem:[#allocation6 + $0x42c] sm:$0xf0] }
 0x1d5   :  { %v2073_v43 = vpop.f32.mrf.mxu0  ;;  %3538 = vmatpush.bf16.msra.mxu1 %v5372_v53  ;;  %v2072_v22 = vadd.f32 %v7020_v37, %v2059_v17  ;;  %v6511_v37 = vld [vmem:[#allocation6 + $0x3b0] sm:$0xf0]  ;;  %v5236_v53 = vor.u32 %v6409_v24, %v5233_v45  ;;  %v5556_v24 = vor.u32 %v6489_v36, %v5553_v39  ;;  %v5531_v45 = vld [vmem:[#allocation6 + $0x2d8] sm:$0xf]  ;;  %v5459_v39 = vld [vmem:[#allocation6 + $0x240] sm:$0xf] }
 0x1d6   :  { %v2047_v52 = vpop.f32.mrf.mxu2  ;;  %v5632_v50 = vor.u32 %v6511_v37, %v5631_v41  ;;  %v5611_v43 = vld [vmem:[#allocation6 + $0x378] sm:$0xf]  ;;  %v6507_v37 = vld [vmem:[#allocation6 + $0x390] sm:$0xf0] }
 0x1d7   :  { %3578 = vmatpush.bf16.msrb.mxu0 %v5832_v57  ;;  %v5636_v52 = vor.u32 %v6509_v34, %v5633_v42  ;;  %v5696_v57 = vor.u32 %v6524_v46, %v5693_v47  ;;  %v5612_v0 = vor.u32 %v6506_v54, %v5611_v43  ;;  %v6584_v34 = vld [vmem:[#allocation6 + $0x5fc] sm:$0xf]  ;;  %v5552_v42 = vor.u32 %v6491_v33, %v5551_v32  ;;  %v6579_v43 = vld [vmem:[#allocation6 + $0x5d4] sm:$0xf]  ;;  %v5913_v54 = vld [vmem:[#allocation6 + $0x5e4] sm:$0xf0] }
 0x1d8   :  { %v6464_v32 = vld [vmem:[#allocation6 + $0x23c] sm:$0xf]  ;;  %v5453_v33 = vld [vmem:[#allocation6 + $0x24c] sm:$0xf0]  ;;  %v6487_v36 = vld [vmem:[#allocation6 + $0x2f0] sm:$0xf0] }
 0x1d9   :  { %3539 = vmatpush.bf16.msra.mxu1 %v5352_v62  ;;  %v6519_v62 = vld [vmem:[#allocation6 + $0x3f4] sm:$0xf] }
 0x1da   :  { %v2060_v2 = vpop.f32.mrf.mxu3  ;;  %v5676_v5 = vor.u32 %v6519_v62, %v5673_v63  ;;  %v5916_v62 = vor.u32 %v6579_v43, %v5913_v54  ;;  %v6479_v63 = vld [vmem:[#allocation6 + $0x2b4] sm:$0xf]  ;;  %v6462_v43 = vld [vmem:[#allocation6 + $0x228] sm:$0xf0] }
 0x1db   :  { %3579 = vmatpush.bf16.msrb.mxu0 %v5812_v3  ;;  %v5591_v2 = vld [vmem:[#allocation6 + $0x350] sm:$0xf]  ;;  %v6501_v3 = vld [vmem:[#allocation6 + $0x360] sm:$0xf0]  ;;  %v6559_v54 = vld [vmem:[#allocation6 + $0x534] sm:$0xf] }
 0x1dc   :  { %v5592_v10 = vor.u32 %v6501_v3, %v5591_v2  ;;  %v6497_v2 = vld [vmem:[#allocation6 + $0x340] sm:$0xf0]  ;;  %v6574_v3 = vld [vmem:[#allocation6 + $0x5ac] sm:$0xf] }
 0x1dd   :  { %3540 = vmatpush.bf16.msra.mxu1 %v5332_v29  ;;  %v5193_v29 = vld [vmem:[#allocation6 + $0x44] sm:$0xf0] }
 0x1df   :  { %3624 = vmatpush.bf16.msra.mxu0 %v5796_v7  ;;  %v6399_v7 = vld [vmem:[#allocation6 + $0x34] sm:$0xf] }
 0x1e0   :  { %3541 = vmatmul.bf16.vlgmr.msra.gmra.mxu1 %v7000_v15  ;;  %v5196_v17 = vor.u32 %v6399_v7, %v5193_v29  ;;  %v5491_v7 = vld [vmem:[#allocation6 + $0x288] sm:$0xf] }
 0x1e1   :  { %3585 = vmatpush.bf16.msrb.mxu1 %v5316_v12  ;;  %v5639_v12 = vld [vmem:[#allocation6 + $0x3a8] sm:$0xf] }
 0x1e3   :  { %3625 = vmatpush.bf16.msra.mxu0 %v5776_v58  ;;  %v5571_v58 = vld [vmem:[#allocation6 + $0x328] sm:$0xf] }
 0x1e4   :  { %v5572_v26 = vor.u32 %v6496_v18, %v5571_v58  ;;  %v5473_v58 = vld [vmem:[#allocation6 + $0x274] sm:$0xf0]  ;;  %v6492_v18 = vld [vmem:[#allocation6 + $0x318] sm:$0xf0] }
 0x1e5   :  { %v2084_v16 = vpop.f32.mrf.mxu1  ;;  %3586 = vmatpush.bf16.msrb.mxu1 %v5296_v21  ;;  %v5656_v21 = vor.u32 %v6514_v8, %v5653_v11  ;;  %v6476_v8 = vld [vmem:[#allocation6 + $0x298] sm:$0xf0]  ;;  %v6474_v11 = vld [vmem:[#allocation6 + $0x28c] sm:$0xf] }
 0x1e6   :  { %v2085_v27 = vadd.f32 %v2084_v16, %v2072_v22  ;;  %v5173_v22 = vld [vmem:[#allocation6 + $0x1c] sm:$0xf0]  ;;  %v6589_v16 = vld [vmem:[#allocation6 + $0x624] sm:$0xf] }
 0x1e7   :  { %3626 = vmatpush.bf16.msra.mxu0 %v5756_v23  ;;  %v5640_v23 = vor.u32 %v6512_v49, %v5639_v12  ;;  %v5896_v49 = vor.u32 %v6574_v3, %v5893_v4  ;;  %v6554_v3 = vld [vmem:[#allocation6 + $0x50c] sm:$0xf]  ;;  %v5813_v4 = vld [vmem:[#allocation6 + $0x51c] sm:$0xf0] }
 0x1e8   :  { %6670 = vtanh.f32 %v2085_v27  ;;  %v5576_v27 = vor.u32 %v6494_v19, %v5573_v20  ;;  %v5479_v19 = vld [vmem:[#allocation6 + $0x268] sm:$0xf] }
 0x1e9   :  { %3587 = vmatpush.bf16.msrb.mxu1 %v5276_v30  ;;  %v5176_v30 = vor.u32 %v6394_v9, %v5173_v22  ;;  %v5492_v9 = vor.u32 %v6476_v8, %v5491_v7  ;;  %v6569_v22 = vld [vmem:[#allocation6 + $0x584] sm:$0xf]  ;;  %v6552_v8 = vld [vmem:[#allocation6 + $0x4f8] sm:$0xf0] }
 0x1eb   :  { %3627 = vmatpush.bf16.msra.mxu0 %v5736_v35  ;;  %v5956_v35 = vor.u32 %v6589_v16, %v5953_v25 }
 0x1ed   :  { %v2086_v28 = vpop.f32.mrf.mxu1  ;;  %3588 = vmatpush.bf16.msrb.mxu1 %v5256_v38  ;;  %v5619_v38 = vld [vmem:[#allocation6 + $0x380] sm:$0xf] }
 0x1ee   :  { %v6671_v48 = vpop.eup %6670  ;;  %v6486_v28 = vld [vmem:[#allocation6 + $0x2e8] sm:$0xf0]  ;;  %v5620_v46 = vor.u32 %v6507_v37, %v5619_v38  ;;  %v6467_v38 = vld [vmem:[#allocation6 + $0x250] sm:$0xf0] }
 0x1ef   :  { %v7027_v51 = vpack.c.bf16 %v6671_v48, %v6671_v48  ;;  %3628 = vmatpush.bf16.msra.mxu0 %v5716_v44  ;;  %v5933_v44 = vld [vmem:[#allocation6 + $0x60c] sm:$0xf0]  ;;  %v6484_v48 = vld [vmem:[#allocation6 + $0x2dc] sm:$0xf]  ;;  %v5532_v56 = vor.u32 %v6486_v28, %v5531_v45 }
 0x1f0   :  { %v5936_v47 = vor.u32 %v6584_v34, %v5933_v44  ;;  %v6564_v34 = vld [vmem:[#allocation6 + $0x55c] sm:$0xf]  ;;  %v5853_v44 = vld [vmem:[#allocation6 + $0x56c] sm:$0xf0] }
 0x1f1   :  { %3450 = vmatmul.bf16.vlgmr.msra.gmra.mxu2 %v7027_v51  ;;  %3515 = vmatmul.bf16.vlgmr.msrb.gmra.mxu3 %v7027_v51 }
 0x1f2   :  { %3546 = vmatpush.bf16.msra.mxu2 %v5632_v50  ;;  %3580 = vmatmul.bf16.vlgmr.msrb.gmra.mxu0 %v7027_v51  ;;  %v5533_v50 = vld [vmem:[#allocation6 + $0x2ec] sm:$0xf0] }
 0x1f3   :  { %3611 = vmatpush.bf16.msrb.mxu3 %v5636_v52  ;;  %3589 = vmatpush.bf16.msrb.mxu1 %v5236_v53  ;;  %v7032_v41 = vpop.f32.mrf.mxu2  ;;  %v5599_v52 = vld [vmem:[#allocation6 + $0x358] sm:$0xf]  ;;  %v6502_v53 = vld [vmem:[#allocation6 + $0x368] sm:$0xf0] }
 0x1f4   :  { %3629 = vmatpush.bf16.msra.mxu0 %v5696_v57  ;;  %v5536_v57 = vor.u32 %v6484_v48, %v5533_v50  ;;  %v5600_v61 = vor.u32 %v6502_v53, %v5599_v52  ;;  %v6459_v48 = vld [vmem:[#allocation6 + $0x214] sm:$0xf]  ;;  %v5433_v50 = vld [vmem:[#allocation6 + $0x224] sm:$0xf0]  ;;  %v6482_v52 = vld [vmem:[#allocation6 + $0x2c8] sm:$0xf0] }
 0x1f5   :  { %v5439_v53 = vld [vmem:[#allocation6 + $0x218] sm:$0xf] }
 0x1f6   :  { %3547 = vmatpush.bf16.msra.mxu2 %v5612_v0  ;;  %v5513_v0 = vld [vmem:[#allocation6 + $0x2c4] sm:$0xf0]  ;;  %v5440_v60 = vor.u32 %v6462_v43, %v5439_v53  ;;  %v6432_v53 = vld [vmem:[#allocation6 + $0x138] sm:$0xf0] }
 0x1f7   :  { %3612 = vmatpush.bf16.msrb.mxu3 %v5616_v1  ;;  %3590 = vmatpush.bf16.msrb.mxu1 %v5216_v40  ;;  %v5579_v1 = vld [vmem:[#allocation6 + $0x330] sm:$0xf]  ;;  %v5516_v29 = vor.u32 %v6479_v63, %v5513_v0  ;;  %v5413_v63 = vld [vmem:[#allocation6 + $0x1fc] sm:$0xf0] }
 0x1f8   :  { %3630 = vmatpush.bf16.msra.mxu0 %v5676_v5  ;;  %v7038_v5 = vld [vmem:[#allocation7] sm:$0x1f]  ;;  %v5580_v12 = vor.u32 %v6497_v2, %v5579_v1 }
 0x1f9   :  { %v2340_v20 = vperm.slane %v7038_v5, 0  ;;  %v6477_v1 = vld [vmem:[#allocation6 + $0x2a0] sm:$0xf0] }
 0x1fa   :  { %3548 = vmatpush.bf16.msra.mxu2 %v5592_v10  ;;  %v5493_v10 = vld [vmem:[#allocation6 + $0x29c] sm:$0xf0]  ;;  %v6457_v2 = vld [vmem:[#allocation6 + $0x200] sm:$0xf0] }
 0x1fb   :  { %3613 = vmatpush.bf16.msrb.mxu3 %v5596_v13  ;;  %3591 = vmatpush.bf16.msrb.mxu1 %v5196_v17  ;;  %v3401_v40 = vpop.f32.mrf.mxu2  ;;  %v5559_v13 = vld [vmem:[#allocation6 + $0x308] sm:$0xf]  ;;  %v6469_v17 = vld [vmem:[#allocation6 + $0x264] sm:$0xf]  ;;  %v5496_v16 = vor.u32 %v6474_v11, %v5493_v10  ;;  %v3400_v37 = vadd.f32 %v7032_v41, %v2340_v20  ;;  %v5856_v41 = vor.u32 %v6564_v34, %v5853_v44  ;;  %v6547_v20 = vld [vmem:[#allocation6 + $0x4d0] sm:$0xf0] }
 0x1fc   :  { %3631 = vmatpush.bf16.msra.mxu0 %v5656_v21  ;;  %v6472_v21 = vld [vmem:[#allocation6 + $0x278] sm:$0xf0]  ;;  %v5476_v25 = vor.u32 %v6469_v17, %v5473_v58  ;;  %v5419_v40 = vld [vmem:[#allocation6 + $0x1f0] sm:$0xf]  ;;  %v5399_v17 = vld [vmem:[#allocation6 + $0x1c8] sm:$0xf] }
 0x1fd   :  { %v5420_v10 = vor.u32 %v6457_v2, %v5419_v40  ;;  %v6452_v58 = vld [vmem:[#allocation6 + $0x1d8] sm:$0xf0]  ;;  %v6527_v40 = vld [vmem:[#allocation6 + $0x430] sm:$0xf0] }
 0x1fe   :  { %3549 = vmatpush.bf16.msra.mxu2 %v5572_v26  ;;  %v5560_v26 = vor.u32 %v6492_v18, %v5559_v13  ;;  %v5816_v13 = vor.u32 %v6554_v3, %v5813_v4  ;;  %v2341_v3 = vperm.slane %v7038_v5, 1  ;;  %v5279_v4 = vld [vmem:[#allocation6 + $0xd8] sm:$0xf] }
 0x1ff   :  { %3614 = vmatpush.bf16.msrb.mxu3 %v5576_v27  ;;  %3592 = vmatpush.bf16.msrb.mxu1 %v5176_v30  ;;  %v5480_v27 = vor.u32 %v6472_v21, %v5479_v19  ;;  %v5539_v30 = vld [vmem:[#allocation6 + $0x2e0] sm:$0xf] }
 0x200   :  { %3676 = vmatpush.bf16.msrb.mxu0 %v5640_v23  ;;  %v5873_v23 = vld [vmem:[#allocation6 + $0x594] sm:$0xf0]  ;;  %v5540_v28 = vor.u32 %v6487_v36, %v5539_v30  ;;  %v5779_v21 = vld [vmem:[#allocation6 + $0x4c0] sm:$0xf]  ;;  %v6439_v36 = vld [vmem:[#allocation6 + $0x174] sm:$0xf] }
 0x201   :  { %3502 = vmatmul.bf16.vlgmr.msrb.gmra.mxu2 %v7014_v55  ;;  %3567 = vmatmul.bf16.vlgmr.msra.gmra.mxu3 %v7014_v55 }
 0x202   :  { %3550 = vmatpush.bf16.msra.mxu2 %v5552_v42  ;;  %3593 = vmatmul.bf16.vlgmr.msrb.gmra.mxu1 %v6996_v31 }
 0x203   :  { %3637 = vmatpush.bf16.msra.mxu1 %v5956_v35  ;;  %3615 = vmatpush.bf16.msrb.mxu3 %v5556_v24  ;;  %v5876_v35 = vor.u32 %v6569_v22, %v5873_v23  ;;  %v5456_v24 = vor.u32 %v6464_v32, %v5453_v33  ;;  %v6444_v22 = vld [vmem:[#allocation6 + $0x19c] sm:$0xf]  ;;  %v5373_v23 = vld [vmem:[#allocation6 + $0x1ac] sm:$0xf0]  ;;  %v5759_v32 = vld [vmem:[#allocation6 + $0x498] sm:$0xf] }
 0x204   :  { %3632 = vmatmul.bf16.vlgmr.msra.gmra.mxu0 %v7014_v55  ;;  %v5376_v30 = vor.u32 %v6444_v22, %v5373_v23  ;;  %v6542_v33 = vld [vmem:[#allocation6 + $0x4a8] sm:$0xf0]  ;;  %v5219_v23 = vld [vmem:[#allocation6 + $0x60] sm:$0xf] }
 0x205   :  { %3677 = vmatpush.bf16.msrb.mxu0 %v5620_v46  ;;  %v3412_v42 = vpop.f32.mrf.mxu3  ;;  %v5460_v46 = vor.u32 %v6467_v38, %v5459_v39  ;;  %v5353_v39 = vld [vmem:[#allocation6 + $0x184] sm:$0xf0]  ;;  %v5359_v38 = vld [vmem:[#allocation6 + $0x178] sm:$0xf]  ;;  %v5760_v44 = vor.u32 %v6542_v33, %v5759_v32  ;;  %v6402_v32 = vld [vmem:[#allocation6 + $0x48] sm:$0xf0] }
 0x206   :  { %3551 = vmatpush.bf16.msra.mxu2 %v5532_v56  ;;  %v7042_v45 = vadd.f32 %v3412_v42, %v3400_v37  ;;  %v5833_v56 = vld [vmem:[#allocation6 + $0x544] sm:$0xf0]  ;;  %v6442_v37 = vld [vmem:[#allocation6 + $0x188] sm:$0xf0]  ;;  %v6639_v33 = vld [vmem:[#allocation10 + $0x30] sm:$0xff] }
 0x207   :  { %3638 = vmatpush.bf16.msra.mxu1 %v5936_v47  ;;  %3616 = vmatpush.bf16.msrb.mxu3 %v5536_v57  ;;  %v5519_v47 = vld [vmem:[#allocation6 + $0x2b8] sm:$0xf]  ;;  %v5436_v57 = vor.u32 %v6459_v48, %v5433_v50  ;;  %v5836_v0 = vor.u32 %v6559_v54, %v5833_v56  ;;  %v5333_v48 = vld [vmem:[#allocation6 + $0x15c] sm:$0xf0]  ;;  %v5339_v50 = vld [vmem:[#allocation6 + $0x150] sm:$0xf] }
 0x208   :  { %v5520_v59 = vor.u32 %v6482_v52, %v5519_v47  ;;  %v6434_v47 = vld [vmem:[#allocation6 + $0x14c] sm:$0xf]  ;;  %v5319_v52 = vld [vmem:[#allocation6 + $0x128] sm:$0xf] }
 0x209   :  { %3678 = vmatpush.bf16.msrb.mxu0 %v5600_v61  ;;  %v5499_v61 = vld [vmem:[#allocation6 + $0x290] sm:$0xf]  ;;  %v5336_v56 = vor.u32 %v6434_v47, %v5333_v48  ;;  %v5939_v47 = vld [vmem:[#allocation6 + $0x600] sm:$0xf]  ;;  %v6587_v48 = vld [vmem:[#allocation6 + $0x610] sm:$0xf0] }
 0x20a   :  { %3552 = vmatpush.bf16.msra.mxu2 %v5512_v6  ;;  %v5500_v11 = vor.u32 %v6477_v1, %v5499_v61  ;;  %v5299_v61 = vld [vmem:[#allocation6 + $0x100] sm:$0xf] }
 0x20b   :  { %3639 = vmatpush.bf16.msra.mxu1 %v5916_v62  ;;  %3617 = vmatpush.bf16.msrb.mxu3 %v5516_v29  ;;  %v6454_v62 = vld [vmem:[#allocation6 + $0x1ec] sm:$0xf]  ;;  %v5799_v29 = vld [vmem:[#allocation6 + $0x4e8] sm:$0xf]  ;;  %v5699_v1 = vld [vmem:[#allocation6 + $0x420] sm:$0xf] }
 0x20c   :  { %v5416_v7 = vor.u32 %v6454_v62, %v5413_v63  ;;  %v5800_v18 = vor.u32 %v6552_v8, %v5799_v29  ;;  %v6427_v62 = vld [vmem:[#allocation6 + $0x110] sm:$0xf0]  ;;  %v5679_v29 = vld [vmem:[#allocation6 + $0x3f8] sm:$0xf]  ;;  %v6522_v8 = vld [vmem:[#allocation6 + $0x408] sm:$0xf0] }
 0x20d   :  { %3679 = vmatpush.bf16.msrb.mxu0 %v5580_v12  ;;  %v3414_v6 = vpop.f32.mrf.mxu3  ;;  %v6449_v12 = vld [vmem:[#allocation6 + $0x1c4] sm:$0xf]  ;;  %v5300_v2 = vor.u32 %v6427_v62, %v5299_v61  ;;  %v6635_v62 = vld [vmem:[#allocation10 + $0x10] sm:$0xff] }
 0x20e   :  { %3553 = vmatpush.bf16.msra.mxu2 %v5492_v9  ;;  %v5400_v9 = vor.u32 %v6452_v58, %v5399_v17  ;;  %v6422_v6 = vld [vmem:[#allocation6 + $0xe8] sm:$0xf0]  ;;  %v5680_v17 = vor.u32 %v6522_v8, %v5679_v29  ;;  %v6577_v61 = vld [vmem:[#allocation6 + $0x5c0] sm:$0xf0]  ;;  %v6595_v29 = vld [vmem:[#allocation9 + $0x10] sm:$0xff] }
 0x20f   :  { %3640 = vmatpush.bf16.msra.mxu1 %v5896_v49  ;;  %3618 = vmatpush.bf16.msrb.mxu3 %v5496_v16  ;;  %v5393_v49 = vld [vmem:[#allocation6 + $0x1d4] sm:$0xf0]  ;;  %v5379_v16 = vld [vmem:[#allocation6 + $0x1a0] sm:$0xf]  ;;  %v6633_v8 = vld [vmem:[#allocation10] sm:$0xff] }
 0x210   :  { %v5396_v19 = vor.u32 %v6449_v12, %v5393_v49  ;;  %v5259_v12 = vld [vmem:[#allocation6 + $0xb0] sm:$0xf]  ;;  %v6417_v49 = vld [vmem:[#allocation6 + $0xc0] sm:$0xf0] }
 0x211   :  { %3680 = vmatpush.bf16.msrb.mxu0 %v5560_v26  ;;  %3554 = vmatmul.bf16.vlgmr.msra.gmra.mxu2 %v7008_v14  ;;  %v5780_v26 = vor.u32 %v6547_v20, %v5779_v21  ;;  %v5260_v21 = vor.u32 %v6417_v49, %v5259_v12  ;;  %v5239_v20 = vld [vmem:[#allocation6 + $0x88] sm:$0xf]  ;;  %v5839_v49 = vld [vmem:[#allocation6 + $0x538] sm:$0xf] }
 0x212   :  { %3598 = vmatpush.bf16.msrb.mxu2 %v5476_v25  ;;  %3619 = vmatmul.bf16.vlgmr.msrb.gmra.mxu3 %v7008_v14  ;;  %v6447_v25 = vld [vmem:[#allocation6 + $0x1b0] sm:$0xf0] }
 0x213   :  { %3663 = vmatpush.bf16.msra.mxu3 %v5480_v27  ;;  %3641 = vmatpush.bf16.msra.mxu1 %v5876_v35  ;;  %v5380_v35 = vor.u32 %v6447_v25, %v5379_v16  ;;  %v6407_v16 = vld [vmem:[#allocation6 + $0x70] sm:$0xf0]  ;;  %v6640_v25 = vld [vmem:[#allocation10 + $0x38] sm:$0xff] }
 0x215   :  { %3681 = vmatpush.bf16.msrb.mxu0 %v5540_v28  ;;  %v3464_v27 = vpop.f32.mrf.mxu3  ;;  %v6537_v28 = vld [vmem:[#allocation6 + $0x480] sm:$0xf0] }
 0x216   :  { %3599 = vmatpush.bf16.msrb.mxu2 %v5456_v24  ;;  %v5739_v24 = vld [vmem:[#allocation6 + $0x470] sm:$0xf] }
 0x217   :  { %3664 = vmatpush.bf16.msra.mxu3 %v5460_v46  ;;  %3642 = vmatpush.bf16.msra.mxu1 %v5856_v41  ;;  %v5360_v46 = vor.u32 %v6442_v37, %v5359_v38  ;;  %v6437_v41 = vld [vmem:[#allocation6 + $0x160] sm:$0xf0]  ;;  %v5740_v43 = vor.u32 %v6537_v28, %v5739_v24  ;;  %v6638_v24 = vld [vmem:[#allocation10 + $0x28] sm:$0xff] }
 0x218   :  { %v6397_v38 = vld [vmem:[#allocation6 + $0x20] sm:$0xf0] }
 0x219   :  { %3682 = vmatpush.bf16.msrb.mxu0 %v5520_v59  ;;  %v6532_v59 = vld [vmem:[#allocation6 + $0x458] sm:$0xf0] }
 0x21a   :  { %3600 = vmatpush.bf16.msrb.mxu2 %v5436_v57  ;;  %v5719_v57 = vld [vmem:[#allocation6 + $0x448] sm:$0xf]  ;;  %v6600_v37 = vld [vmem:[#allocation9 + $0x38] sm:$0xff] }
 0x21b   :  { %3665 = vmatpush.bf16.msra.mxu3 %v5440_v60  ;;  %3643 = vmatpush.bf16.msra.mxu1 %v5836_v0  ;;  %v3425_v34 = vpop.f32.mrf.mxu0  ;;  %v5320_v60 = vor.u32 %v6432_v53, %v5319_v52  ;;  %v5720_v0 = vor.u32 %v6532_v59, %v5719_v57  ;;  %v5940_v53 = vor.u32 %v6587_v48, %v5939_v47  ;;  %v6636_v57 = vld [vmem:[#allocation10 + $0x18] sm:$0xff]  ;;  %v6597_v59 = vld [vmem:[#allocation9 + $0x20] sm:$0xff] }
 0x21c   :  { %v7049_v42 = vadd.f32 %v3425_v34, %v7042_v45  ;;  %v5340_v45 = vor.u32 %v6437_v41, %v5339_v50  ;;  %v6637_v50 = vld [vmem:[#allocation10 + $0x20] sm:$0xff]  ;;  %v6598_v41 = vld [vmem:[#allocation9 + $0x28] sm:$0xff] }
 0x21d   :  { %3683 = vmatpush.bf16.msrb.mxu0 %v5500_v11  ;;  %v3466_v54 = vpop.f32.mrf.mxu3  ;;  %v5280_v11 = vor.u32 %v6422_v6, %v5279_v4  ;;  %v6634_v4 = vld [vmem:[#allocation10 + $0x8] sm:$0xff]  ;;  %v5859_v6 = vld [vmem:[#allocation6 + $0x560] sm:$0xf] }
 0x21e   :  { %3601 = vmatpush.bf16.msrb.mxu2 %v5416_v7  ;;  %v5700_v7 = vor.u32 %v6527_v40, %v5699_v1  ;;  %v5919_v54 = vld [vmem:[#allocation6 + $0x5d8] sm:$0xf] }
 0x21f   :  { %3666 = vmatpush.bf16.msra.mxu3 %v5420_v10  ;;  %3644 = vmatpush.bf16.msra.mxu1 %v5816_v13  ;;  %v3465_v10 = vadd.f32 %v3464_v27, %v2341_v3  ;;  %v5220_v27 = vor.u32 %v6407_v16, %v5219_v23  ;;  %v6572_v3 = vld [vmem:[#allocation6 + $0x598] sm:$0xf0] }
 0x220   :  { %3684 = vmatmul.bf16.vlgmr.msrb.gmra.mxu0 %v7008_v14  ;;  %v5356_v14 = vor.u32 %v6439_v36, %v5353_v39  ;;  %v5179_v39 = vld [vmem:[#allocation6 + $0x10] sm:$0xf] }
 0x221   :  { %4122 = vmatpush.bf16.msra.mxu0 %v6600_v37  ;;  %v5180_v28 = vor.u32 %v6397_v38, %v5179_v39  ;;  %v6601_v38 = vld [vmem:[#allocation9 + $0x40] sm:$0xff] }
 0x222   :  { %3602 = vmatpush.bf16.msrb.mxu2 %v5396_v19  ;;  %3645 = vmatmul.bf16.vlgmr.msra.gmra.mxu1 %v7027_v51  ;;  %v6517_v19 = vld [vmem:[#allocation6 + $0x3e0] sm:$0xf0] }
 0x223   :  { %3689 = vmatpush.bf16.msrb.mxu1 %v5800_v18  ;;  %3667 = vmatpush.bf16.msra.mxu3 %v5400_v9  ;;  %v3427_v63 = vpop.f32.mrf.mxu0  ;;  %v5659_v18 = vld [vmem:[#allocation6 + $0x3d0] sm:$0xf]  ;;  %v6412_v9 = vld [vmem:[#allocation6 + $0x98] sm:$0xf0]  ;;  %v6613_v37 = vld [vmem:[#allocation9 + $0xa0] sm:$0xff] }
 0x224   :  { %v5240_v22 = vor.u32 %v6412_v9, %v5239_v20  ;;  %v6596_v63 = vld [vmem:[#allocation9 + $0x18] sm:$0xff]  ;;  %v5819_v20 = vld [vmem:[#allocation6 + $0x510] sm:$0xf] }
 0x225   :  { %v6557_v9 = vld [vmem:[#allocation6 + $0x520] sm:$0xf0] }
 0x226   :  { %3603 = vmatpush.bf16.msrb.mxu2 %v5376_v30  ;;  %v5199_v30 = vld [vmem:[#allocation6 + $0x38] sm:$0xf]  ;;  %v5820_v16 = vor.u32 %v6557_v9, %v5819_v20 }
 0x227   :  { %3690 = vmatpush.bf16.msrb.mxu1 %v5780_v26  ;;  %3668 = vmatpush.bf16.msra.mxu3 %v5380_v35  ;;  %v5200_v35 = vor.u32 %v6402_v32, %v5199_v30  ;;  %v6615_v32 = vld [vmem:[#allocation9 + $0xb0] sm:$0xff] }
 0x22a   :  { %3604 = vmatpush.bf16.msrb.mxu2 %v5356_v14  ;;  %v6592_v14 = vld [vmem:[#allocation6 + $0x638] sm:$0xf0] }
 0x22b   :  { %3691 = vmatpush.bf16.msrb.mxu1 %v5760_v44  ;;  %3669 = vmatpush.bf16.msra.mxu3 %v5360_v46  ;;  %v3477_v13 = vpop.f32.mrf.mxu0  ;;  %v5959_v44 = vld [vmem:[#allocation6 + $0x628] sm:$0xf]  ;;  %v6599_v46 = vld [vmem:[#allocation9 + $0x30] sm:$0xff] }
 0x22c   :  { %v7054_v58 = vadd.f32 %v3477_v13, %v3465_v10  ;;  %4123 = vmatpush.bf16.msra.mxu0 %v6599_v46  ;;  %v6562_v13 = vld [vmem:[#allocation6 + $0x548] sm:$0xf0]  ;;  %v6611_v46 = vld [vmem:[#allocation9 + $0x90] sm:$0xff] }
 0x22e   :  { %3605 = vmatpush.bf16.msrb.mxu2 %v5336_v56  ;;  %v6582_v56 = vld [vmem:[#allocation6 + $0x5e8] sm:$0xf0] }
 0x22f   :  { %3692 = vmatpush.bf16.msrb.mxu1 %v5740_v43  ;;  %3670 = vmatpush.bf16.msra.mxu3 %v5340_v45  ;;  %v5920_v45 = vor.u32 %v6582_v56, %v5919_v54 }
 0x230   :  { %4124 = vmatpush.bf16.msra.mxu0 %v6598_v41 }
 0x231   :  { %3606 = vmatmul.bf16.vlgmr.msrb.gmra.mxu2 %v7000_v15 }
 0x232   :  { %3650 = vmatpush.bf16.msra.mxu2 %v5320_v60  ;;  %3671 = vmatmul.bf16.vlgmr.msra.gmra.mxu3 %v7000_v15  ;;  %v5660_v15 = vor.u32 %v6517_v19, %v5659_v18  ;;  %v5899_v60 = vld [vmem:[#allocation6 + $0x5b0] sm:$0xf]  ;;  %v5840_v19 = vor.u32 %v6562_v13, %v5839_v49 }
 0x233   :  { %3693 = vmatpush.bf16.msrb.mxu1 %v5720_v0  ;;  %v3479_v26 = vpop.f32.mrf.mxu0  ;;  %3869 = vmatpush.bf16.msrb.mxu3 %v6640_v25  ;;  %v6608_v0 = vld [vmem:[#allocation9 + $0x78] sm:$0xff]  ;;  %v5900_v40 = vor.u32 %v6577_v61, %v5899_v60  ;;  %v6606_v18 = vld [vmem:[#allocation9 + $0x68] sm:$0xff] }
 0x234   :  { %4125 = vmatpush.bf16.msra.mxu0 %v6597_v59  ;;  %v6604_v25 = vld [vmem:[#allocation9 + $0x58] sm:$0xff] }
 0x235   :  { %v6616_v26 = vld [vmem:[#allocation9 + $0xb8] sm:$0xff] }
 0x236   :  { %3651 = vmatpush.bf16.msra.mxu2 %v5300_v2  ;;  %v5879_v2 = vld [vmem:[#allocation6 + $0x588] sm:$0xf] }
 0x237   :  { %3694 = vmatpush.bf16.msrb.mxu1 %v5700_v7  ;;  %3870 = vmatpush.bf16.msrb.mxu3 %v6639_v33  ;;  %v6567_v7 = vld [vmem:[#allocation6 + $0x570] sm:$0xf0] }
 0x238   :  { %4126 = vmatpush.bf16.msra.mxu0 %v6596_v63  ;;  %v5860_v12 = vor.u32 %v6567_v7, %v5859_v6  ;;  %v6602_v33 = vld [vmem:[#allocation9 + $0x48] sm:$0xff]  ;;  %v6620_v7 = vld [vmem:[#allocation9 + $0xd8] sm:$0xff] }
 0x239   :  { %v6622_v63 = vld [vmem:[#allocation9 + $0xe8] sm:$0xff] }
 0x23a   :  { %3652 = vmatpush.bf16.msra.mxu2 %v5280_v11  ;;  %v6607_v11 = vld [vmem:[#allocation9 + $0x70] sm:$0xff] }
 0x23b   :  { %3695 = vmatpush.bf16.msrb.mxu1 %v5680_v17  ;;  %v7059_v34 = vpop.f32.mrf.mxu0  ;;  %3871 = vmatpush.bf16.msrb.mxu3 %v6638_v24  ;;  %v6594_v17 = vld [vmem:[#allocation9 + $0x8] sm:$0xff] }
 0x23c   :  { %4127 = vmatpush.bf16.msra.mxu0 %v6595_v29 }
 0x23d   :  { %v7057_v36 = vpop.f32.mrf.mxu1 }
 0x23e   :  { %3653 = vmatpush.bf16.msra.mxu2 %v5260_v21  ;;  %v6682_v21 = vld [vmem:[%s7085_s0] sm:$0xf] }
 0x23f   :  { %3696 = vmatpush.bf16.msrb.mxu1 %v5660_v15  ;;  %3872 = vmatpush.bf16.msrb.mxu3 %v6637_v50  ;;  %v6593_v15 = vld [vmem:[#allocation9] sm:$0xff] }
 0x240   :  { %4128 = vmatpush.bf16.msra.mxu0 %v6594_v17  ;;  %v6618_v17 = vld [vmem:[#allocation9 + $0xc8] sm:$0xff] }
 0x242   :  { %3654 = vmatpush.bf16.msra.mxu2 %v5240_v22  ;;  %3697 = vmatmul.bf16.vlgmr.msrb.gmra.mxu1 %v7014_v55  ;;  %v5960_v55 = vor.u32 %v6592_v14, %v5959_v44  ;;  %v6605_v22 = vld [vmem:[#allocation9 + $0x60] sm:$0xff]  ;;  %v3439_v44 = vadd.f32 %v7057_v36, %v7049_v42 }
 0x243   :  { %v3531_v43 = vpop.f32.mrf.mxu0  ;;  %3873 = vmatpush.bf16.msrb.mxu3 %v6636_v57  ;;  %4135 = vmatpush.bf16.msra.mxu1 %v6608_v0  ;;  %v6609_v42 = vld [vmem:[#allocation9 + $0x80] sm:$0xff]  ;;  %v6624_v57 = vld [vmem:[#allocation9 + $0xf8] sm:$0xff] }
 0x244   :  { %4129 = vmatpush.bf16.msra.mxu0 %v6593_v15 }
 0x245   :  { %v3440_v52 = vpop.f32.mrf.mxu1 }
 0x246   :  { %3655 = vmatpush.bf16.msra.mxu2 %v5220_v27  ;;  %v6603_v27 = vld [vmem:[#allocation9 + $0x50] sm:$0xff]  ;;  %v6610_v52 = vld [vmem:[#allocation9 + $0x88] sm:$0xff] }
 0x247   :  { %3874 = vmatpush.bf16.msrb.mxu3 %v6635_v62  ;;  %4136 = vmatpush.bf16.msra.mxu1 %v6607_v11 }
 0x24a   :  { %3656 = vmatpush.bf16.msra.mxu2 %v5200_v35  ;;  %v6614_v35 = vld [vmem:[#allocation9 + $0xa8] sm:$0xff] }
 0x24b   :  { %3875 = vmatpush.bf16.msrb.mxu3 %v6634_v4  ;;  %4137 = vmatpush.bf16.msra.mxu1 %v6606_v18 }
 0x24d   :  { %v7062_v1 = vpop.f32.mrf.mxu1 }
 0x24e   :  { %3657 = vmatpush.bf16.msra.mxu2 %v5180_v28  ;;  %v6612_v28 = vld [vmem:[#allocation9 + $0x98] sm:$0xff]  ;;  %v3491_v36 = vadd.f32 %v7062_v1, %v7054_v58 }
 0x24f   :  { %3876 = vmatpush.bf16.msrb.mxu3 %v6633_v8  ;;  %4138 = vmatpush.bf16.msra.mxu1 %v6605_v22  ;;  %v2343_v22 = vperm.slane %v7038_v5, 3 }
 0x251   :  { %3658 = vmatmul.bf16.vlgmr.msra.gmra.mxu2 %v6996_v31  ;;  %v5880_v31 = vor.u32 %v6572_v3, %v5879_v2  ;;  %v2342_v2 = vperm.slane %v7038_v5, 2  ;;  %v6621_v3 = vld [vmem:[#allocation9 + $0xe0] sm:$0xff] }
 0x252   :  { %3702 = vmatpush.bf16.msrb.mxu2 %v5960_v55  ;;  %3877 = vmatmul.bf16.vlgmr.msrb.gmra.mxu3 %v6682_v21 }
 0x253   :  { %4139 = vmatpush.bf16.msra.mxu1 %v6604_v25  ;;  %4161 = vmatpush.bf16.msra.mxu3 %v6624_v57  ;;  %v3530_v4 = vadd.f32 %v7059_v34, %v2342_v2  ;;  %v6617_v34 = vld [vmem:[#allocation9 + $0xc0] sm:$0xff] }
 0x255   :  { %v3492_v10 = vpop.f32.mrf.mxu1 }
 0x256   :  { %3703 = vmatpush.bf16.msrb.mxu2 %v5940_v53  ;;  %v6619_v10 = vld [vmem:[#allocation9 + $0xd0] sm:$0xff] }
 0x257   :  { %4140 = vmatpush.bf16.msra.mxu1 %v6603_v27 }
 0x25a   :  { %3704 = vmatpush.bf16.msrb.mxu2 %v5920_v45  ;;  %v6623_v45 = vld [vmem:[#allocation9 + $0xf0] sm:$0xff] }
 0x25b   :  { %4141 = vmatpush.bf16.msra.mxu1 %v6602_v33  ;;  %4162 = vmatpush.bf16.msra.mxu3 %v6623_v45 }
 0x25d   :  { %v7067_v23 = vpop.f32.mrf.mxu1 }
 0x25e   :  { %3705 = vmatpush.bf16.msrb.mxu2 %v5900_v40 }
 0x25f   :  { %4142 = vmatpush.bf16.msra.mxu1 %v6601_v38  ;;  %4163 = vmatpush.bf16.msra.mxu3 %v6622_v63 }
 0x262   :  { %3706 = vmatpush.bf16.msrb.mxu2 %v5880_v31  ;;  %v3543_v31 = vadd.f32 %v7067_v23, %v3530_v4 }
 0x263   :  { %4164 = vmatpush.bf16.msra.mxu3 %v6621_v3 }
 0x265   :  { %v3544_v30 = vpop.f32.mrf.mxu1 }
 0x266   :  { %3707 = vmatpush.bf16.msrb.mxu2 %v5860_v12 }
 0x267   :  { %4165 = vmatpush.bf16.msra.mxu3 %v6620_v7  ;;  %v6651_v7 = vld [vmem:[%s7094_s9] ss:$0 sm:$0xff] }
 0x26a   :  { %3708 = vmatpush.bf16.msrb.mxu2 %v5840_v19 }
 0x26b   :  { %4166 = vmatpush.bf16.msra.mxu3 %v6619_v10 }
 0x26e   :  { %3709 = vmatpush.bf16.msrb.mxu2 %v5820_v16 }
 0x26f   :  { %v3581_v39 = vpop.f32.mrf.mxu0  ;;  %4167 = vmatpush.bf16.msra.mxu3 %v6618_v17 }
 0x271   :  { %3710 = vmatmul.bf16.vlgmr.msrb.gmra.mxu2 %v7027_v51 }
 0x272   :  { %4148 = vmatpush.bf16.msra.mxu2 %v6616_v26 }
 0x273   :  { %4168 = vmatpush.bf16.msra.mxu3 %v6617_v34 }
 0x274   :  { %v3451_v14 = vpop.f32.mrf.mxu2  ;;  %v3516_v24 = vpop.f32.mrf.mxu3 }
 0x275   :  { %v3452_v51 = vadd.f32 %v3451_v14, %v3439_v44  ;;  %v6630_v44 = vld [vmem:[#allocation9 + $0x128] sm:$0xff] }
 0x276   :  { %4149 = vmatpush.bf16.msra.mxu2 %v6615_v32  ;;  %v6632_v32 = vld [vmem:[#allocation9 + $0x138] sm:$0xff] }
 0x277   :  { %6672 = vtanh.f32 %v3452_v51  ;;  %v3583_v55 = vpop.f32.mrf.mxu0  ;;  %4174 = vmatpush.bf16.msrb.mxu0 %v6632_v32 }
 0x278   :  { %v6628_v55 = vld [vmem:[#allocation9 + $0x118] sm:$0xff] }
 0x27a   :  { %4150 = vmatpush.bf16.msra.mxu2 %v6614_v35  ;;  %v6631_v35 = vld [vmem:[#allocation9 + $0x130] sm:$0xff] }
 0x27b   :  { %4175 = vmatpush.bf16.msrb.mxu0 %v6631_v35 }
 0x27c   :  { %v3453_v47 = vpop.f32.mrf.mxu2  ;;  %v3518_v48 = vpop.f32.mrf.mxu3 }
 0x27d   :  { %v6673_v50 = vpop.eup %6672  ;;  %v6626_v48 = vld [vmem:[#allocation9 + $0x108] sm:$0xff] }
 0x27e   :  { %4151 = vmatpush.bf16.msra.mxu2 %v6613_v37  ;;  %v3720_v41 = vpack.c.bf16 %v6673_v50, %v6673_v50  ;;  %v6625_v50 = vld [vmem:[#allocation9 + $0x100] sm:$0xff] }
 0x27f   :  { %v3594_v53 = vpop.f32.mrf.mxu1  ;;  %4176 = vmatpush.bf16.msrb.mxu0 %v6630_v44 }
 0x280   :  { %4130 = vmatmul.bf16.vlgmr.msra.gmra.mxu0 %v3720_v41  ;;  %v3595_v23 = vadd.f32 %v3594_v53, %v2343_v22 }
 0x281   :  { %v3633_v43 = vpop.f32.mrf.mxu0 }
 0x282   :  { %4152 = vmatpush.bf16.msra.mxu2 %v6612_v28 }
 0x284   :  { %v3503_v54 = vpop.f32.mrf.mxu2  ;;  %v3568_v56 = vpop.f32.mrf.mxu3 }
 0x285   :  { %v3504_v59 = vadd.f32 %v3503_v54, %v3491_v36 }
 0x286   :  { %4153 = vmatpush.bf16.msra.mxu2 %v6611_v46  ;;  %v6627_v46 = vld [vmem:[#allocation9 + $0x110] sm:$0xff] }
 0x287   :  { %v3517_v60 = vadd.f32 %v3516_v24, %v3504_v59  ;;  %v3596_v61 = vpop.f32.mrf.mxu1  ;;  %v6629_v24 = vld [vmem:[#allocation9 + $0x120] sm:$0xff] }
 0x288   :  { %4177 = vmatpush.bf16.msrb.mxu0 %v6629_v24 }
 0x289   :  { %v3635_v62 = vpop.f32.mrf.mxu0  ;;  %6674 = vtanh.f32 %v3517_v60 }
 0x28a   :  { %4154 = vmatpush.bf16.msra.mxu2 %v6610_v52  ;;  %v2344_v52 = vperm.slane %v7038_v5, 4 }
 0x28c   :  { %v3505_v0 = vpop.f32.mrf.mxu2  ;;  %v3570_v40 = vpop.f32.mrf.mxu3  ;;  %4178 = vmatpush.bf16.msrb.mxu0 %v6628_v55 }
 0x28e   :  { %4155 = vmatpush.bf16.msra.mxu2 %v6609_v42 }
 0x28f   :  { %v6675_v58 = vpop.eup %6674 }
 0x290   :  { %v3721_v1 = vpack.c.bf16 %v6675_v58, %v6675_v58  ;;  %4179 = vmatpush.bf16.msrb.mxu0 %v6627_v46 }
 0x292   :  { %4143 = vmatmul.bf16.vlgmr.msra.gmra.mxu1 %v3721_v1 }
 0x294   :  { %v3555_v6 = vpop.f32.mrf.mxu2  ;;  %4180 = vmatpush.bf16.msrb.mxu0 %v6626_v48 }
 0x295   :  { %v3556_v29 = vadd.f32 %v3555_v6, %v3543_v31  ;;  %v3620_v8 = vpop.f32.mrf.mxu3 }
 0x297   :  { %v3569_v11 = vadd.f32 %v3568_v56, %v3556_v29 }
 0x298   :  { %4181 = vmatpush.bf16.msrb.mxu0 %v6625_v50 }
 0x299   :  { %v3582_v12 = vadd.f32 %v3581_v39, %v3569_v11 }
 0x29b   :  { %6676 = vtanh.f32 %v3582_v12 }
 0x29c   :  { %v3557_v13 = vpop.f32.mrf.mxu2 }
 0x29d   :  { %v3685_v49 = vpop.f32.mrf.mxu0  ;;  %v3622_v19 = vpop.f32.mrf.mxu3 }
 0x29f   :  { %v3646_v18 = vpop.f32.mrf.mxu1 }
 0x2a1   :  { %v6677_v21 = vpop.eup %6676 }
 0x2a2   :  { %v3722_v20 = vpack.c.bf16 %v6677_v21, %v6677_v21 }
 0x2a4   :  { %4156 = vmatmul.bf16.vlgmr.msra.gmra.mxu2 %v3722_v20 }
 0x2a5   :  { %v3687_v9 = vpop.f32.mrf.mxu0 }
 0x2a7   :  { %v3648_v15 = vpop.f32.mrf.mxu1 }
 0x2b4   :  { %v3607_v16 = vpop.f32.mrf.mxu2 }
 0x2b5   :  { %v3608_v25 = vadd.f32 %v3607_v16, %v3595_v23  ;;  %v3672_v26 = vpop.f32.mrf.mxu3 }
 0x2b7   :  { %v3621_v27 = vadd.f32 %v3620_v8, %v3608_v25 }
 0x2b9   :  { %v3634_v30 = vadd.f32 %v3633_v43, %v3621_v27 }
 0x2bb   :  { %v3647_v33 = vadd.f32 %v3646_v18, %v3634_v30 }
 0x2bc   :  { %v3609_v39 = vpop.f32.mrf.mxu2 }
 0x2bd   :  { %6678 = vtanh.f32 %v3647_v33  ;;  %v3674_v38 = vpop.f32.mrf.mxu3 }
 0x2bf   :  { %v3698_v37 = vpop.f32.mrf.mxu1 }
 0x2c3   :  { %v6679_v14 = vpop.eup %6678 }
 0x2c4   :  { %v3723_v51 = vpack.c.bf16 %v6679_v14, %v6679_v14 }
 0x2c6   :  { %4169 = vmatmul.bf16.vlgmr.msra.gmra.mxu3 %v3723_v51 }
 0x2c7   :  { %v3700_v28 = vpop.f32.mrf.mxu1 }
 0x2d4   :  { %v3659_v47 = vpop.f32.mrf.mxu2 }
 0x2d5   :  { %v3660_v53 = vadd.f32 %v3659_v47, %v2344_v52  ;;  %v3878_v43 = vpop.f32.mrf.mxu3 }
 0x2d7   :  { %v3673_v42 = vadd.f32 %v3672_v26, %v3660_v53 }
 0x2d9   :  { %v3686_v36 = vadd.f32 %v3685_v49, %v3673_v42 }
 0x2db   :  { %v3699_v56 = vadd.f32 %v3698_v37, %v3686_v36 }
 0x2dc   :  { %v3661_v41 = vpop.f32.mrf.mxu2 }
 0x2dd   :  { %v3880_v54 = vpop.f32.mrf.mxu3 }
 0x2f4   :  { %v3711_v57 = vpop.f32.mrf.mxu2 }
 0x2f5   :  { %v3712_v59 = vadd.f32 %v3711_v57, %v3699_v56 }
 0x2f7   :  { %6680 = vtanh.f32 %v3712_v59 }
 0x2fc   :  { %v3713_v45 = vpop.f32.mrf.mxu2 }
 0x2fd   :  { %v6681_v60 = vpop.eup %6680  ;;  %v4131_v62 = vpop.f32.mrf.mxu0 }
 0x2fe   :  { %v3724_v61 = vpack.c.bf16 %v6681_v60, %v6681_v60  ;;  %v4132_v63 = vadd.f32 %v4131_v62, %v3878_v43 }
 0x300   :  { %4182 = vmatmul.bf16.vlgmr.msrb.gmra.mxu0 %v3724_v61 }
 0x305   :  { %v4133_v0 = vpop.f32.mrf.mxu0 }
 0x30f   :  { %v4144_v40 = vpop.f32.mrf.mxu1 }
 0x310   :  { %v4145_v2 = vadd.f32 %v4144_v40, %v4132_v63 }
 0x317   :  { %v4146_v3 = vpop.f32.mrf.mxu1 }
 0x327   :  { %v4157_v5 = vpop.f32.mrf.mxu2 }
 0x328   :  { %v4158_v58 = vadd.f32 %v4157_v5, %v4145_v2 }
 0x32f   :  { %v4159_v1 = vpop.f32.mrf.mxu2 }
 0x349   :  { %v4170_v4 = vpop.f32.mrf.mxu3 }
 0x34a   :  { %v4171_v6 = vadd.f32 %v4170_v4, %v4158_v58 }
 0x351   :  { %v4172_v31 = vpop.f32.mrf.mxu3 }
 0x37d   :  { %v4183_v29 = vpop.f32.mrf.mxu0 }
 0x37e   :  { %v4184_v8 = vadd.f32 %v4183_v29, %v4171_v6 }
 0x380   :  { %v4191_v11 = vadd.f32 %v6651_v7, %v4184_v8 }
 0x382   :  { %4192 = vst [vmem:[%s7095_s10] sm:$0xff] %v4191_v11 }
 0x385   :  { %v4185_v10 = vpop.f32.mrf.mxu0 }
 0x386   :  { %4197 = vsyncpa [#allocation3], 1 }
 0x387   :  { %4198 = vsyncpa [#allocation5], 1 }
 0x388   :  { %4199 = vsyncpa [#allocation8], 1 }
 0x389   :  { %4200 = vsyncpa [#allocation11], 1 }

</bundles_post_ra>
